<compile_context>
chip_gen: v7x
topology: tpu7x:2x2x1
jax: 0.10.0
libtpu: 0.0.40
codegen_flags: <defaults>
</compile_context>

<pallas_src>
import functools
import math

import jax
import jax.numpy as jnp
from jax.experimental import pallas as pl
from jax.experimental.pallas import tpu as pltpu

# ----------------------------- configuration --------------------------------
PATCH_SIZE = 8
NUM_HIDDENS = 64          # num_hiddens / norm_shape = [64]
NUM_LAYERS = 2
NUM_HEADS = 4
FFN_HIDDENS = 128         # ffn_num_hiddens
MLP_HIDDENS = 128         # mlp_hiddens
MLP_OUTS = 10             # mlp_outs (classifier width)
OUT_PAD = 128             # lane-dense padded classifier width (sliced outside)
LN_EPS = 1e-5             # torch.nn.LayerNorm default
MXU_DTYPE = jnp.bfloat16  # MXU operand dtype (f32 accumulation)


# ------------------------------ kernel helpers --------------------------------
def _mxdot(a, w):
    """2-D matmul on the MXU: bf16 operands, f32 accumulation."""
    return jnp.dot(a.astype(MXU_DTYPE), w.astype(MXU_DTYPE),
                   preferred_element_type=jnp.float32)


def _layernorm(x, g, b, eps=LN_EPS):
    # One-pass statistics: E[x] and E[x^2] are independent reductions
    # (no serialized (x - mu)**2 second pass).
    m1 = jnp.mean(x, axis=-1, keepdims=True)
    m2 = jnp.mean(x * x, axis=-1, keepdims=True)
    var = m2 - m1 * m1
    return (x - m1) * jax.lax.rsqrt(var + eps) * g + b


# ------------------------------ fused kernel ----------------------------------
def cvit_kernel(tok_ref, conv_w_ref, conv_b_ref, cls_ref, pos_ref,
                wqkv_ref, wo_ref,
                ln1g_ref, ln1b_ref, w1_ref, b1_ref, w2_ref, b2_ref,
                ln2g_ref, ln2b_ref,
                hw1_ref, hb1_ref, hw2_ref, hb2_ref,
                out_ref,
                *, batch_tile, seq_len, seq_pad, num_heads, num_layers):
    Bt, S, Sp = batch_tile, seq_len, seq_pad
    H = wo_ref.shape[-1]
    NH = num_heads
    hd = H // NH
    scale = 1.0 / math.sqrt(hd)

    # ---- patch embedding: Conv2d(k == s == patch) as ONE matmul on the
    #      pre-laid-out token slab (cls/pad rows are zeros) --------------------
    emb = _mxdot(tok_ref[...], conv_w_ref[...]) + conv_b_ref[...]      # (Bt*Sp, H)
    emb = emb.reshape(Bt, Sp, H)

    # ---- insert class token (single dense where) + positional encoding ------
    tok_idx = jax.lax.broadcasted_iota(jnp.int32, (Bt, Sp, 1), 1)
    tok = jnp.where(tok_idx == 0, cls_ref[...][None, :, :], emb)
    x = (tok + pos_ref[...][None, :, :]).reshape(Bt * Sp, H)   # dropout = identity

    # ---- key-padding bias, hoisted once to full (Bt, Sp, Sp) -----------------
    key_idx = jax.lax.broadcasted_iota(jnp.int32, (Sp, Sp), 1)
    kbias = jnp.broadcast_to(
        jnp.where(key_idx < S, 0.0, -1e30).astype(jnp.float32)[None],
        (Bt, Sp, Sp))

    # ---- transformer encoder blocks (static unroll over stacked weights) ----
    for l in range(num_layers):
        # fused QKV projection: one (Bt*Sp, H) @ (H, 3H) matmul (use_bias=False)
        qkv = _mxdot(x, wqkv_ref[l])                                    # (Bt*Sp, 3H)
        q = (qkv[:, :H] * scale).reshape(Bt, Sp, H)
        k = qkv[:, H:2 * H].reshape(Bt, Sp, H)
        v = qkv[:, 2 * H:].reshape(Bt, Sp, H)

        # Per-head attention.  Mosaic dot_general supports a single batch dim,
        # so heads stay as a static unroll of 3-D batched einsums; the head
        # outputs are concatenated once and multiplied by W_o in ONE matmul.
        heads = []
        for h in range(NH):
            sl = slice(h * hd, (h + 1) * hd)
            s = jnp.einsum('bqd,bkd->bqk',
                           q[:, :, sl].astype(MXU_DTYPE),
                           k[:, :, sl].astype(MXU_DTYPE),
                           preferred_element_type=jnp.float32) + kbias
            s = s - jnp.max(s, axis=-1, keepdims=True)
            p = jnp.exp(s)
            p = p / jnp.sum(p, axis=-1, keepdims=True)        # exact softmax
            oh = jnp.einsum('bqk,bkd->bqd',
                            p.astype(MXU_DTYPE),
                            v[:, :, sl].astype(MXU_DTYPE),
                            preferred_element_type=jnp.float32)         # (Bt,Sp,hd)
            heads.append(oh.reshape(Bt * Sp, hd))
        attn = _mxdot(jnp.concatenate(heads, axis=-1), wo_ref[l])       # (Bt*Sp, H)

        # AddNorm 1 (dropout == identity in eval mode)
        y = _layernorm(x + attn, ln1g_ref[l], ln1b_ref[l])

        # Position-wise FFN: Linear -> ReLU -> Linear
        f = jnp.maximum(_mxdot(y, w1_ref[l]) + b1_ref[l], 0.0)
        f = _mxdot(f, w2_ref[l]) + b2_ref[l]

        # AddNorm 2
        x = _layernorm(y + f, ln2g_ref[l], ln2b_ref[l])

    # ---- class-token MLP head (lane-dense 128-wide padded output) ------------
    # TODO(synk): model_cvit.Class_token_mlp source unavailable; assumed
    #             Linear(H, mlp_hiddens) -> ReLU -> Linear(mlp_hiddens, mlp_outs).
    cls_tok = x.reshape(Bt, Sp, H)[:, 0, :]                             # (Bt, H)
    h1 = jnp.maximum(_mxdot(cls_tok, hw1_ref[...]) + hb1_ref[...], 0.0)
    logits = _mxdot(h1, hw2_ref[...]) + hb2_ref[...]                    # (Bt, 128)
    out_ref[...] = logits.astype(out_ref.dtype)


# ------------------------------ JAX glue -------------------------------------
def patch_token_slab(x, ps, seq_pad):
    """NCHW -> (B*Sp, C*ps*ps) token slab with zero rows at cls/pad positions.

    Patch order is row-major over (H/ps, W/ps); features ordered (C, kh, kw)
    to match torch Conv2d weight flattening."""
    B, C, Hh, Ww = x.shape
    hp, wp = Hh // ps, Ww // ps
    P = hp * wp
    K = C * ps * ps
    patches = x.reshape(B, C, hp, ps, wp, ps)
    patches = patches.transpose(0, 2, 4, 1, 3, 5).reshape(B, P, K)
    slab = jnp.zeros((B, seq_pad, K), x.dtype)
    slab = slab.at[:, 1:1 + P, :].set(patches)
    return slab.reshape(B * seq_pad, K)


def sinusoidal_pos_encoding(max_len, d):
    pos = jnp.arange(max_len, dtype=jnp.float32)[:, None]
    idx = jnp.arange(0, d, 2, dtype=jnp.float32)[None, :]
    angle = pos / jnp.power(10000.0, idx / d)
    P = jnp.zeros((max_len, d), jnp.float32)
    P = P.at[:, 0::2].set(jnp.sin(angle))
    P = P.at[:, 1::2].set(jnp.cos(angle))
    return P
    # TODO(synk): reference PositionalEncoding assumed sinusoidal (d2l-style);
    #             swap in a learned table if model_cvit uses one.


def init_params(key, in_channels):
    kiter = iter(jax.random.split(key, 32))
    std = 0.02

    def nrm(shape):
        return std * jax.random.normal(next(kiter), shape, jnp.float32)

    L, H, F = NUM_LAYERS, NUM_HIDDENS, FFN_HIDDENS
    return {
        "conv_w": nrm((in_channels * PATCH_SIZE * PATCH_SIZE, H)),
        "conv_b": jnp.zeros((1, H), jnp.float32),
        "cls": nrm((1, H)),
        "pos": sinusoidal_pos_encoding(1024, H),
        # fused QKV weights, columns ordered [W_q | W_k | W_v] (use_bias=False)
        "wqkv": nrm((L, H, 3 * H)),
        "wo": nrm((L, H, H)),
        "ln1_g": jnp.ones((L, 1, H), jnp.float32),
        "ln1_b": jnp.zeros((L, 1, H), jnp.float32),
        "w1": nrm((L, H, F)), "b1": jnp.zeros((L, 1, F), jnp.float32),
        "w2": nrm((L, F, H)), "b2": jnp.zeros((L, 1, H), jnp.float32),
        "ln2_g": jnp.ones((L, 1, H), jnp.float32),
        "ln2_b": jnp.zeros((L, 1, H), jnp.float32),
        "head_w1": nrm((H, MLP_HIDDENS)),
        "head_b1": jnp.zeros((1, MLP_HIDDENS), jnp.float32),
        "head_w2": nrm((MLP_HIDDENS, MLP_OUTS)),
        "head_b2": jnp.zeros((1, MLP_OUTS), jnp.float32),
    }


def _pick_batch_tile(B, Sp):
    # Target ~256-row (Bt*Sp) slabs per grid step (one MXU pass on v6e/v7x),
    # keep >= 2 grid steps when the batch allows it (v7x has 2 TensorCores),
    # and keep the output block's second-to-last dim a multiple of 8 unless
    # the tile covers the whole batch.
    cap = max(8, 256 // Sp)
    cands = [d for d in range(1, B + 1)
             if B % d == 0 and d <= cap and (d == B or d % 8 == 0)]
    if not cands:
        return B
    Bt = max(cands)
    if B // Bt < 2:
        smaller = [d for d in cands if B // d >= 2 and d * Sp >= 64]
        if smaller:
            Bt = max(smaller)
    return Bt


def c_vit_forward(x, params):
    B, C, Hh, Ww = x.shape
    P = (Hh // PATCH_SIZE) * (Ww // PATCH_SIZE)
    S = P + 1
    Sp = ((S + 7) // 8) * 8                     # pad sequence to sublane multiple
    K = C * PATCH_SIZE * PATCH_SIZE

    tokens = patch_token_slab(x, PATCH_SIZE, Sp)          # (B*Sp, K)

    Bt = _pick_batch_tile(B, Sp)
    ntiles = B // Bt

    # lane-dense classifier: pad the final linear to 128 output columns
    hw2 = jnp.zeros((MLP_HIDDENS, OUT_PAD), jnp.float32)
    hw2 = hw2.at[:, :MLP_OUTS].set(params["head_w2"])
    hb2 = jnp.zeros((1, OUT_PAD), jnp.float32)
    hb2 = hb2.at[:, :MLP_OUTS].set(params["head_b2"])

    kernel = functools.partial(
        cvit_kernel, batch_tile=Bt, seq_len=S, seq_pad=Sp,
        num_heads=NUM_HEADS, num_layers=NUM_LAYERS)

    def full_spec(a):
        nd = a.ndim
        return pl.BlockSpec(a.shape, lambda i, _nd=nd: (0,) * _nd)

    const_ins = (params["conv_w"], params["conv_b"], params["cls"],
                 params["pos"][:Sp, :],
                 params["wqkv"], params["wo"],
                 params["ln1_g"], params["ln1_b"],
                 params["w1"], params["b1"], params["w2"], params["b2"],
                 params["ln2_g"], params["ln2_b"],
                 params["head_w1"], params["head_b1"], hw2, hb2)

    padded = pl.pallas_call(
        kernel,
        out_shape=jax.ShapeDtypeStruct((B, OUT_PAD), jnp.float32),
        grid=(ntiles,),
        in_specs=([pl.BlockSpec((Bt * Sp, K), lambda i: (i, 0))]
                  + [full_spec(a) for a in const_ins]),
        out_specs=pl.BlockSpec((Bt, OUT_PAD), lambda i: (i, 0)),
        compiler_params=pltpu.CompilerParams(
            dimension_semantics=("parallel",)),
    )(tokens, *const_ins)

    return padded[:, :MLP_OUTS]


if __name__ == "__main__":
    key = jax.random.PRNGKey(0)
    k_param, k_x = jax.random.split(key)

    B, C, HW = 2, 4, 16                      # 16x16 image -> 2x2 = 4 patches, S=5
    x = jax.random.normal(k_x, (B, C, HW, HW), jnp.float32)
    params = init_params(k_param, in_channels=C)

    out = jax.jit(c_vit_forward)(x, params)
    out = jax.block_until_ready(out)
    assert out.shape == (B, MLP_OUTS), out.shape
    assert bool(jnp.all(jnp.isfinite(out)))
    print("KERNEL_OK")
</pallas_src>

<mosaic_0001>
module attributes {stable_mosaic.version = 11 : i64} {
  func.func @cvit_kernel(%arg0: i32, %arg1: memref<16x256xf32, #tpu.memory_space<vmem>>, %arg2: memref<256x64xf32, #tpu.memory_space<vmem>>, %arg3: memref<1x64xf32, #tpu.memory_space<vmem>>, %arg4: memref<1x64xf32, #tpu.memory_space<vmem>>, %arg5: memref<8x64xf32, #tpu.memory_space<vmem>>, %arg6: memref<2x64x192xf32, #tpu.memory_space<vmem>>, %arg7: memref<2x64x64xf32, #tpu.memory_space<vmem>>, %arg8: memref<2x1x64xf32, #tpu.memory_space<vmem>>, %arg9: memref<2x1x64xf32, #tpu.memory_space<vmem>>, %arg10: memref<2x64x128xf32, #tpu.memory_space<vmem>>, %arg11: memref<2x1x128xf32, #tpu.memory_space<vmem>>, %arg12: memref<2x128x64xf32, #tpu.memory_space<vmem>>, %arg13: memref<2x1x64xf32, #tpu.memory_space<vmem>>, %arg14: memref<2x1x64xf32, #tpu.memory_space<vmem>>, %arg15: memref<2x1x64xf32, #tpu.memory_space<vmem>>, %arg16: memref<64x128xf32, #tpu.memory_space<vmem>>, %arg17: memref<1x128xf32, #tpu.memory_space<vmem>>, %arg18: memref<128x128xf32, #tpu.memory_space<vmem>>, %arg19: memref<1x128xf32, #tpu.memory_space<vmem>>, %arg20: memref<2x128xf32, #tpu.memory_space<vmem>>) attributes {dimension_semantics = [#tpu.dimension_semantics<parallel>], iteration_bounds = array<i64: 1>, scalar_prefetch = 0 : i64, scratch_operands = 0 : i64, tpu.core_type = #tpu.core_type<tc>, window_params = [{transform_indices = @transform_0, window_bounds = array<i64: 16, 256>}, {pipeline_mode = #tpu.pipeline_mode<synchronous>, transform_indices = @transform_1, window_bounds = array<i64: 256, 64>}, {pipeline_mode = #tpu.pipeline_mode<synchronous>, transform_indices = @transform_2, window_bounds = array<i64: 1, 64>}, {pipeline_mode = #tpu.pipeline_mode<synchronous>, transform_indices = @transform_3, window_bounds = array<i64: 1, 64>}, {pipeline_mode = #tpu.pipeline_mode<synchronous>, transform_indices = @transform_4, window_bounds = array<i64: 8, 64>}, {pipeline_mode = #tpu.pipeline_mode<synchronous>, transform_indices = @transform_5, window_bounds = array<i64: 2, 64, 192>}, {pipeline_mode = #tpu.pipeline_mode<synchronous>, transform_indices = @transform_6, window_bounds = array<i64: 2, 64, 64>}, {pipeline_mode = #tpu.pipeline_mode<synchronous>, transform_indices = @transform_7, window_bounds = array<i64: 2, 1, 64>}, {pipeline_mode = #tpu.pipeline_mode<synchronous>, transform_indices = @transform_8, window_bounds = array<i64: 2, 1, 64>}, {pipeline_mode = #tpu.pipeline_mode<synchronous>, transform_indices = @transform_9, window_bounds = array<i64: 2, 64, 128>}, {pipeline_mode = #tpu.pipeline_mode<synchronous>, transform_indices = @transform_10, window_bounds = array<i64: 2, 1, 128>}, {pipeline_mode = #tpu.pipeline_mode<synchronous>, transform_indices = @transform_11, window_bounds = array<i64: 2, 128, 64>}, {pipeline_mode = #tpu.pipeline_mode<synchronous>, transform_indices = @transform_12, window_bounds = array<i64: 2, 1, 64>}, {pipeline_mode = #tpu.pipeline_mode<synchronous>, transform_indices = @transform_13, window_bounds = array<i64: 2, 1, 64>}, {pipeline_mode = #tpu.pipeline_mode<synchronous>, transform_indices = @transform_14, window_bounds = array<i64: 2, 1, 64>}, {pipeline_mode = #tpu.pipeline_mode<synchronous>, transform_indices = @transform_15, window_bounds = array<i64: 64, 128>}, {pipeline_mode = #tpu.pipeline_mode<synchronous>, transform_indices = @transform_16, window_bounds = array<i64: 1, 128>}, {pipeline_mode = #tpu.pipeline_mode<synchronous>, transform_indices = @transform_17, window_bounds = array<i64: 128, 128>}, {pipeline_mode = #tpu.pipeline_mode<synchronous>, transform_indices = @transform_18, window_bounds = array<i64: 1, 128>}, {transform_indices = @transform_19, window_bounds = array<i64: 2, 128>}]} {
    %c0 = arith.constant 0 : index
    %c0_0 = arith.constant 0 : index
    %0 = vector.load %arg1[%c0, %c0_0] : memref<16x256xf32, #tpu.memory_space<vmem>>, vector<16x256xf32>
    %c0_1 = arith.constant 0 : index
    %c0_2 = arith.constant 0 : index
    %1 = vector.load %arg2[%c0_1, %c0_2] : memref<256x64xf32, #tpu.memory_space<vmem>>, vector<256x64xf32>
    %2 = arith.truncf %0 : vector<16x256xf32> to vector<16x256xbf16>
    %3 = arith.truncf %1 : vector<256x64xf32> to vector<256x64xbf16>
    %cst = arith.constant dense<0.000000e+00> : vector<16x64xf32>
    %4 = tpu.matmul %2, %3, %cst {dimension_numbers = #tpu.dot_dimension_numbers<[1], [0], [0], [1], [0, 0, 1, 1], [], []>} : vector<16x256xbf16>, vector<256x64xbf16>, vector<16x64xf32> -> vector<16x64xf32>
    %c0_3 = arith.constant 0 : index
    %c0_4 = arith.constant 0 : index
    %5 = vector.load %arg3[%c0_3, %c0_4] : memref<1x64xf32, #tpu.memory_space<vmem>>, vector<1x64xf32>
    %6 = vector.broadcast %5 : vector<1x64xf32> to vector<16x64xf32>
    %7 = arith.addf %4, %6 : vector<16x64xf32>
    %8 = vector.shape_cast %7 : vector<16x64xf32> to vector<2x8x64xf32>
    %9 = tpu.iota {dimensions = array<i32: 1>} : vector<2x8x1xi32>
    %c0_i32 = arith.constant 0 : i32
    %10 = vector.broadcast %c0_i32 : i32 to vector<2x8x1xi32>
    %11 = arith.cmpi eq, %9, %10 : vector<2x8x1xi32>
    %c0_5 = arith.constant 0 : index
    %c0_6 = arith.constant 0 : index
    %12 = vector.load %arg4[%c0_5, %c0_6] : memref<1x64xf32, #tpu.memory_space<vmem>>, vector<1x64xf32>
    %13 = vector.shape_cast %12 : vector<1x64xf32> to vector<1x1x64xf32>
    %14 = vector.shape_cast %11 : vector<2x8x1xi1> to vector<2x8x1xi1>
    %15 = vector.broadcast %14 : vector<2x8x1xi1> to vector<2x8x64xi1>
    %16 = vector.shape_cast %13 : vector<1x1x64xf32> to vector<1x1x64xf32>
    %17 = vector.broadcast %16 : vector<1x1x64xf32> to vector<2x8x64xf32>
    %18 = arith.select %15, %17, %8 : vector<2x8x64xi1>, vector<2x8x64xf32>
    %c0_7 = arith.constant 0 : index
    %c0_8 = arith.constant 0 : index
    %19 = vector.load %arg5[%c0_7, %c0_8] : memref<8x64xf32, #tpu.memory_space<vmem>>, vector<8x64xf32>
    %20 = vector.shape_cast %19 : vector<8x64xf32> to vector<1x8x64xf32>
    %21 = vector.broadcast %20 : vector<1x8x64xf32> to vector<2x8x64xf32>
    %22 = arith.addf %18, %21 : vector<2x8x64xf32>
    %23 = vector.shape_cast %22 : vector<2x8x64xf32> to vector<16x64xf32>
    %24 = tpu.iota {dimensions = array<i32: 1>} : vector<8x8xi32>
    %c5_i32 = arith.constant 5 : i32
    %25 = vector.broadcast %c5_i32 : i32 to vector<8x8xi32>
    %26 = arith.cmpi slt, %24, %25 : vector<8x8xi32>
    %cst_9 = arith.constant 0.000000e+00 : f32
    %cst_10 = arith.constant -1.000000e+30 : f32
    %27 = vector.broadcast %cst_9 : f32 to vector<8x8xf32>
    %28 = vector.broadcast %cst_10 : f32 to vector<8x8xf32>
    %29 = arith.select %26, %27, %28 : vector<8x8xi1>, vector<8x8xf32>
    %30 = vector.shape_cast %29 : vector<8x8xf32> to vector<1x8x8xf32>
    %31 = vector.shape_cast %30 : vector<1x8x8xf32> to vector<1x8x8xf32>
    %32 = vector.broadcast %31 : vector<1x8x8xf32> to vector<2x8x8xf32>
    %c0_11 = arith.constant 0 : index
    %c0_12 = arith.constant 0 : index
    %c0_13 = arith.constant 0 : index
    %33 = vector.load %arg6[%c0_11, %c0_12, %c0_13] : memref<2x64x192xf32, #tpu.memory_space<vmem>>, vector<1x64x192xf32>
    %34 = vector.shape_cast %33 : vector<1x64x192xf32> to vector<64x192xf32>
    %35 = arith.truncf %23 : vector<16x64xf32> to vector<16x64xbf16>
    %36 = arith.truncf %34 : vector<64x192xf32> to vector<64x192xbf16>
    %cst_14 = arith.constant dense<0.000000e+00> : vector<16x192xf32>
    %37 = tpu.matmul %35, %36, %cst_14 {dimension_numbers = #tpu.dot_dimension_numbers<[1], [0], [0], [1], [0, 0, 1, 1], [], []>} : vector<16x64xbf16>, vector<64x192xbf16>, vector<16x192xf32> -> vector<16x192xf32>
    %38 = vector.extract_strided_slice %37 {offsets = [0, 0], sizes = [16, 64], strides = [1, 1]} : vector<16x192xf32> to vector<16x64xf32>
    %cst_15 = arith.constant 2.500000e-01 : f32
    %39 = vector.broadcast %cst_15 : f32 to vector<16x64xf32>
    %40 = arith.mulf %38, %39 : vector<16x64xf32>
    %41 = vector.shape_cast %40 : vector<16x64xf32> to vector<2x8x64xf32>
    %42 = vector.extract_strided_slice %37 {offsets = [0, 64], sizes = [16, 64], strides = [1, 1]} : vector<16x192xf32> to vector<16x64xf32>
    %43 = vector.shape_cast %42 : vector<16x64xf32> to vector<2x8x64xf32>
    %44 = vector.extract_strided_slice %37 {offsets = [0, 128], sizes = [16, 64], strides = [1, 1]} : vector<16x192xf32> to vector<16x64xf32>
    %45 = vector.shape_cast %44 : vector<16x64xf32> to vector<2x8x64xf32>
    %46 = vector.extract_strided_slice %41 {offsets = [0, 0, 0], sizes = [2, 8, 16], strides = [1, 1, 1]} : vector<2x8x64xf32> to vector<2x8x16xf32>
    %47 = arith.truncf %46 : vector<2x8x16xf32> to vector<2x8x16xbf16>
    %48 = vector.extract_strided_slice %43 {offsets = [0, 0, 0], sizes = [2, 8, 16], strides = [1, 1, 1]} : vector<2x8x64xf32> to vector<2x8x16xf32>
    %49 = arith.truncf %48 : vector<2x8x16xf32> to vector<2x8x16xbf16>
    "tpu.trace_start"() <{level = 10 : i32, message = "bqd,bkd->bqk"}> : () -> ()
    %cst_16 = arith.constant dense<0.000000e+00> : vector<2x8x8xf32>
    %50 = tpu.matmul %47, %49, %cst_16 {dimension_numbers = #tpu.dot_dimension_numbers<[2], [2], [1], [1], [0, 0, 0, 1, 1, 1], [0], [0]>} : vector<2x8x16xbf16>, vector<2x8x16xbf16>, vector<2x8x8xf32> -> vector<2x8x8xf32>
    "tpu.trace_stop"() : () -> ()
    %51 = arith.addf %50, %32 : vector<2x8x8xf32>
    %cst_17 = arith.constant dense<0xFF800000> : vector<2x8xf32>
    %52 = vector.multi_reduction <maximumf>, %51, %cst_17 [2] : vector<2x8x8xf32> to vector<2x8xf32>
    %53 = vector.shape_cast %52 : vector<2x8xf32> to vector<2x8x1xf32>
    %54 = vector.broadcast %53 : vector<2x8x1xf32> to vector<2x8x8xf32>
    %55 = arith.subf %51, %54 : vector<2x8x8xf32>
    %56 = math.exp %55 : vector<2x8x8xf32>
    %cst_18 = arith.constant dense<0.000000e+00> : vector<2x8xf32>
    %57 = vector.multi_reduction <add>, %56, %cst_18 [2] : vector<2x8x8xf32> to vector<2x8xf32>
    %58 = vector.shape_cast %57 : vector<2x8xf32> to vector<2x8x1xf32>
    %59 = vector.broadcast %58 : vector<2x8x1xf32> to vector<2x8x8xf32>
    %60 = arith.divf %56, %59 : vector<2x8x8xf32>
    %61 = arith.truncf %60 : vector<2x8x8xf32> to vector<2x8x8xbf16>
    %62 = vector.extract_strided_slice %45 {offsets = [0, 0, 0], sizes = [2, 8, 16], strides = [1, 1, 1]} : vector<2x8x64xf32> to vector<2x8x16xf32>
    %63 = arith.truncf %62 : vector<2x8x16xf32> to vector<2x8x16xbf16>
    "tpu.trace_start"() <{level = 10 : i32, message = "bqk,bkd->bqd"}> : () -> ()
    %cst_19 = arith.constant dense<0.000000e+00> : vector<2x8x16xf32>
    %64 = tpu.matmul %61, %63, %cst_19 {dimension_numbers = #tpu.dot_dimension_numbers<[2], [1], [1], [2], [0, 0, 0, 1, 1, 2], [0], [0]>} : vector<2x8x8xbf16>, vector<2x8x16xbf16>, vector<2x8x16xf32> -> vector<2x8x16xf32>
    "tpu.trace_stop"() : () -> ()
    %65 = vector.shape_cast %64 : vector<2x8x16xf32> to vector<16x16xf32>
    %66 = vector.extract_strided_slice %41 {offsets = [0, 0, 16], sizes = [2, 8, 16], strides = [1, 1, 1]} : vector<2x8x64xf32> to vector<2x8x16xf32>
    %67 = arith.truncf %66 : vector<2x8x16xf32> to vector<2x8x16xbf16>
    %68 = vector.extract_strided_slice %43 {offsets = [0, 0, 16], sizes = [2, 8, 16], strides = [1, 1, 1]} : vector<2x8x64xf32> to vector<2x8x16xf32>
    %69 = arith.truncf %68 : vector<2x8x16xf32> to vector<2x8x16xbf16>
    "tpu.trace_start"() <{level = 10 : i32, message = "bqd,bkd->bqk"}> : () -> ()
    %cst_20 = arith.constant dense<0.000000e+00> : vector<2x8x8xf32>
    %70 = tpu.matmul %67, %69, %cst_20 {dimension_numbers = #tpu.dot_dimension_numbers<[2], [2], [1], [1], [0, 0, 0, 1, 1, 1], [0], [0]>} : vector<2x8x16xbf16>, vector<2x8x16xbf16>, vector<2x8x8xf32> -> vector<2x8x8xf32>
    "tpu.trace_stop"() : () -> ()
    %71 = arith.addf %70, %32 : vector<2x8x8xf32>
    %cst_21 = arith.constant dense<0xFF800000> : vector<2x8xf32>
    %72 = vector.multi_reduction <maximumf>, %71, %cst_21 [2] : vector<2x8x8xf32> to vector<2x8xf32>
    %73 = vector.shape_cast %72 : vector<2x8xf32> to vector<2x8x1xf32>
    %74 = vector.broadcast %73 : vector<2x8x1xf32> to vector<2x8x8xf32>
    %75 = arith.subf %71, %74 : vector<2x8x8xf32>
    %76 = math.exp %75 : vector<2x8x8xf32>
    %cst_22 = arith.constant dense<0.000000e+00> : vector<2x8xf32>
    %77 = vector.multi_reduction <add>, %76, %cst_22 [2] : vector<2x8x8xf32> to vector<2x8xf32>
    %78 = vector.shape_cast %77 : vector<2x8xf32> to vector<2x8x1xf32>
    %79 = vector.broadcast %78 : vector<2x8x1xf32> to vector<2x8x8xf32>
    %80 = arith.divf %76, %79 : vector<2x8x8xf32>
    %81 = arith.truncf %80 : vector<2x8x8xf32> to vector<2x8x8xbf16>
    %82 = vector.extract_strided_slice %45 {offsets = [0, 0, 16], sizes = [2, 8, 16], strides = [1, 1, 1]} : vector<2x8x64xf32> to vector<2x8x16xf32>
    %83 = arith.truncf %82 : vector<2x8x16xf32> to vector<2x8x16xbf16>
    "tpu.trace_start"() <{level = 10 : i32, message = "bqk,bkd->bqd"}> : () -> ()
    %cst_23 = arith.constant dense<0.000000e+00> : vector<2x8x16xf32>
    %84 = tpu.matmul %81, %83, %cst_23 {dimension_numbers = #tpu.dot_dimension_numbers<[2], [1], [1], [2], [0, 0, 0, 1, 1, 2], [0], [0]>} : vector<2x8x8xbf16>, vector<2x8x16xbf16>, vector<2x8x16xf32> -> vector<2x8x16xf32>
    "tpu.trace_stop"() : () -> ()
    %85 = vector.shape_cast %84 : vector<2x8x16xf32> to vector<16x16xf32>
    %86 = vector.extract_strided_slice %41 {offsets = [0, 0, 32], sizes = [2, 8, 16], strides = [1, 1, 1]} : vector<2x8x64xf32> to vector<2x8x16xf32>
    %87 = arith.truncf %86 : vector<2x8x16xf32> to vector<2x8x16xbf16>
    %88 = vector.extract_strided_slice %43 {offsets = [0, 0, 32], sizes = [2, 8, 16], strides = [1, 1, 1]} : vector<2x8x64xf32> to vector<2x8x16xf32>
    %89 = arith.truncf %88 : vector<2x8x16xf32> to vector<2x8x16xbf16>
    "tpu.trace_start"() <{level = 10 : i32, message = "bqd,bkd->bqk"}> : () -> ()
    %cst_24 = arith.constant dense<0.000000e+00> : vector<2x8x8xf32>
    %90 = tpu.matmul %87, %89, %cst_24 {dimension_numbers = #tpu.dot_dimension_numbers<[2], [2], [1], [1], [0, 0, 0, 1, 1, 1], [0], [0]>} : vector<2x8x16xbf16>, vector<2x8x16xbf16>, vector<2x8x8xf32> -> vector<2x8x8xf32>
    "tpu.trace_stop"() : () -> ()
    %91 = arith.addf %90, %32 : vector<2x8x8xf32>
    %cst_25 = arith.constant dense<0xFF800000> : vector<2x8xf32>
    %92 = vector.multi_reduction <maximumf>, %91, %cst_25 [2] : vector<2x8x8xf32> to vector<2x8xf32>
    %93 = vector.shape_cast %92 : vector<2x8xf32> to vector<2x8x1xf32>
    %94 = vector.broadcast %93 : vector<2x8x1xf32> to vector<2x8x8xf32>
    %95 = arith.subf %91, %94 : vector<2x8x8xf32>
    %96 = math.exp %95 : vector<2x8x8xf32>
    %cst_26 = arith.constant dense<0.000000e+00> : vector<2x8xf32>
    %97 = vector.multi_reduction <add>, %96, %cst_26 [2] : vector<2x8x8xf32> to vector<2x8xf32>
    %98 = vector.shape_cast %97 : vector<2x8xf32> to vector<2x8x1xf32>
    %99 = vector.broadcast %98 : vector<2x8x1xf32> to vector<2x8x8xf32>
    %100 = arith.divf %96, %99 : vector<2x8x8xf32>
    %101 = arith.truncf %100 : vector<2x8x8xf32> to vector<2x8x8xbf16>
    %102 = vector.extract_strided_slice %45 {offsets = [0, 0, 32], sizes = [2, 8, 16], strides = [1, 1, 1]} : vector<2x8x64xf32> to vector<2x8x16xf32>
    %103 = arith.truncf %102 : vector<2x8x16xf32> to vector<2x8x16xbf16>
    "tpu.trace_start"() <{level = 10 : i32, message = "bqk,bkd->bqd"}> : () -> ()
    %cst_27 = arith.constant dense<0.000000e+00> : vector<2x8x16xf32>
    %104 = tpu.matmul %101, %103, %cst_27 {dimension_numbers = #tpu.dot_dimension_numbers<[2], [1], [1], [2], [0, 0, 0, 1, 1, 2], [0], [0]>} : vector<2x8x8xbf16>, vector<2x8x16xbf16>, vector<2x8x16xf32> -> vector<2x8x16xf32>
    "tpu.trace_stop"() : () -> ()
    %105 = vector.shape_cast %104 : vector<2x8x16xf32> to vector<16x16xf32>
    %106 = vector.extract_strided_slice %41 {offsets = [0, 0, 48], sizes = [2, 8, 16], strides = [1, 1, 1]} : vector<2x8x64xf32> to vector<2x8x16xf32>
    %107 = arith.truncf %106 : vector<2x8x16xf32> to vector<2x8x16xbf16>
    %108 = vector.extract_strided_slice %43 {offsets = [0, 0, 48], sizes = [2, 8, 16], strides = [1, 1, 1]} : vector<2x8x64xf32> to vector<2x8x16xf32>
    %109 = arith.truncf %108 : vector<2x8x16xf32> to vector<2x8x16xbf16>
    "tpu.trace_start"() <{level = 10 : i32, message = "bqd,bkd->bqk"}> : () -> ()
    %cst_28 = arith.constant dense<0.000000e+00> : vector<2x8x8xf32>
    %110 = tpu.matmul %107, %109, %cst_28 {dimension_numbers = #tpu.dot_dimension_numbers<[2], [2], [1], [1], [0, 0, 0, 1, 1, 1], [0], [0]>} : vector<2x8x16xbf16>, vector<2x8x16xbf16>, vector<2x8x8xf32> -> vector<2x8x8xf32>
    "tpu.trace_stop"() : () -> ()
    %111 = arith.addf %110, %32 : vector<2x8x8xf32>
    %cst_29 = arith.constant dense<0xFF800000> : vector<2x8xf32>
    %112 = vector.multi_reduction <maximumf>, %111, %cst_29 [2] : vector<2x8x8xf32> to vector<2x8xf32>
    %113 = vector.shape_cast %112 : vector<2x8xf32> to vector<2x8x1xf32>
    %114 = vector.broadcast %113 : vector<2x8x1xf32> to vector<2x8x8xf32>
    %115 = arith.subf %111, %114 : vector<2x8x8xf32>
    %116 = math.exp %115 : vector<2x8x8xf32>
    %cst_30 = arith.constant dense<0.000000e+00> : vector<2x8xf32>
    %117 = vector.multi_reduction <add>, %116, %cst_30 [2] : vector<2x8x8xf32> to vector<2x8xf32>
    %118 = vector.shape_cast %117 : vector<2x8xf32> to vector<2x8x1xf32>
    %119 = vector.broadcast %118 : vector<2x8x1xf32> to vector<2x8x8xf32>
    %120 = arith.divf %116, %119 : vector<2x8x8xf32>
    %121 = arith.truncf %120 : vector<2x8x8xf32> to vector<2x8x8xbf16>
    %122 = vector.extract_strided_slice %45 {offsets = [0, 0, 48], sizes = [2, 8, 16], strides = [1, 1, 1]} : vector<2x8x64xf32> to vector<2x8x16xf32>
    %123 = arith.truncf %122 : vector<2x8x16xf32> to vector<2x8x16xbf16>
    "tpu.trace_start"() <{level = 10 : i32, message = "bqk,bkd->bqd"}> : () -> ()
    %cst_31 = arith.constant dense<0.000000e+00> : vector<2x8x16xf32>
    %124 = tpu.matmul %121, %123, %cst_31 {dimension_numbers = #tpu.dot_dimension_numbers<[2], [1], [1], [2], [0, 0, 0, 1, 1, 2], [0], [0]>} : vector<2x8x8xbf16>, vector<2x8x16xbf16>, vector<2x8x16xf32> -> vector<2x8x16xf32>
    "tpu.trace_stop"() : () -> ()
    %125 = vector.shape_cast %124 : vector<2x8x16xf32> to vector<16x16xf32>
    %126 = tpu.concatenate %65, %85, %105, %125 in 1 : vector<16x16xf32>, vector<16x16xf32>, vector<16x16xf32>, vector<16x16xf32> -> vector<16x64xf32>
    %c0_32 = arith.constant 0 : index
    %c0_33 = arith.constant 0 : index
    %c0_34 = arith.constant 0 : index
    %127 = vector.load %arg7[%c0_32, %c0_33, %c0_34] : memref<2x64x64xf32, #tpu.memory_space<vmem>>, vector<1x64x64xf32>
    %128 = vector.shape_cast %127 : vector<1x64x64xf32> to vector<64x64xf32>
    %129 = arith.truncf %126 : vector<16x64xf32> to vector<16x64xbf16>
    %130 = arith.truncf %128 : vector<64x64xf32> to vector<64x64xbf16>
    %cst_35 = arith.constant dense<0.000000e+00> : vector<16x64xf32>
    %131 = tpu.matmul %129, %130, %cst_35 {dimension_numbers = #tpu.dot_dimension_numbers<[1], [0], [0], [1], [0, 0, 1, 1], [], []>} : vector<16x64xbf16>, vector<64x64xbf16>, vector<16x64xf32> -> vector<16x64xf32>
    %132 = arith.addf %23, %131 : vector<16x64xf32>
    %c0_36 = arith.constant 0 : index
    %c0_37 = arith.constant 0 : index
    %c0_38 = arith.constant 0 : index
    %133 = vector.load %arg8[%c0_36, %c0_37, %c0_38] : memref<2x1x64xf32, #tpu.memory_space<vmem>>, vector<1x1x64xf32>
    %134 = vector.shape_cast %133 : vector<1x1x64xf32> to vector<1x64xf32>
    %c0_39 = arith.constant 0 : index
    %c0_40 = arith.constant 0 : index
    %c0_41 = arith.constant 0 : index
    %135 = vector.load %arg9[%c0_39, %c0_40, %c0_41] : memref<2x1x64xf32, #tpu.memory_space<vmem>>, vector<1x1x64xf32>
    %136 = vector.shape_cast %135 : vector<1x1x64xf32> to vector<1x64xf32>
    %cst_42 = arith.constant dense<0.000000e+00> : vector<16xf32>
    %137 = vector.multi_reduction <add>, %132, %cst_42 [1] : vector<16x64xf32> to vector<16xf32>
    %138 = vector.shape_cast %137 : vector<16xf32> to vector<16x1xf32>
    %cst_43 = arith.constant 6.400000e+01 : f32
    %139 = vector.broadcast %cst_43 : f32 to vector<16x1xf32>
    %140 = arith.divf %138, %139 : vector<16x1xf32>
    %141 = arith.mulf %132, %132 : vector<16x64xf32>
    %cst_44 = arith.constant dense<0.000000e+00> : vector<16xf32>
    %142 = vector.multi_reduction <add>, %141, %cst_44 [1] : vector<16x64xf32> to vector<16xf32>
    %143 = vector.shape_cast %142 : vector<16xf32> to vector<16x1xf32>
    %cst_45 = arith.constant 6.400000e+01 : f32
    %144 = vector.broadcast %cst_45 : f32 to vector<16x1xf32>
    %145 = arith.divf %143, %144 : vector<16x1xf32>
    %146 = arith.mulf %140, %140 : vector<16x1xf32>
    %147 = arith.subf %145, %146 : vector<16x1xf32>
    %148 = vector.broadcast %140 : vector<16x1xf32> to vector<16x64xf32>
    %149 = arith.subf %132, %148 : vector<16x64xf32>
    %cst_46 = arith.constant 9.99999974E-6 : f32
    %150 = vector.broadcast %cst_46 : f32 to vector<16x1xf32>
    %151 = arith.addf %147, %150 : vector<16x1xf32>
    %152 = math.rsqrt %151 : vector<16x1xf32>
    %153 = vector.broadcast %152 : vector<16x1xf32> to vector<16x64xf32>
    %154 = arith.mulf %149, %153 : vector<16x64xf32>
    %155 = vector.broadcast %134 : vector<1x64xf32> to vector<16x64xf32>
    %156 = arith.mulf %154, %155 : vector<16x64xf32>
    %157 = vector.broadcast %136 : vector<1x64xf32> to vector<16x64xf32>
    %158 = arith.addf %156, %157 : vector<16x64xf32>
    %c0_47 = arith.constant 0 : index
    %c0_48 = arith.constant 0 : index
    %c0_49 = arith.constant 0 : index
    %159 = vector.load %arg10[%c0_47, %c0_48, %c0_49] : memref<2x64x128xf32, #tpu.memory_space<vmem>>, vector<1x64x128xf32>
    %160 = vector.shape_cast %159 : vector<1x64x128xf32> to vector<64x128xf32>
    %161 = arith.truncf %158 : vector<16x64xf32> to vector<16x64xbf16>
    %162 = arith.truncf %160 : vector<64x128xf32> to vector<64x128xbf16>
    %cst_50 = arith.constant dense<0.000000e+00> : vector<16x128xf32>
    %163 = tpu.matmul %161, %162, %cst_50 {dimension_numbers = #tpu.dot_dimension_numbers<[1], [0], [0], [1], [0, 0, 1, 1], [], []>} : vector<16x64xbf16>, vector<64x128xbf16>, vector<16x128xf32> -> vector<16x128xf32>
    %c0_51 = arith.constant 0 : index
    %c0_52 = arith.constant 0 : index
    %c0_53 = arith.constant 0 : index
    %164 = vector.load %arg11[%c0_51, %c0_52, %c0_53] : memref<2x1x128xf32, #tpu.memory_space<vmem>>, vector<1x1x128xf32>
    %165 = vector.shape_cast %164 : vector<1x1x128xf32> to vector<1x128xf32>
    %166 = vector.broadcast %165 : vector<1x128xf32> to vector<16x128xf32>
    %167 = arith.addf %163, %166 : vector<16x128xf32>
    %cst_54 = arith.constant 0.000000e+00 : f32
    %168 = vector.broadcast %cst_54 : f32 to vector<16x128xf32>
    %169 = arith.maximumf %167, %168 : vector<16x128xf32>
    %c0_55 = arith.constant 0 : index
    %c0_56 = arith.constant 0 : index
    %c0_57 = arith.constant 0 : index
    %170 = vector.load %arg12[%c0_55, %c0_56, %c0_57] : memref<2x128x64xf32, #tpu.memory_space<vmem>>, vector<1x128x64xf32>
    %171 = vector.shape_cast %170 : vector<1x128x64xf32> to vector<128x64xf32>
    %172 = arith.truncf %169 : vector<16x128xf32> to vector<16x128xbf16>
    %173 = arith.truncf %171 : vector<128x64xf32> to vector<128x64xbf16>
    %cst_58 = arith.constant dense<0.000000e+00> : vector<16x64xf32>
    %174 = tpu.matmul %172, %173, %cst_58 {dimension_numbers = #tpu.dot_dimension_numbers<[1], [0], [0], [1], [0, 0, 1, 1], [], []>} : vector<16x128xbf16>, vector<128x64xbf16>, vector<16x64xf32> -> vector<16x64xf32>
    %c0_59 = arith.constant 0 : index
    %c0_60 = arith.constant 0 : index
    %c0_61 = arith.constant 0 : index
    %175 = vector.load %arg13[%c0_59, %c0_60, %c0_61] : memref<2x1x64xf32, #tpu.memory_space<vmem>>, vector<1x1x64xf32>
    %176 = vector.shape_cast %175 : vector<1x1x64xf32> to vector<1x64xf32>
    %177 = vector.broadcast %176 : vector<1x64xf32> to vector<16x64xf32>
    %178 = arith.addf %174, %177 : vector<16x64xf32>
    %179 = arith.addf %158, %178 : vector<16x64xf32>
    %c0_62 = arith.constant 0 : index
    %c0_63 = arith.constant 0 : index
    %c0_64 = arith.constant 0 : index
    %180 = vector.load %arg14[%c0_62, %c0_63, %c0_64] : memref<2x1x64xf32, #tpu.memory_space<vmem>>, vector<1x1x64xf32>
    %181 = vector.shape_cast %180 : vector<1x1x64xf32> to vector<1x64xf32>
    %c0_65 = arith.constant 0 : index
    %c0_66 = arith.constant 0 : index
    %c0_67 = arith.constant 0 : index
    %182 = vector.load %arg15[%c0_65, %c0_66, %c0_67] : memref<2x1x64xf32, #tpu.memory_space<vmem>>, vector<1x1x64xf32>
    %183 = vector.shape_cast %182 : vector<1x1x64xf32> to vector<1x64xf32>
    %cst_68 = arith.constant dense<0.000000e+00> : vector<16xf32>
    %184 = vector.multi_reduction <add>, %179, %cst_68 [1] : vector<16x64xf32> to vector<16xf32>
    %185 = vector.shape_cast %184 : vector<16xf32> to vector<16x1xf32>
    %cst_69 = arith.constant 6.400000e+01 : f32
    %186 = vector.broadcast %cst_69 : f32 to vector<16x1xf32>
    %187 = arith.divf %185, %186 : vector<16x1xf32>
    %188 = arith.mulf %179, %179 : vector<16x64xf32>
    %cst_70 = arith.constant dense<0.000000e+00> : vector<16xf32>
    %189 = vector.multi_reduction <add>, %188, %cst_70 [1] : vector<16x64xf32> to vector<16xf32>
    %190 = vector.shape_cast %189 : vector<16xf32> to vector<16x1xf32>
    %cst_71 = arith.constant 6.400000e+01 : f32
    %191 = vector.broadcast %cst_71 : f32 to vector<16x1xf32>
    %192 = arith.divf %190, %191 : vector<16x1xf32>
    %193 = arith.mulf %187, %187 : vector<16x1xf32>
    %194 = arith.subf %192, %193 : vector<16x1xf32>
    %195 = vector.broadcast %187 : vector<16x1xf32> to vector<16x64xf32>
    %196 = arith.subf %179, %195 : vector<16x64xf32>
    %cst_72 = arith.constant 9.99999974E-6 : f32
    %197 = vector.broadcast %cst_72 : f32 to vector<16x1xf32>
    %198 = arith.addf %194, %197 : vector<16x1xf32>
    %199 = math.rsqrt %198 : vector<16x1xf32>
    %200 = vector.broadcast %199 : vector<16x1xf32> to vector<16x64xf32>
    %201 = arith.mulf %196, %200 : vector<16x64xf32>
    %202 = vector.broadcast %181 : vector<1x64xf32> to vector<16x64xf32>
    %203 = arith.mulf %201, %202 : vector<16x64xf32>
    %204 = vector.broadcast %183 : vector<1x64xf32> to vector<16x64xf32>
    %205 = arith.addf %203, %204 : vector<16x64xf32>
    %c1 = arith.constant 1 : index
    %c0_73 = arith.constant 0 : index
    %c0_74 = arith.constant 0 : index
    %206 = vector.load %arg6[%c1, %c0_73, %c0_74] : memref<2x64x192xf32, #tpu.memory_space<vmem>>, vector<1x64x192xf32>
    %207 = vector.shape_cast %206 : vector<1x64x192xf32> to vector<64x192xf32>
    %208 = arith.truncf %205 : vector<16x64xf32> to vector<16x64xbf16>
    %209 = arith.truncf %207 : vector<64x192xf32> to vector<64x192xbf16>
    %cst_75 = arith.constant dense<0.000000e+00> : vector<16x192xf32>
    %210 = tpu.matmul %208, %209, %cst_75 {dimension_numbers = #tpu.dot_dimension_numbers<[1], [0], [0], [1], [0, 0, 1, 1], [], []>} : vector<16x64xbf16>, vector<64x192xbf16>, vector<16x192xf32> -> vector<16x192xf32>
    %211 = vector.extract_strided_slice %210 {offsets = [0, 0], sizes = [16, 64], strides = [1, 1]} : vector<16x192xf32> to vector<16x64xf32>
    %cst_76 = arith.constant 2.500000e-01 : f32
    %212 = vector.broadcast %cst_76 : f32 to vector<16x64xf32>
    %213 = arith.mulf %211, %212 : vector<16x64xf32>
    %214 = vector.shape_cast %213 : vector<16x64xf32> to vector<2x8x64xf32>
    %215 = vector.extract_strided_slice %210 {offsets = [0, 64], sizes = [16, 64], strides = [1, 1]} : vector<16x192xf32> to vector<16x64xf32>
    %216 = vector.shape_cast %215 : vector<16x64xf32> to vector<2x8x64xf32>
    %217 = vector.extract_strided_slice %210 {offsets = [0, 128], sizes = [16, 64], strides = [1, 1]} : vector<16x192xf32> to vector<16x64xf32>
    %218 = vector.shape_cast %217 : vector<16x64xf32> to vector<2x8x64xf32>
    %219 = vector.extract_strided_slice %214 {offsets = [0, 0, 0], sizes = [2, 8, 16], strides = [1, 1, 1]} : vector<2x8x64xf32> to vector<2x8x16xf32>
    %220 = arith.truncf %219 : vector<2x8x16xf32> to vector<2x8x16xbf16>
    %221 = vector.extract_strided_slice %216 {offsets = [0, 0, 0], sizes = [2, 8, 16], strides = [1, 1, 1]} : vector<2x8x64xf32> to vector<2x8x16xf32>
    %222 = arith.truncf %221 : vector<2x8x16xf32> to vector<2x8x16xbf16>
    "tpu.trace_start"() <{level = 10 : i32, message = "bqd,bkd->bqk"}> : () -> ()
    %cst_77 = arith.constant dense<0.000000e+00> : vector<2x8x8xf32>
    %223 = tpu.matmul %220, %222, %cst_77 {dimension_numbers = #tpu.dot_dimension_numbers<[2], [2], [1], [1], [0, 0, 0, 1, 1, 1], [0], [0]>} : vector<2x8x16xbf16>, vector<2x8x16xbf16>, vector<2x8x8xf32> -> vector<2x8x8xf32>
    "tpu.trace_stop"() : () -> ()
    %224 = arith.addf %223, %32 : vector<2x8x8xf32>
    %cst_78 = arith.constant dense<0xFF800000> : vector<2x8xf32>
    %225 = vector.multi_reduction <maximumf>, %224, %cst_78 [2] : vector<2x8x8xf32> to vector<2x8xf32>
    %226 = vector.shape_cast %225 : vector<2x8xf32> to vector<2x8x1xf32>
    %227 = vector.broadcast %226 : vector<2x8x1xf32> to vector<2x8x8xf32>
    %228 = arith.subf %224, %227 : vector<2x8x8xf32>
    %229 = math.exp %228 : vector<2x8x8xf32>
    %cst_79 = arith.constant dense<0.000000e+00> : vector<2x8xf32>
    %230 = vector.multi_reduction <add>, %229, %cst_79 [2] : vector<2x8x8xf32> to vector<2x8xf32>
    %231 = vector.shape_cast %230 : vector<2x8xf32> to vector<2x8x1xf32>
    %232 = vector.broadcast %231 : vector<2x8x1xf32> to vector<2x8x8xf32>
    %233 = arith.divf %229, %232 : vector<2x8x8xf32>
    %234 = arith.truncf %233 : vector<2x8x8xf32> to vector<2x8x8xbf16>
    %235 = vector.extract_strided_slice %218 {offsets = [0, 0, 0], sizes = [2, 8, 16], strides = [1, 1, 1]} : vector<2x8x64xf32> to vector<2x8x16xf32>
    %236 = arith.truncf %235 : vector<2x8x16xf32> to vector<2x8x16xbf16>
    "tpu.trace_start"() <{level = 10 : i32, message = "bqk,bkd->bqd"}> : () -> ()
    %cst_80 = arith.constant dense<0.000000e+00> : vector<2x8x16xf32>
    %237 = tpu.matmul %234, %236, %cst_80 {dimension_numbers = #tpu.dot_dimension_numbers<[2], [1], [1], [2], [0, 0, 0, 1, 1, 2], [0], [0]>} : vector<2x8x8xbf16>, vector<2x8x16xbf16>, vector<2x8x16xf32> -> vector<2x8x16xf32>
    "tpu.trace_stop"() : () -> ()
    %238 = vector.shape_cast %237 : vector<2x8x16xf32> to vector<16x16xf32>
    %239 = vector.extract_strided_slice %214 {offsets = [0, 0, 16], sizes = [2, 8, 16], strides = [1, 1, 1]} : vector<2x8x64xf32> to vector<2x8x16xf32>
    %240 = arith.truncf %239 : vector<2x8x16xf32> to vector<2x8x16xbf16>
    %241 = vector.extract_strided_slice %216 {offsets = [0, 0, 16], sizes = [2, 8, 16], strides = [1, 1, 1]} : vector<2x8x64xf32> to vector<2x8x16xf32>
    %242 = arith.truncf %241 : vector<2x8x16xf32> to vector<2x8x16xbf16>
    "tpu.trace_start"() <{level = 10 : i32, message = "bqd,bkd->bqk"}> : () -> ()
    %cst_81 = arith.constant dense<0.000000e+00> : vector<2x8x8xf32>
    %243 = tpu.matmul %240, %242, %cst_81 {dimension_numbers = #tpu.dot_dimension_numbers<[2], [2], [1], [1], [0, 0, 0, 1, 1, 1], [0], [0]>} : vector<2x8x16xbf16>, vector<2x8x16xbf16>, vector<2x8x8xf32> -> vector<2x8x8xf32>
    "tpu.trace_stop"() : () -> ()
    %244 = arith.addf %243, %32 : vector<2x8x8xf32>
    %cst_82 = arith.constant dense<0xFF800000> : vector<2x8xf32>
    %245 = vector.multi_reduction <maximumf>, %244, %cst_82 [2] : vector<2x8x8xf32> to vector<2x8xf32>
    %246 = vector.shape_cast %245 : vector<2x8xf32> to vector<2x8x1xf32>
    %247 = vector.broadcast %246 : vector<2x8x1xf32> to vector<2x8x8xf32>
    %248 = arith.subf %244, %247 : vector<2x8x8xf32>
    %249 = math.exp %248 : vector<2x8x8xf32>
    %cst_83 = arith.constant dense<0.000000e+00> : vector<2x8xf32>
    %250 = vector.multi_reduction <add>, %249, %cst_83 [2] : vector<2x8x8xf32> to vector<2x8xf32>
    %251 = vector.shape_cast %250 : vector<2x8xf32> to vector<2x8x1xf32>
    %252 = vector.broadcast %251 : vector<2x8x1xf32> to vector<2x8x8xf32>
    %253 = arith.divf %249, %252 : vector<2x8x8xf32>
    %254 = arith.truncf %253 : vector<2x8x8xf32> to vector<2x8x8xbf16>
    %255 = vector.extract_strided_slice %218 {offsets = [0, 0, 16], sizes = [2, 8, 16], strides = [1, 1, 1]} : vector<2x8x64xf32> to vector<2x8x16xf32>
    %256 = arith.truncf %255 : vector<2x8x16xf32> to vector<2x8x16xbf16>
    "tpu.trace_start"() <{level = 10 : i32, message = "bqk,bkd->bqd"}> : () -> ()
    %cst_84 = arith.constant dense<0.000000e+00> : vector<2x8x16xf32>
    %257 = tpu.matmul %254, %256, %cst_84 {dimension_numbers = #tpu.dot_dimension_numbers<[2], [1], [1], [2], [0, 0, 0, 1, 1, 2], [0], [0]>} : vector<2x8x8xbf16>, vector<2x8x16xbf16>, vector<2x8x16xf32> -> vector<2x8x16xf32>
    "tpu.trace_stop"() : () -> ()
    %258 = vector.shape_cast %257 : vector<2x8x16xf32> to vector<16x16xf32>
    %259 = vector.extract_strided_slice %214 {offsets = [0, 0, 32], sizes = [2, 8, 16], strides = [1, 1, 1]} : vector<2x8x64xf32> to vector<2x8x16xf32>
    %260 = arith.truncf %259 : vector<2x8x16xf32> to vector<2x8x16xbf16>
    %261 = vector.extract_strided_slice %216 {offsets = [0, 0, 32], sizes = [2, 8, 16], strides = [1, 1, 1]} : vector<2x8x64xf32> to vector<2x8x16xf32>
    %262 = arith.truncf %261 : vector<2x8x16xf32> to vector<2x8x16xbf16>
    "tpu.trace_start"() <{level = 10 : i32, message = "bqd,bkd->bqk"}> : () -> ()
    %cst_85 = arith.constant dense<0.000000e+00> : vector<2x8x8xf32>
    %263 = tpu.matmul %260, %262, %cst_85 {dimension_numbers = #tpu.dot_dimension_numbers<[2], [2], [1], [1], [0, 0, 0, 1, 1, 1], [0], [0]>} : vector<2x8x16xbf16>, vector<2x8x16xbf16>, vector<2x8x8xf32> -> vector<2x8x8xf32>
    "tpu.trace_stop"() : () -> ()
    %264 = arith.addf %263, %32 : vector<2x8x8xf32>
    %cst_86 = arith.constant dense<0xFF800000> : vector<2x8xf32>
    %265 = vector.multi_reduction <maximumf>, %264, %cst_86 [2] : vector<2x8x8xf32> to vector<2x8xf32>
    %266 = vector.shape_cast %265 : vector<2x8xf32> to vector<2x8x1xf32>
    %267 = vector.broadcast %266 : vector<2x8x1xf32> to vector<2x8x8xf32>
    %268 = arith.subf %264, %267 : vector<2x8x8xf32>
    %269 = math.exp %268 : vector<2x8x8xf32>
    %cst_87 = arith.constant dense<0.000000e+00> : vector<2x8xf32>
    %270 = vector.multi_reduction <add>, %269, %cst_87 [2] : vector<2x8x8xf32> to vector<2x8xf32>
    %271 = vector.shape_cast %270 : vector<2x8xf32> to vector<2x8x1xf32>
    %272 = vector.broadcast %271 : vector<2x8x1xf32> to vector<2x8x8xf32>
    %273 = arith.divf %269, %272 : vector<2x8x8xf32>
    %274 = arith.truncf %273 : vector<2x8x8xf32> to vector<2x8x8xbf16>
    %275 = vector.extract_strided_slice %218 {offsets = [0, 0, 32], sizes = [2, 8, 16], strides = [1, 1, 1]} : vector<2x8x64xf32> to vector<2x8x16xf32>
    %276 = arith.truncf %275 : vector<2x8x16xf32> to vector<2x8x16xbf16>
    "tpu.trace_start"() <{level = 10 : i32, message = "bqk,bkd->bqd"}> : () -> ()
    %cst_88 = arith.constant dense<0.000000e+00> : vector<2x8x16xf32>
    %277 = tpu.matmul %274, %276, %cst_88 {dimension_numbers = #tpu.dot_dimension_numbers<[2], [1], [1], [2], [0, 0, 0, 1, 1, 2], [0], [0]>} : vector<2x8x8xbf16>, vector<2x8x16xbf16>, vector<2x8x16xf32> -> vector<2x8x16xf32>
    "tpu.trace_stop"() : () -> ()
    %278 = vector.shape_cast %277 : vector<2x8x16xf32> to vector<16x16xf32>
    %279 = vector.extract_strided_slice %214 {offsets = [0, 0, 48], sizes = [2, 8, 16], strides = [1, 1, 1]} : vector<2x8x64xf32> to vector<2x8x16xf32>
    %280 = arith.truncf %279 : vector<2x8x16xf32> to vector<2x8x16xbf16>
    %281 = vector.extract_strided_slice %216 {offsets = [0, 0, 48], sizes = [2, 8, 16], strides = [1, 1, 1]} : vector<2x8x64xf32> to vector<2x8x16xf32>
    %282 = arith.truncf %281 : vector<2x8x16xf32> to vector<2x8x16xbf16>
    "tpu.trace_start"() <{level = 10 : i32, message = "bqd,bkd->bqk"}> : () -> ()
    %cst_89 = arith.constant dense<0.000000e+00> : vector<2x8x8xf32>
    %283 = tpu.matmul %280, %282, %cst_89 {dimension_numbers = #tpu.dot_dimension_numbers<[2], [2], [1], [1], [0, 0, 0, 1, 1, 1], [0], [0]>} : vector<2x8x16xbf16>, vector<2x8x16xbf16>, vector<2x8x8xf32> -> vector<2x8x8xf32>
    "tpu.trace_stop"() : () -> ()
    %284 = arith.addf %283, %32 : vector<2x8x8xf32>
    %cst_90 = arith.constant dense<0xFF800000> : vector<2x8xf32>
    %285 = vector.multi_reduction <maximumf>, %284, %cst_90 [2] : vector<2x8x8xf32> to vector<2x8xf32>
    %286 = vector.shape_cast %285 : vector<2x8xf32> to vector<2x8x1xf32>
    %287 = vector.broadcast %286 : vector<2x8x1xf32> to vector<2x8x8xf32>
    %288 = arith.subf %284, %287 : vector<2x8x8xf32>
    %289 = math.exp %288 : vector<2x8x8xf32>
    %cst_91 = arith.constant dense<0.000000e+00> : vector<2x8xf32>
    %290 = vector.multi_reduction <add>, %289, %cst_91 [2] : vector<2x8x8xf32> to vector<2x8xf32>
    %291 = vector.shape_cast %290 : vector<2x8xf32> to vector<2x8x1xf32>
    %292 = vector.broadcast %291 : vector<2x8x1xf32> to vector<2x8x8xf32>
    %293 = arith.divf %289, %292 : vector<2x8x8xf32>
    %294 = arith.truncf %293 : vector<2x8x8xf32> to vector<2x8x8xbf16>
    %295 = vector.extract_strided_slice %218 {offsets = [0, 0, 48], sizes = [2, 8, 16], strides = [1, 1, 1]} : vector<2x8x64xf32> to vector<2x8x16xf32>
    %296 = arith.truncf %295 : vector<2x8x16xf32> to vector<2x8x16xbf16>
    "tpu.trace_start"() <{level = 10 : i32, message = "bqk,bkd->bqd"}> : () -> ()
    %cst_92 = arith.constant dense<0.000000e+00> : vector<2x8x16xf32>
    %297 = tpu.matmul %294, %296, %cst_92 {dimension_numbers = #tpu.dot_dimension_numbers<[2], [1], [1], [2], [0, 0, 0, 1, 1, 2], [0], [0]>} : vector<2x8x8xbf16>, vector<2x8x16xbf16>, vector<2x8x16xf32> -> vector<2x8x16xf32>
    "tpu.trace_stop"() : () -> ()
    %298 = vector.shape_cast %297 : vector<2x8x16xf32> to vector<16x16xf32>
    %299 = tpu.concatenate %238, %258, %278, %298 in 1 : vector<16x16xf32>, vector<16x16xf32>, vector<16x16xf32>, vector<16x16xf32> -> vector<16x64xf32>
    %c1_93 = arith.constant 1 : index
    %c0_94 = arith.constant 0 : index
    %c0_95 = arith.constant 0 : index
    %300 = vector.load %arg7[%c1_93, %c0_94, %c0_95] : memref<2x64x64xf32, #tpu.memory_space<vmem>>, vector<1x64x64xf32>
    %301 = vector.shape_cast %300 : vector<1x64x64xf32> to vector<64x64xf32>
    %302 = arith.truncf %299 : vector<16x64xf32> to vector<16x64xbf16>
    %303 = arith.truncf %301 : vector<64x64xf32> to vector<64x64xbf16>
    %cst_96 = arith.constant dense<0.000000e+00> : vector<16x64xf32>
    %304 = tpu.matmul %302, %303, %cst_96 {dimension_numbers = #tpu.dot_dimension_numbers<[1], [0], [0], [1], [0, 0, 1, 1], [], []>} : vector<16x64xbf16>, vector<64x64xbf16>, vector<16x64xf32> -> vector<16x64xf32>
    %305 = arith.addf %205, %304 : vector<16x64xf32>
    %c1_97 = arith.constant 1 : index
    %c0_98 = arith.constant 0 : index
    %c0_99 = arith.constant 0 : index
    %306 = vector.load %arg8[%c1_97, %c0_98, %c0_99] : memref<2x1x64xf32, #tpu.memory_space<vmem>>, vector<1x1x64xf32>
    %307 = vector.shape_cast %306 : vector<1x1x64xf32> to vector<1x64xf32>
    %c1_100 = arith.constant 1 : index
    %c0_101 = arith.constant 0 : index
    %c0_102 = arith.constant 0 : index
    %308 = vector.load %arg9[%c1_100, %c0_101, %c0_102] : memref<2x1x64xf32, #tpu.memory_space<vmem>>, vector<1x1x64xf32>
    %309 = vector.shape_cast %308 : vector<1x1x64xf32> to vector<1x64xf32>
    %cst_103 = arith.constant dense<0.000000e+00> : vector<16xf32>
    %310 = vector.multi_reduction <add>, %305, %cst_103 [1] : vector<16x64xf32> to vector<16xf32>
    %311 = vector.shape_cast %310 : vector<16xf32> to vector<16x1xf32>
    %cst_104 = arith.constant 6.400000e+01 : f32
    %312 = vector.broadcast %cst_104 : f32 to vector<16x1xf32>
    %313 = arith.divf %311, %312 : vector<16x1xf32>
    %314 = arith.mulf %305, %305 : vector<16x64xf32>
    %cst_105 = arith.constant dense<0.000000e+00> : vector<16xf32>
    %315 = vector.multi_reduction <add>, %314, %cst_105 [1] : vector<16x64xf32> to vector<16xf32>
    %316 = vector.shape_cast %315 : vector<16xf32> to vector<16x1xf32>
    %cst_106 = arith.constant 6.400000e+01 : f32
    %317 = vector.broadcast %cst_106 : f32 to vector<16x1xf32>
    %318 = arith.divf %316, %317 : vector<16x1xf32>
    %319 = arith.mulf %313, %313 : vector<16x1xf32>
    %320 = arith.subf %318, %319 : vector<16x1xf32>
    %321 = vector.broadcast %313 : vector<16x1xf32> to vector<16x64xf32>
    %322 = arith.subf %305, %321 : vector<16x64xf32>
    %cst_107 = arith.constant 9.99999974E-6 : f32
    %323 = vector.broadcast %cst_107 : f32 to vector<16x1xf32>
    %324 = arith.addf %320, %323 : vector<16x1xf32>
    %325 = math.rsqrt %324 : vector<16x1xf32>
    %326 = vector.broadcast %325 : vector<16x1xf32> to vector<16x64xf32>
    %327 = arith.mulf %322, %326 : vector<16x64xf32>
    %328 = vector.broadcast %307 : vector<1x64xf32> to vector<16x64xf32>
    %329 = arith.mulf %327, %328 : vector<16x64xf32>
    %330 = vector.broadcast %309 : vector<1x64xf32> to vector<16x64xf32>
    %331 = arith.addf %329, %330 : vector<16x64xf32>
    %c1_108 = arith.constant 1 : index
    %c0_109 = arith.constant 0 : index
    %c0_110 = arith.constant 0 : index
    %332 = vector.load %arg10[%c1_108, %c0_109, %c0_110] : memref<2x64x128xf32, #tpu.memory_space<vmem>>, vector<1x64x128xf32>
    %333 = vector.shape_cast %332 : vector<1x64x128xf32> to vector<64x128xf32>
    %334 = arith.truncf %331 : vector<16x64xf32> to vector<16x64xbf16>
    %335 = arith.truncf %333 : vector<64x128xf32> to vector<64x128xbf16>
    %cst_111 = arith.constant dense<0.000000e+00> : vector<16x128xf32>
    %336 = tpu.matmul %334, %335, %cst_111 {dimension_numbers = #tpu.dot_dimension_numbers<[1], [0], [0], [1], [0, 0, 1, 1], [], []>} : vector<16x64xbf16>, vector<64x128xbf16>, vector<16x128xf32> -> vector<16x128xf32>
    %c1_112 = arith.constant 1 : index
    %c0_113 = arith.constant 0 : index
    %c0_114 = arith.constant 0 : index
    %337 = vector.load %arg11[%c1_112, %c0_113, %c0_114] : memref<2x1x128xf32, #tpu.memory_space<vmem>>, vector<1x1x128xf32>
    %338 = vector.shape_cast %337 : vector<1x1x128xf32> to vector<1x128xf32>
    %339 = vector.broadcast %338 : vector<1x128xf32> to vector<16x128xf32>
    %340 = arith.addf %336, %339 : vector<16x128xf32>
    %cst_115 = arith.constant 0.000000e+00 : f32
    %341 = vector.broadcast %cst_115 : f32 to vector<16x128xf32>
    %342 = arith.maximumf %340, %341 : vector<16x128xf32>
    %c1_116 = arith.constant 1 : index
    %c0_117 = arith.constant 0 : index
    %c0_118 = arith.constant 0 : index
    %343 = vector.load %arg12[%c1_116, %c0_117, %c0_118] : memref<2x128x64xf32, #tpu.memory_space<vmem>>, vector<1x128x64xf32>
    %344 = vector.shape_cast %343 : vector<1x128x64xf32> to vector<128x64xf32>
    %345 = arith.truncf %342 : vector<16x128xf32> to vector<16x128xbf16>
    %346 = arith.truncf %344 : vector<128x64xf32> to vector<128x64xbf16>
    %cst_119 = arith.constant dense<0.000000e+00> : vector<16x64xf32>
    %347 = tpu.matmul %345, %346, %cst_119 {dimension_numbers = #tpu.dot_dimension_numbers<[1], [0], [0], [1], [0, 0, 1, 1], [], []>} : vector<16x128xbf16>, vector<128x64xbf16>, vector<16x64xf32> -> vector<16x64xf32>
    %c1_120 = arith.constant 1 : index
    %c0_121 = arith.constant 0 : index
    %c0_122 = arith.constant 0 : index
    %348 = vector.load %arg13[%c1_120, %c0_121, %c0_122] : memref<2x1x64xf32, #tpu.memory_space<vmem>>, vector<1x1x64xf32>
    %349 = vector.shape_cast %348 : vector<1x1x64xf32> to vector<1x64xf32>
    %350 = vector.broadcast %349 : vector<1x64xf32> to vector<16x64xf32>
    %351 = arith.addf %347, %350 : vector<16x64xf32>
    %352 = arith.addf %331, %351 : vector<16x64xf32>
    %c1_123 = arith.constant 1 : index
    %c0_124 = arith.constant 0 : index
    %c0_125 = arith.constant 0 : index
    %353 = vector.load %arg14[%c1_123, %c0_124, %c0_125] : memref<2x1x64xf32, #tpu.memory_space<vmem>>, vector<1x1x64xf32>
    %354 = vector.shape_cast %353 : vector<1x1x64xf32> to vector<1x64xf32>
    %c1_126 = arith.constant 1 : index
    %c0_127 = arith.constant 0 : index
    %c0_128 = arith.constant 0 : index
    %355 = vector.load %arg15[%c1_126, %c0_127, %c0_128] : memref<2x1x64xf32, #tpu.memory_space<vmem>>, vector<1x1x64xf32>
    %356 = vector.shape_cast %355 : vector<1x1x64xf32> to vector<1x64xf32>
    %cst_129 = arith.constant dense<0.000000e+00> : vector<16xf32>
    %357 = vector.multi_reduction <add>, %352, %cst_129 [1] : vector<16x64xf32> to vector<16xf32>
    %358 = vector.shape_cast %357 : vector<16xf32> to vector<16x1xf32>
    %cst_130 = arith.constant 6.400000e+01 : f32
    %359 = vector.broadcast %cst_130 : f32 to vector<16x1xf32>
    %360 = arith.divf %358, %359 : vector<16x1xf32>
    %361 = arith.mulf %352, %352 : vector<16x64xf32>
    %cst_131 = arith.constant dense<0.000000e+00> : vector<16xf32>
    %362 = vector.multi_reduction <add>, %361, %cst_131 [1] : vector<16x64xf32> to vector<16xf32>
    %363 = vector.shape_cast %362 : vector<16xf32> to vector<16x1xf32>
    %cst_132 = arith.constant 6.400000e+01 : f32
    %364 = vector.broadcast %cst_132 : f32 to vector<16x1xf32>
    %365 = arith.divf %363, %364 : vector<16x1xf32>
    %366 = arith.mulf %360, %360 : vector<16x1xf32>
    %367 = arith.subf %365, %366 : vector<16x1xf32>
    %368 = vector.broadcast %360 : vector<16x1xf32> to vector<16x64xf32>
    %369 = arith.subf %352, %368 : vector<16x64xf32>
    %cst_133 = arith.constant 9.99999974E-6 : f32
    %370 = vector.broadcast %cst_133 : f32 to vector<16x1xf32>
    %371 = arith.addf %367, %370 : vector<16x1xf32>
    %372 = math.rsqrt %371 : vector<16x1xf32>
    %373 = vector.broadcast %372 : vector<16x1xf32> to vector<16x64xf32>
    %374 = arith.mulf %369, %373 : vector<16x64xf32>
    %375 = vector.broadcast %354 : vector<1x64xf32> to vector<16x64xf32>
    %376 = arith.mulf %374, %375 : vector<16x64xf32>
    %377 = vector.broadcast %356 : vector<1x64xf32> to vector<16x64xf32>
    %378 = arith.addf %376, %377 : vector<16x64xf32>
    %379 = vector.shape_cast %378 : vector<16x64xf32> to vector<2x8x64xf32>
    %380 = vector.extract_strided_slice %379 {offsets = [0, 0, 0], sizes = [2, 1, 64], strides = [1, 1, 1]} : vector<2x8x64xf32> to vector<2x1x64xf32>
    %381 = vector.shape_cast %380 : vector<2x1x64xf32> to vector<2x64xf32>
    %c0_134 = arith.constant 0 : index
    %c0_135 = arith.constant 0 : index
    %382 = vector.load %arg16[%c0_134, %c0_135] : memref<64x128xf32, #tpu.memory_space<vmem>>, vector<64x128xf32>
    %383 = arith.truncf %381 : vector<2x64xf32> to vector<2x64xbf16>
    %384 = arith.truncf %382 : vector<64x128xf32> to vector<64x128xbf16>
    %cst_136 = arith.constant dense<0.000000e+00> : vector<2x128xf32>
    %385 = tpu.matmul %383, %384, %cst_136 {dimension_numbers = #tpu.dot_dimension_numbers<[1], [0], [0], [1], [0, 0, 1, 1], [], []>} : vector<2x64xbf16>, vector<64x128xbf16>, vector<2x128xf32> -> vector<2x128xf32>
    %c0_137 = arith.constant 0 : index
    %c0_138 = arith.constant 0 : index
    %386 = vector.load %arg17[%c0_137, %c0_138] : memref<1x128xf32, #tpu.memory_space<vmem>>, vector<1x128xf32>
    %387 = vector.broadcast %386 : vector<1x128xf32> to vector<2x128xf32>
    %388 = arith.addf %385, %387 : vector<2x128xf32>
    %cst_139 = arith.constant 0.000000e+00 : f32
    %389 = vector.broadcast %cst_139 : f32 to vector<2x128xf32>
    %390 = arith.maximumf %388, %389 : vector<2x128xf32>
    %c0_140 = arith.constant 0 : index
    %c0_141 = arith.constant 0 : index
    %391 = vector.load %arg18[%c0_140, %c0_141] : memref<128x128xf32, #tpu.memory_space<vmem>>, vector<128x128xf32>
    %392 = arith.truncf %390 : vector<2x128xf32> to vector<2x128xbf16>
    %393 = arith.truncf %391 : vector<128x128xf32> to vector<128x128xbf16>
    %cst_142 = arith.constant dense<0.000000e+00> : vector<2x128xf32>
    %394 = tpu.matmul %392, %393, %cst_142 {dimension_numbers = #tpu.dot_dimension_numbers<[1], [0], [0], [1], [0, 0, 1, 1], [], []>} : vector<2x128xbf16>, vector<128x128xbf16>, vector<2x128xf32> -> vector<2x128xf32>
    %c0_143 = arith.constant 0 : index
    %c0_144 = arith.constant 0 : index
    %395 = vector.load %arg19[%c0_143, %c0_144] : memref<1x128xf32, #tpu.memory_space<vmem>>, vector<1x128xf32>
    %396 = vector.broadcast %395 : vector<1x128xf32> to vector<2x128xf32>
    %397 = arith.addf %394, %396 : vector<2x128xf32>
    %c0_145 = arith.constant 0 : index
    %c0_146 = arith.constant 0 : index
    %398 = vector.load %arg20[%c0_145, %c0_146] : memref<2x128xf32, #tpu.memory_space<vmem>>, vector<2x128xf32>
    tpu.vector_store %arg20[%c0_145, %c0_146], %397 {strides = array<i32>} : memref<2x128xf32, #tpu.memory_space<vmem>>, vector<2x128xf32>,
    return
  }
  func.func @transform_0(%arg0: i32) -> (i32, i32) {
    %c0_i32 = arith.constant 0 : i32
    %c0_i32_0 = arith.constant 0 : i32
    return %arg0, %c0_i32 : i32, i32
  }
  func.func @transform_1(%arg0: i32) -> (i32, i32) {
    %c0_i32 = arith.constant 0 : i32
    %c0_i32_0 = arith.constant 0 : i32
    %c0_i32_1 = arith.constant 0 : i32
    return %c0_i32, %c0_i32_0 : i32, i32
  }
  func.func @transform_2(%arg0: i32) -> (i32, i32) {
    %c0_i32 = arith.constant 0 : i32
    %c0_i32_0 = arith.constant 0 : i32
    %c0_i32_1 = arith.constant 0 : i32
    return %c0_i32, %c0_i32_0 : i32, i32
  }
  func.func @transform_3(%arg0: i32) -> (i32, i32) {
    %c0_i32 = arith.constant 0 : i32
    %c0_i32_0 = arith.constant 0 : i32
    %c0_i32_1 = arith.constant 0 : i32
    return %c0_i32, %c0_i32_0 : i32, i32
  }
  func.func @transform_4(%arg0: i32) -> (i32, i32) {
    %c0_i32 = arith.constant 0 : i32
    %c0_i32_0 = arith.constant 0 : i32
    %c0_i32_1 = arith.constant 0 : i32
    return %c0_i32, %c0_i32_0 : i32, i32
  }
  func.func @transform_5(%arg0: i32) -> (i32, i32, i32) {
    %c0_i32 = arith.constant 0 : i32
    %c0_i32_0 = arith.constant 0 : i32
    %c0_i32_1 = arith.constant 0 : i32
    %c0_i32_2 = arith.constant 0 : i32
    return %c0_i32, %c0_i32_0, %c0_i32_1 : i32, i32, i32
  }
  func.func @transform_6(%arg0: i32) -> (i32, i32, i32) {
    %c0_i32 = arith.constant 0 : i32
    %c0_i32_0 = arith.constant 0 : i32
    %c0_i32_1 = arith.constant 0 : i32
    %c0_i32_2 = arith.constant 0 : i32
    return %c0_i32, %c0_i32_0, %c0_i32_1 : i32, i32, i32
  }
  func.func @transform_7(%arg0: i32) -> (i32, i32, i32) {
    %c0_i32 = arith.constant 0 : i32
    %c0_i32_0 = arith.constant 0 : i32
    %c0_i32_1 = arith.constant 0 : i32
    %c0_i32_2 = arith.constant 0 : i32
    return %c0_i32, %c0_i32_0, %c0_i32_1 : i32, i32, i32
  }
  func.func @transform_8(%arg0: i32) -> (i32, i32, i32) {
    %c0_i32 = arith.constant 0 : i32
    %c0_i32_0 = arith.constant 0 : i32
    %c0_i32_1 = arith.constant 0 : i32
    %c0_i32_2 = arith.constant 0 : i32
    return %c0_i32, %c0_i32_0, %c0_i32_1 : i32, i32, i32
  }
  func.func @transform_9(%arg0: i32) -> (i32, i32, i32) {
    %c0_i32 = arith.constant 0 : i32
    %c0_i32_0 = arith.constant 0 : i32
    %c0_i32_1 = arith.constant 0 : i32
    %c0_i32_2 = arith.constant 0 : i32
    return %c0_i32, %c0_i32_0, %c0_i32_1 : i32, i32, i32
  }
  func.func @transform_10(%arg0: i32) -> (i32, i32, i32) {
    %c0_i32 = arith.constant 0 : i32
    %c0_i32_0 = arith.constant 0 : i32
    %c0_i32_1 = arith.constant 0 : i32
    %c0_i32_2 = arith.constant 0 : i32
    return %c0_i32, %c0_i32_0, %c0_i32_1 : i32, i32, i32
  }
  func.func @transform_11(%arg0: i32) -> (i32, i32, i32) {
    %c0_i32 = arith.constant 0 : i32
    %c0_i32_0 = arith.constant 0 : i32
    %c0_i32_1 = arith.constant 0 : i32
    %c0_i32_2 = arith.constant 0 : i32
    return %c0_i32, %c0_i32_0, %c0_i32_1 : i32, i32, i32
  }
  func.func @transform_12(%arg0: i32) -> (i32, i32, i32) {
    %c0_i32 = arith.constant 0 : i32
    %c0_i32_0 = arith.constant 0 : i32
    %c0_i32_1 = arith.constant 0 : i32
    %c0_i32_2 = arith.constant 0 : i32
    return %c0_i32, %c0_i32_0, %c0_i32_1 : i32, i32, i32
  }
  func.func @transform_13(%arg0: i32) -> (i32, i32, i32) {
    %c0_i32 = arith.constant 0 : i32
    %c0_i32_0 = arith.constant 0 : i32
    %c0_i32_1 = arith.constant 0 : i32
    %c0_i32_2 = arith.constant 0 : i32
    return %c0_i32, %c0_i32_0, %c0_i32_1 : i32, i32, i32
  }
  func.func @transform_14(%arg0: i32) -> (i32, i32, i32) {
    %c0_i32 = arith.constant 0 : i32
    %c0_i32_0 = arith.constant 0 : i32
    %c0_i32_1 = arith.constant 0 : i32
    %c0_i32_2 = arith.constant 0 : i32
    return %c0_i32, %c0_i32_0, %c0_i32_1 : i32, i32, i32
  }
  func.func @transform_15(%arg0: i32) -> (i32, i32) {
    %c0_i32 = arith.constant 0 : i32
    %c0_i32_0 = arith.constant 0 : i32
    %c0_i32_1 = arith.constant 0 : i32
    return %c0_i32, %c0_i32_0 : i32, i32
  }
  func.func @transform_16(%arg0: i32) -> (i32, i32) {
    %c0_i32 = arith.constant 0 : i32
    %c0_i32_0 = arith.constant 0 : i32
    %c0_i32_1 = arith.constant 0 : i32
    return %c0_i32, %c0_i32_0 : i32, i32
  }
  func.func @transform_17(%arg0: i32) -> (i32, i32) {
    %c0_i32 = arith.constant 0 : i32
    %c0_i32_0 = arith.constant 0 : i32
    %c0_i32_1 = arith.constant 0 : i32
    return %c0_i32, %c0_i32_0 : i32, i32
  }
  func.func @transform_18(%arg0: i32) -> (i32, i32) {
    %c0_i32 = arith.constant 0 : i32
    %c0_i32_0 = arith.constant 0 : i32
    %c0_i32_1 = arith.constant 0 : i32
    return %c0_i32, %c0_i32_0 : i32, i32
  }
  func.func @transform_19(%arg0: i32) -> (i32, i32) {
    %c0_i32 = arith.constant 0 : i32
    %c0_i32_0 = arith.constant 0 : i32
    return %arg0, %c0_i32 : i32, i32
  }
}

</mosaic_0001>

<bundles_post_ra>
// kernel: c_vit_forward.1
= control target key start
LH: loop header
LB: loop body
LE: loop exit
PB: predicated region body
PF: predicated region fallthrough
CT: control target
= control target key end

     0   :  { %s4785_s0 = inlined_call_operand.vmem [shape: f32[16,256], index: 0, kind: input, shape index: {}]   ;;  %s4786_s1 = inlined_call_operand.vmem [shape: f32[256,64], index: 1, kind: input, shape index: {}]   ;;  %s4787_s2 = inlined_call_operand.vmem [shape: f32[1,64], index: 2, kind: input, shape index: {}]   ;;  %s4788_s3 = inlined_call_operand.vmem [shape: f32[1,64], index: 3, kind: input, shape index: {}]   ;;  %s4789_s4 = inlined_call_operand.vmem [shape: f32[8,64], index: 4, kind: input, shape index: {}]   ;;  %s4790_s5 = inlined_call_operand.vmem [shape: f32[2,64,192], index: 5, kind: input, shape index: {}]   ;;  %s4791_s6 = inlined_call_operand.vmem [shape: f32[2,64,64], index: 6, kind: input, shape index: {}]   ;;  %s4792_s7 = inlined_call_operand.vmem [shape: f32[2,1,64], index: 7, kind: input, shape index: {}]   ;;  %s4793_s8 = inlined_call_operand.vmem [shape: f32[2,1,64], index: 8, kind: input, shape index: {}]   ;;  %s4794_s9 = inlined_call_operand.vmem [shape: f32[2,64,128], index: 9, kind: input, shape index: {}]   ;;  %s4795_s10 = inlined_call_operand.vmem [shape: f32[2,1,128], index: 10, kind: input, shape index: {}]   ;;  %s4796_s11 = inlined_call_operand.vmem [shape: f32[2,128,64], index: 11, kind: input, shape index: {}]   ;;  %s4797_s12 = inlined_call_operand.vmem [shape: f32[2,1,64], index: 12, kind: input, shape index: {}]   ;;  %s4798_s13 = inlined_call_operand.vmem [shape: f32[2,1,64], index: 13, kind: input, shape index: {}]   ;;  %s4799_s14 = inlined_call_operand.vmem [shape: f32[2,1,64], index: 14, kind: input, shape index: {}]   ;;  %s4800_s15 = inlined_call_operand.vmem [shape: f32[64,128], index: 15, kind: input, shape index: {}]   ;;  %s4801_s16 = inlined_call_operand.vmem [shape: f32[1,128], index: 16, kind: input, shape index: {}]   ;;  %s4802_s17 = inlined_call_operand.vmem [shape: f32[128,128], index: 17, kind: input, shape index: {}]   ;;  %s4803_s18 = inlined_call_operand.vmem [shape: f32[1,128], index: 18, kind: input, shape index: {}]   ;;  %s4804_s19 = inlined_call_operand.hbm [shape: f32[2,128], index: 19, kind: output, shape index: {}]  }
   0x1   :  { %4809 = sst [smem:[#allocation5_spill]] %s4785_s0 }
   0x2   :  { %4810 = sst [smem:[#allocation6_spill]] %s4786_s1 }
   0x3   :  { %4811 = sst [smem:[#allocation7_spill]] %s4787_s2 }
   0x4   :  { %4812 = sst [smem:[#allocation8_spill]] %s4788_s3 }
   0x5   :  { %s4813_s20 = sld [smem:[#allocation6_spill]]  ;;  %s4814_s26 = sld [smem:[#allocation5_spill]]  ;;  %v188_v30 = vld [vmem:[%s4790_s5 + $0x8] sm:$0xff]  ;;  %v190_v31 = vld [vmem:[%s4790_s5 + $0x18] sm:$0xff]  ;;  %v187_v32 = vld [vmem:[%s4790_s5] sm:$0xff] }
   0x6   :  { %v205_v35 = vpack.c.bf16 %v190_v31, %v188_v30  ;;  %v189_v36 = vld [vmem:[%s4790_s5 + $0x10] sm:$0xff] }
   0xb   :  { %v84_v0 = vld [vmem:[%s4813_s20 + $0x80] sm:$0xff]  ;;  %v85_v1 = vld [vmem:[%s4813_s20 + $0x88] sm:$0xff]  ;;  %v86_v5 = vld [vmem:[%s4813_s20 + $0x90] sm:$0xff] }
   0xc   :  { %v68_v2 = vld [vmem:[%s4813_s20] sm:$0xff]  ;;  %v110_v3 = vpack.c.bf16 %v85_v1, %v84_v0  ;;  %v69_v4 = vld [vmem:[%s4813_s20 + $0x8] sm:$0xff]  ;;  %v87_v6 = vld [vmem:[%s4813_s20 + $0x98] sm:$0xff] }
   0xd   :  { %v102_v7 = vpack.c.bf16 %v69_v4, %v68_v2  ;;  %v111_v8 = vpack.c.bf16 %v87_v6, %v86_v5  ;;  %v70_v9 = vld [vmem:[%s4813_s20 + $0x10] sm:$0xff]  ;;  %v71_v10 = vld [vmem:[%s4813_s20 + $0x18] sm:$0xff]  ;;  %v88_v11 = vld [vmem:[%s4813_s20 + $0xa0] sm:$0xff] }
   0xe   :  { %3039 = vmatprep.subr.bf16.mxu0 %v110_v3  ;;  %v89_v12 = vld [vmem:[%s4813_s20 + $0xa8] sm:$0xff]  ;;  %v103_v13 = vpack.c.bf16 %v71_v10, %v70_v9  ;;  %v72_v15 = vld [vmem:[%s4813_s20 + $0x20] sm:$0xff]  ;;  %v90_v17 = vld [vmem:[%s4813_s20 + $0xb0] sm:$0xff] }
   0xf   :  { %3040 = vmatpush3.bf16.msra.mxu0 %v102_v7  ;;  %v112_v14 = vpack.c.bf16 %v89_v12, %v88_v11  ;;  %v73_v16 = vld [vmem:[%s4813_s20 + $0x28] sm:$0xff]  ;;  %v91_v18 = vld [vmem:[%s4813_s20 + $0xb8] sm:$0xff]  ;;  %v74_v21 = vld [vmem:[%s4813_s20 + $0x30] sm:$0xff] }
  0x10   :  { %3041 = vmatprep.subr.bf16.mxu0 %v111_v8  ;;  %v104_v19 = vpack.c.bf16 %v73_v16, %v72_v15  ;;  %v113_v20 = vpack.c.bf16 %v91_v18, %v90_v17  ;;  %v75_v22 = vld [vmem:[%s4813_s20 + $0x38] sm:$0xff]  ;;  %v92_v23 = vld [vmem:[%s4813_s20 + $0xc0] sm:$0xff]  ;;  %v93_v24 = vld [vmem:[%s4813_s20 + $0xc8] sm:$0xff] }
  0x11   :  { %v65_v25 = vld [vmem:[%s4814_s26 + $0x8] sm:$0xff]  ;;  %v76_v26 = vld [vmem:[%s4813_s20 + $0x40] sm:$0xff]  ;;  %v67_v27 = vld [vmem:[%s4814_s26 + $0x18] sm:$0xff]  ;;  %v105_v28 = vpack.c.bf16 %v75_v22, %v74_v21  ;;  %v114_v33 = vpack.c.bf16 %v93_v24, %v92_v23 }
  0x12   :  { %v101_v29 = vpack.c.bf16 %v67_v27, %v65_v25  ;;  %v77_v34 = vld [vmem:[%s4813_s20 + $0x48] sm:$0xff] }
  0x13   :  { %3042 = vmatpush3.bf16.msra.mxu0 %v103_v13 }
  0x14   :  { %3043 = vmatprep.subr.bf16.mxu0 %v112_v14 }
  0x17   :  { %3044 = vmatpush3.bf16.msra.mxu0 %v104_v19 }
  0x18   :  { %3045 = vmatprep.subr.bf16.mxu0 %v113_v20 }
  0x19   :  { %24 = vsyncpa [#allocation3], 0  ;;  %v94_v37 = vld [vmem:[%s4813_s20 + $0xd0] sm:$0xff]  ;;  %v95_v38 = vld [vmem:[%s4813_s20 + $0xd8] sm:$0xff]  ;;  %157 = vmatprep.mubr.bf16.mxu0 %v101_v29  ;;  %v204_v39 = vpack.c.bf16 %v189_v36, %v187_v32  ;;  %216 = vmatprep.subr.bf16.mxu1 %v205_v35  ;;  %v106_v40 = vpack.c.bf16 %v77_v34, %v76_v26  ;;  %v3635_v14 = vmov 0   ;;  %v166_v15 = vlaneseq  ;;  %s4815_s3 = sld [smem:[#allocation7_spill]] }
  0x1a   :  { %v115_v41 = vpack.c.bf16 %v95_v38, %v94_v37  ;;  %v78_v42 = vld [vmem:[%s4813_s20 + $0x50] sm:$0xff]  ;;  %v79_v43 = vld [vmem:[%s4813_s20 + $0x58] sm:$0xff]  ;;  %v96_v44 = vld [vmem:[%s4813_s20 + $0xe0] sm:$0xff]  ;;  %248 = vmatprep.mubr.bf16.mxu1 %v3635_v14  ;;  %s4816_s29 = sld [smem:[#allocation8_spill]]  ;;  %vm212_vm1 = vcmask 523264   ;;  %vm3637_vm2 = vmmov 0  }
  0x1b   :  { %3046 = vmatpush3.bf16.msra.mxu0 %v105_v28  ;;  %217 = vmatpush1.bf16.msra.mxu1 %v204_v39  ;;  %v97_v45 = vld [vmem:[%s4813_s20 + $0xe8] sm:$0xff]  ;;  %v107_v46 = vpack.c.bf16 %v79_v43, %v78_v42  ;;  %v80_v48 = vld [vmem:[%s4813_s20 + $0x60] sm:$0xff]  ;;  %v98_v50 = vld [vmem:[%s4813_s20 + $0xf0] sm:$0xff]  ;;  %v167_v16 = vshrl.u32 %v166_v15, 7  ;;  %vm268_vm3 = vcmask 130048   ;;  %vm394_vm4 = vcmask 1043456  }
  0x1c   :  { %3047 = vmatprep.subr.bf16.mxu0 %v114_v33  ;;  %v116_v47 = vpack.c.bf16 %v97_v45, %v96_v44  ;;  %v81_v49 = vld [vmem:[%s4813_s20 + $0x68] sm:$0xff]  ;;  %v99_v51 = vld [vmem:[%s4813_s20 + $0xf8] sm:$0xff]  ;;  %v82_v54 = vld [vmem:[%s4813_s20 + $0x70] sm:$0xff]  ;;  %v3636_v33 = vmov 0.0   ;;  %vm364_vm6 = vcmask 64512   ;;  %s3640_s21 = smov 48  }
  0x1d   :  { %v108_v52 = vpack.c.bf16 %v81_v49, %v80_v48  ;;  %v117_v53 = vpack.c.bf16 %v99_v51, %v98_v50  ;;  %v83_v55 = vld [vmem:[%s4813_s20 + $0x78] sm:$0xff]  ;;  %v64_v57 = vld [vmem:[%s4814_s26] sm:$0xff]  ;;  %v66_v58 = vld [vmem:[%s4814_s26 + $0x10] sm:$0xff]  ;;  %vm168_vm0 = vcmp.eq.s32.totalorder %v167_v16, 0  ;;  %s3641_s20 = smov 112   ;;  %s3642_s1 = smov 32  }
  0x1e   :  { %v109_v56 = vpack.c.bf16 %v83_v55, %v82_v54  ;;  %v100_v59 = vpack.c.bf16 %v66_v58, %v64_v57  ;;  %v192_v60 = vld [vmem:[%s4790_s5 + $0x28] sm:$0xff]  ;;  %v194_v61 = vld [vmem:[%s4790_s5 + $0x38] sm:$0xff]  ;;  %v191_v63 = vld [vmem:[%s4790_s5 + $0x20] sm:$0xff]  ;;  %s3643_s22 = smov 96   ;;  %s3644_s2 = smov 16   ;;  %vm1174_vm7 = vcmask 261120  }
  0x1f   :  { %3048 = vmatpush3.bf16.msra.mxu0 %v106_v40  ;;  %v207_v62 = vpack.c.bf16 %v194_v61, %v192_v60  ;;  %v193_v0 = vld [vmem:[%s4790_s5 + $0x30] sm:$0xff]  ;;  %v196_v2 = vld [vmem:[%s4790_s5 + $0x48] sm:$0xff]  ;;  %v198_v3 = vld [vmem:[%s4790_s5 + $0x58] sm:$0xff]  ;;  %s4807_s23 = smov 80   ;;  %vm1177_vm8 = vcmask 392192   ;;  %vm2796_vm9 = vcmask 1041409  }
  0x20   :  { %3049 = vmatprep.subr.bf16.mxu0 %v115_v41  ;;  %v206_v1 = vpack.c.bf16 %v193_v0, %v191_v63  ;;  %v209_v4 = vpack.c.bf16 %v198_v3, %v196_v2  ;;  %v195_v5 = vld [vmem:[%s4790_s5 + $0x40] sm:$0xff]  ;;  %v197_v6 = vld [vmem:[%s4790_s5 + $0x50] sm:$0xff]  ;;  %v200_v8 = vld [vmem:[%s4790_s5 + $0x68] sm:$0xff] }
  0x21   :  { %218 = vmatprep.subr.bf16.mxu1 %v207_v62  ;;  %v208_v7 = vpack.c.bf16 %v197_v6, %v195_v5  ;;  %v202_v9 = vld [vmem:[%s4790_s5 + $0x78] sm:$0xff]  ;;  %v199_v11 = vld [vmem:[%s4790_s5 + $0x60] sm:$0xff]  ;;  %v201_v12 = vld [vmem:[%s4790_s5 + $0x70] sm:$0xff] }
  0x22   :  { %219 = vmatpush1.bf16.msra.mxu1 %v206_v1  ;;  %v211_v10 = vpack.c.bf16 %v202_v9, %v200_v8  ;;  %v210_v13 = vpack.c.bf16 %v201_v12, %v199_v11  ;;  %v2930_v18 = vld [vmem:[%s4815_s3] ss:$0 sm:$0xff] }
  0x23   :  { %3050 = vmatpush3.bf16.msra.mxu0 %v107_v46  ;;  %220 = vmatprep.subr.bf16.mxu1 %v209_v4  ;;  %v2931_v22 = vld [vmem:[%s4816_s29] ss:$0 sm:$0xff] }
  0x24   :  { %3051 = vmatprep.subr.bf16.mxu0 %v116_v47  ;;  %v180_v27 = vld [vmem:[%s4789_s4] sm:$0xff]  ;;  %s3638_s4 = smov 64  }
  0x26   :  { %221 = vmatpush1.bf16.msra.mxu1 %v208_v7 }
  0x27   :  { %3052 = vmatpush3.bf16.msra.mxu0 %v108_v52  ;;  %222 = vmatprep.subr.bf16.mxu1 %v211_v10  ;;  %v184_v52 = vand.u32 127, %v166_v15 }
  0x28   :  { %3053 = vmatprep.subr.bf16.mxu0 %v117_v53  ;;  %v3639_v53 = vmov -1e+30  }
  0x29   :  { %vm185_vm5 = vcmp.lt.s32.totalorder %v184_v52, 5 }
  0x2a   :  { %223 = vmatpush1.bf16.msra.mxu1 %v210_v13  ;;  %v3960_v54 = vsel %vm185_vm5, 0.0, %v3639_v53 }
  0x2b   :  { %3054 = vmatpush3.bf16.msra.mxu0 %v109_v56  ;;  %3183 = vmatprep.subr.bf16.mxu1 %v3636_v33 }
  0x2c   :  { %3177 = vmatprep.subr.bf16.mxu0 %v3636_v33 }
  0x2e   :  { %158 = vmatmul.mubr.bf16.vlgmr.msra.gmra.mrb[0].mxu0 %v100_v59 }
  0x2f   :  { %3179 = vmatprep.mubr.msk.bf16.mxu0 %vm3637_vm2, %v3636_v33 }
 0x101   :  { %v3055_v17 = vpop.f32.mrb[0].mxu0 }
 0x102   :  { %v3056_v19 = vpop.f32.mrb[1].mxu0 }
 0x103   :  { %v3057_v20 = vadd.f32 %v3056_v19, %v3055_v17  ;;  %v3058_v21 = vpop.f32.mrb[2].mxu0 }
 0x104   :  { %v3059_v23 = vpop.f32.mrb[3].mxu0 }
 0x105   :  { %v160_v24 = vadd.f32 %v3057_v20, %v2930_v18  ;;  %v3060_v25 = vadd.f32 %v3059_v23, %v3058_v21 }
 0x107   :  { %v178_v26 = vsel %vm168_vm0, %v2931_v22, %v160_v24  ;;  %v163_v28 = vadd.f32 %v3060_v25, %v2930_v18 }
 0x108   :  { %v3913_v30 = vadd.f32 %v180_v27, %v178_v26 }
 0x109   :  { %v179_v29 = vsel %vm168_vm0, %v2931_v22, %v163_v28 }
 0x10a   :  { %v3915_v31 = vadd.f32 %v180_v27, %v179_v29 }
 0x10c   :  { %v203_v32 = vpack.c.bf16 %v3915_v31, %v3913_v30 }
 0x10e   :  { %2932 = vmatmul.mubr.msk.bf16.vlgmr.msra.gmra.mrb[0].mxu1 %vm212_vm1, %v203_v32 }
 0x10f   :  { %3185 = vmatprep.mubr.msk.bf16.mxu1 %vm3637_vm2, %v3636_v33 }
 0x1e1   :  { %v250_v34 = vpop.f32.mrb[0].mxu1 }
 0x1e2   :  { %v3926_v35 = vpack.c.bf16 %v250_v34, %v250_v34  ;;  %v252_v36 = vpop.f32.mrb[1].mxu1  ;;  %v259_v42 = vmul.f32 0.25, %v250_v34 }
 0x1e3   :  { %v254_v37 = vpop.f32.mrb[2].mxu1  ;;  %v3936_v44 = vpack.c.bf16 %v252_v36, %v252_v36 }
 0x1e4   :  { %266 = vrot.lane.b32.xlu0 %v3926_v35, %s3638_s4  ;;  %v256_v38 = vpop.f32.mrb[3].mxu1  ;;  %v3930_v39 = vpack.c.bf16 %v254_v37, %v254_v37  ;;  %v3939_v46 = vpack.c.bf16 %v259_v42, %v259_v42  ;;  %v260_v47 = vmul.f32 0.25, %v254_v37 }
 0x1e5   :  { %v3942_v48 = vpack.c.bf16 %v256_v38, %v256_v38  ;;  %v396_v49 = vsel %vm394_vm4, %v3936_v44, 0 }
 0x1e6   :  { %v3950_v50 = vpack.c.bf16 %v260_v47, %v260_v47 }
 0x1e7   :  { %v442_v51 = vsel %vm394_vm4, %v3942_v48, 0 }
 0x1e8   :  { %316 = vrot.lane.b32.xlu0 %v3930_v39, %s3638_s4 }
 0x256   :  { %v267_v40 = vpop.permute.xlu0 %266 }
 0x257   :  { %v273_v41 = vsel %vm268_vm3, %v267_v40, 0 }
 0x258   :  { %3178 = vmatpush3.bf16.xpose.msra.mxu0 %v273_v41 }
 0x259   :  { %3189 = vmatprep.subr.bf16.mxu0 %v3636_v33 }
 0x25a   :  { %v317_v43 = vpop.permute.xlu0 %316 }
 0x25b   :  { %v322_v45 = vsel %vm268_vm3, %v317_v43, 0 }
 0x25c   :  { %3184 = vmatpush3.bf16.xpose.msra.mxu1 %v322_v45 }
 0x25d   :  { %3195 = vmatprep.subr.bf16.mxu1 %v3636_v33 }
 0x25f   :  { %3180 = vmatmul.mubr.msk.bf16.vlgmr.msra.gmra.mrb[4].mxu0 %vm268_vm3, %v3939_v46 }
 0x260   :  { %3190 = vmatpush3.bf16.msra.mxu0 %v396_v49  ;;  %3191 = vmatprep.mubr.msk.bf16.mxu0 %vm3637_vm2, %v3636_v33 }
 0x261   :  { %3201 = vmatprep.subr.bf16.mxu0 %v3636_v33 }
 0x263   :  { %3186 = vmatmul.mubr.msk.bf16.vlgmr.msra.gmra.mrb[4].mxu1 %vm268_vm3, %v3950_v50 }
 0x264   :  { %3196 = vmatpush3.bf16.msra.mxu1 %v442_v51  ;;  %3197 = vmatprep.mubr.msk.bf16.mxu1 %vm3637_vm2, %v3636_v33 }
 0x265   :  { %3207 = vmatprep.subr.bf16.mxu1 %v3636_v33 }
 0x332   :  { %v309_v55 = vpop.f32.mrb[4].mxu0 }
 0x333   :  { %v310_v56 = vadd.f32 %v309_v55, %v3960_v54  ;;  %v3181_v57 = vpop.f32.mrb[5].mxu0 }
 0x334   :  { %v312_v58 = vpop.f32.mrb[6].mxu0 }
 0x335   :  { %v3182_v59 = vpop.f32.mrb[7].mxu0  ;;  %v365_v60 = vsel %vm364_vm6, %v310_v56, -inf }
 0x336   :  { %366 = vmax.xlane.f32.xlu1 %v365_v60  ;;  %v358_v61 = vpop.f32.mrb[4].mxu1 }
 0x337   :  { %v359_v62 = vadd.f32 %v358_v61, %v3960_v54  ;;  %v3187_v63 = vpop.f32.mrb[5].mxu1 }
 0x338   :  { %v361_v0 = vpop.f32.mrb[6].mxu1 }
 0x339   :  { %v3188_v1 = vpop.f32.mrb[7].mxu1  ;;  %v368_v2 = vsel %vm364_vm6, %v359_v62, -inf }
 0x33a   :  { %369 = vmax.xlane.f32.xlu1 %v368_v2 }
 0x34b   :  { %487 = vrot.lane.b32.xlu1 %v3926_v35, %s3640_s21 }
 0x34f   :  { %538 = vrot.lane.b32.xlu1 %v3930_v39, %s3640_s21 }
 0x3c3   :  { %v367_v3 = vpop.xlane.xlu1 %366 }
 0x3c4   :  { %v371_v4 = vsub.f32 %v310_v56, %v367_v3 }
 0x3c6   :  { %v373_v5 = vmul.f32 1.442695, %v371_v4 }
 0x3c7   :  { %v370_v6 = vpop.xlane.xlu1 %369 }
 0x3c8   :  { %3531 = vpow2.f32 %v373_v5  ;;  %v372_v7 = vsub.f32 %v359_v62, %v370_v6 }
 0x3ca   :  { %v375_v8 = vmul.f32 1.442695, %v372_v7 }
 0x3cb   :  { %v488_v13 = vpop.permute.xlu1 %487 }
 0x3cc   :  { %3533 = vpow2.f32 %v375_v8  ;;  %v493_v22 = vsel %vm268_vm3, %v488_v13, 0 }
 0x3cf   :  { %v539_v15 = vpop.permute.xlu1 %538 }
 0x3d0   :  { %v544_v25 = vsel %vm268_vm3, %v539_v15, 0 }
 0x3d2   :  { %v3532_v9 = vpop.eup %3531 }
 0x3d3   :  { %v377_v10 = vsel %vm364_vm6, %v3532_v9, 0.0 }
 0x3d4   :  { %378 = vadd.xlane.f32.xlu0 %v377_v10 }
 0x3d6   :  { %v3534_v11 = vpop.eup %3533 }
 0x3d7   :  { %v380_v12 = vsel %vm364_vm6, %v3534_v11, 0.0 }
 0x3d8   :  { %381 = vadd.xlane.f32.xlu1 %v380_v12 }
 0x3e9   :  { %485 = vrot.lane.b32.xlu1 %v3939_v46, %s3641_s20 }
 0x3ed   :  { %536 = vrot.lane.b32.xlu1 %v3950_v50, %s3641_s20 }
 0x461   :  { %v379_v16 = vpop.xlane.xlu0 %378 }
 0x462   :  { %3535 = vrcp.f32 %v379_v16 }
 0x465   :  { %v382_v17 = vpop.xlane.xlu1 %381 }
 0x466   :  { %3537 = vrcp.f32 %v382_v17 }
 0x469   :  { %v486_v26 = vpop.permute.xlu1 %485 }
 0x46c   :  { %v3536_v18 = vpop.eup %3535 }
 0x46d   :  { %v384_v19 = vmul.f32 %v3536_v18, %v3532_v9  ;;  %v537_v27 = vpop.permute.xlu1 %536 }
 0x46f   :  { %v387_v20 = vpack.c.bf16 %v384_v19, %v384_v19 }
 0x470   :  { %v3538_v21 = vpop.eup %3537 }
 0x471   :  { %v386_v23 = vmul.f32 %v3538_v21, %v3534_v11  ;;  %3192 = vmatmul.mubr.msk.bf16.vlgmr.msra.gmra.mrb[8].mxu0 %vm364_vm6, %v387_v20 }
 0x472   :  { %3202 = vmatpush3.bf16.xpose.msra.mxu0 %v493_v22  ;;  %3203 = vmatprep.mubr.msk.bf16.mxu0 %vm3637_vm2, %v3636_v33 }
 0x473   :  { %v388_v24 = vpack.c.bf16 %v386_v23, %v386_v23  ;;  %3213 = vmatprep.subr.bf16.mxu0 %v3636_v33 }
 0x475   :  { %3198 = vmatmul.mubr.msk.bf16.vlgmr.msra.gmra.mrb[8].mxu1 %vm364_vm6, %v388_v24 }
 0x476   :  { %3208 = vmatpush3.bf16.xpose.msra.mxu1 %v544_v25  ;;  %3209 = vmatprep.mubr.msk.bf16.mxu1 %vm3637_vm2, %v3636_v33 }
 0x477   :  { %3219 = vmatprep.subr.bf16.mxu1 %v3636_v33 }
 0x479   :  { %3204 = vmatmul.mubr.msk.bf16.vlgmr.msra.gmra.mrb[12].mxu0 %vm268_vm3, %v486_v26 }
 0x47a   :  { %3215 = vmatprep.mubr.msk.bf16.mxu0 %vm3637_vm2, %v3636_v33 }
 0x47d   :  { %3210 = vmatmul.mubr.msk.bf16.vlgmr.msra.gmra.mrb[12].mxu1 %vm268_vm3, %v537_v27 }
 0x47e   :  { %3221 = vmatprep.mubr.msk.bf16.mxu1 %vm3637_vm2, %v3636_v33 }
 0x544   :  { %v3992_v28 = vpop.f32.mrb[8].mxu0 }
 0x545   :  { %v3193_v29 = vpop.f32.mrb[9].mxu0 }
 0x546   :  { %v435_v32 = vpop.f32.mrb[10].mxu0 }
 0x547   :  { %v3194_v34 = vpop.f32.mrb[11].mxu0 }
 0x548   :  { %v3994_v36 = vpop.f32.mrb[8].mxu1 }
 0x549   :  { %v3199_v37 = vpop.f32.mrb[9].mxu1 }
 0x54a   :  { %v481_v38 = vpop.f32.mrb[10].mxu1 }
 0x54b   :  { %v3200_v40 = vpop.f32.mrb[11].mxu1 }
 0x54c   :  { %v529_v41 = vpop.f32.mrb[12].mxu0 }
 0x54d   :  { %v530_v42 = vadd.f32 %v529_v41, %v3960_v54  ;;  %v3205_v43 = vpop.f32.mrb[13].mxu0 }
 0x54e   :  { %v532_v45 = vpop.f32.mrb[14].mxu0 }
 0x54f   :  { %v3206_v47 = vpop.f32.mrb[15].mxu0  ;;  %v586_v49 = vsel %vm364_vm6, %v530_v42, -inf }
 0x550   :  { %587 = vmax.xlane.f32.xlu0 %v586_v49  ;;  %v580_v51 = vpop.f32.mrb[12].mxu1 }
 0x551   :  { %v581_v52 = vadd.f32 %v580_v51, %v3960_v54  ;;  %v3211_v53 = vpop.f32.mrb[13].mxu1 }
 0x552   :  { %v583_v55 = vpop.f32.mrb[14].mxu1 }
 0x553   :  { %v3212_v56 = vpop.f32.mrb[15].mxu1  ;;  %v589_v57 = vsel %vm364_vm6, %v581_v52, -inf }
 0x554   :  { %590 = vmax.xlane.f32.xlu1 %v589_v57 }
 0x565   :  { %760 = vrot.lane.b32.xlu1 %v3930_v39, %s3642_s1 }
 0x566   :  { %611 = vrot.lane.b32.xlu0 %v3936_v44, %s3641_s20 }
 0x56a   :  { %660 = vrot.lane.b32.xlu0 %v3942_v48, %s3641_s20 }
 0x5dd   :  { %v588_v58 = vpop.xlane.xlu0 %587 }
 0x5de   :  { %v592_v59 = vsub.f32 %v530_v42, %v588_v58 }
 0x5e0   :  { %v594_v60 = vmul.f32 1.442695, %v592_v59 }
 0x5e1   :  { %v612_v61 = vpop.permute.xlu0 %611  ;;  %v591_v62 = vpop.xlane.xlu1 %590 }
 0x5e2   :  { %3539 = vpow2.f32 %v594_v60  ;;  %v617_v63 = vsel %vm394_vm4, %v612_v61, 0  ;;  %v593_v0 = vsub.f32 %v581_v52, %v591_v62 }
 0x5e3   :  { %3214 = vmatpush3.bf16.msra.mxu0 %v617_v63 }
 0x5e4   :  { %v596_v1 = vmul.f32 1.442695, %v593_v0  ;;  %3225 = vmatprep.subr.bf16.mxu0 %v3636_v33 }
 0x5e5   :  { %v661_v2 = vpop.permute.xlu0 %660  ;;  %v761_v18 = vpop.permute.xlu1 %760 }
 0x5e6   :  { %3541 = vpow2.f32 %v596_v1  ;;  %v666_v3 = vsel %vm394_vm4, %v661_v2, 0  ;;  %v766_v20 = vsel %vm268_vm3, %v761_v18, 0 }
 0x5e7   :  { %3220 = vmatpush3.bf16.msra.mxu1 %v666_v3 }
 0x5e8   :  { %3231 = vmatprep.subr.bf16.mxu1 %v3636_v33 }
 0x5ec   :  { %v3540_v4 = vpop.eup %3539 }
 0x5ed   :  { %v598_v5 = vsel %vm364_vm6, %v3540_v4, 0.0 }
 0x5ee   :  { %599 = vadd.xlane.f32.xlu0 %v598_v5 }
 0x5f0   :  { %v3542_v6 = vpop.eup %3541 }
 0x5f1   :  { %v601_v7 = vsel %vm364_vm6, %v3542_v6, 0.0 }
 0x5f2   :  { %602 = vadd.xlane.f32.xlu0 %v601_v7 }
 0x608   :  { %710 = vrot.lane.b32.xlu0 %v3926_v35, %s3642_s1 }
 0x60c   :  { %708 = vrot.lane.b32.xlu0 %v3939_v46, %s3643_s22 }
 0x610   :  { %758 = vrot.lane.b32.xlu0 %v3950_v50, %s3643_s22 }
 0x67b   :  { %v600_v8 = vpop.xlane.xlu0 %599 }
 0x67c   :  { %3543 = vrcp.f32 %v600_v8 }
 0x67f   :  { %v603_v9 = vpop.xlane.xlu0 %602 }
 0x680   :  { %3545 = vrcp.f32 %v603_v9 }
 0x683   :  { %v711_v12 = vpop.permute.xlu0 %710 }
 0x684   :  { %v716_v17 = vsel %vm268_vm3, %v711_v12, 0 }
 0x686   :  { %v3544_v10 = vpop.eup %3543 }
 0x687   :  { %v605_v11 = vmul.f32 %v3544_v10, %v3540_v4  ;;  %v709_v21 = vpop.permute.xlu0 %708 }
 0x689   :  { %v608_v13 = vpack.c.bf16 %v605_v11, %v605_v11 }
 0x68a   :  { %v3546_v15 = vpop.eup %3545 }
 0x68b   :  { %v607_v16 = vmul.f32 %v3546_v15, %v3542_v6  ;;  %3216 = vmatmul.mubr.msk.bf16.vlgmr.msra.gmra.mrb[16].mxu0 %vm364_vm6, %v608_v13  ;;  %v759_v22 = vpop.permute.xlu0 %758 }
 0x68c   :  { %3226 = vmatpush3.bf16.xpose.msra.mxu0 %v716_v17  ;;  %3227 = vmatprep.mubr.msk.bf16.mxu0 %vm3637_vm2, %v3636_v33 }
 0x68d   :  { %v609_v19 = vpack.c.bf16 %v607_v16, %v607_v16  ;;  %3237 = vmatprep.subr.bf16.mxu0 %v3636_v33 }
 0x68f   :  { %3222 = vmatmul.mubr.msk.bf16.vlgmr.msra.gmra.mrb[16].mxu1 %vm364_vm6, %v609_v19 }
 0x690   :  { %3232 = vmatpush3.bf16.xpose.msra.mxu1 %v766_v20  ;;  %3233 = vmatprep.mubr.msk.bf16.mxu1 %vm3637_vm2, %v3636_v33 }
 0x691   :  { %3243 = vmatprep.subr.bf16.mxu1 %v3636_v33 }
 0x693   :  { %3228 = vmatmul.mubr.msk.bf16.vlgmr.msra.gmra.mrb[20].mxu0 %vm268_vm3, %v709_v21 }
 0x694   :  { %3239 = vmatprep.mubr.msk.bf16.mxu0 %vm3637_vm2, %v3636_v33 }
 0x697   :  { %3234 = vmatmul.mubr.msk.bf16.vlgmr.msra.gmra.mrb[20].mxu1 %vm268_vm3, %v759_v22 }
 0x698   :  { %3245 = vmatprep.mubr.msk.bf16.mxu1 %vm3637_vm2, %v3636_v33 }
 0x75e   :  { %v4034_v23 = vpop.f32.mrb[16].mxu0 }
 0x75f   :  { %v3217_v24 = vpop.f32.mrb[17].mxu0 }
 0x760   :  { %v656_v25 = vpop.f32.mrb[18].mxu0 }
 0x761   :  { %v3218_v26 = vpop.f32.mrb[19].mxu0 }
 0x762   :  { %v4036_v27 = vpop.f32.mrb[16].mxu1 }
 0x763   :  { %v3501_v29 = vpack.i.bf16 %v4036_v27, %v4034_v23  ;;  %v3223_v32 = vpop.f32.mrb[17].mxu1 }
 0x764   :  { %v705_v34 = vpop.f32.mrb[18].mxu1 }
 0x765   :  { %v3224_v37 = vpop.f32.mrb[19].mxu1 }
 0x766   :  { %v752_v38 = vpop.f32.mrb[20].mxu0 }
 0x767   :  { %v753_v40 = vadd.f32 %v752_v38, %v3960_v54  ;;  %v3229_v41 = vpop.f32.mrb[21].mxu0 }
 0x768   :  { %v755_v42 = vpop.f32.mrb[22].mxu0 }
 0x769   :  { %v3230_v43 = vpop.f32.mrb[23].mxu0  ;;  %v808_v45 = vsel %vm364_vm6, %v753_v40, -inf }
 0x76a   :  { %809 = vmax.xlane.f32.xlu0 %v808_v45  ;;  %v802_v47 = vpop.f32.mrb[20].mxu1 }
 0x76b   :  { %v803_v49 = vadd.f32 %v802_v47, %v3960_v54  ;;  %v3235_v51 = vpop.f32.mrb[21].mxu1 }
 0x76c   :  { %v805_v52 = vpop.f32.mrb[22].mxu1 }
 0x76d   :  { %v3236_v53 = vpop.f32.mrb[23].mxu1  ;;  %v811_v55 = vsel %vm364_vm6, %v803_v49, -inf }
 0x76e   :  { %812 = vmax.xlane.f32.xlu1 %v811_v55 }
 0x77f   :  { %880 = vrot.lane.b32.xlu1 %v3942_v48, %s3643_s22 }
 0x780   :  { %832 = vrot.lane.b32.xlu0 %v3936_v44, %s3643_s22 }
 0x783   :  { %930 = vrot.lane.b32.xlu1 %v3926_v35, %s3644_s2 }
 0x787   :  { %928 = vrot.lane.b32.xlu1 %v3939_v46, %s4807_s23 }
 0x7f7   :  { %v810_v56 = vpop.xlane.xlu0 %809 }
 0x7f8   :  { %v814_v57 = vsub.f32 %v753_v40, %v810_v56 }
 0x7fa   :  { %v816_v58 = vmul.f32 1.442695, %v814_v57 }
 0x7fb   :  { %v833_v59 = vpop.permute.xlu0 %832  ;;  %v813_v60 = vpop.xlane.xlu1 %812 }
 0x7fc   :  { %3547 = vpow2.f32 %v816_v58  ;;  %v838_v61 = vsel %vm394_vm4, %v833_v59, 0  ;;  %v815_v62 = vsub.f32 %v803_v49, %v813_v60 }
 0x7fd   :  { %3238 = vmatpush3.bf16.msra.mxu0 %v838_v61 }
 0x7fe   :  { %v818_v63 = vmul.f32 1.442695, %v815_v62  ;;  %3249 = vmatprep.subr.bf16.mxu0 %v3636_v33 }
 0x7ff   :  { %v881_v0 = vpop.permute.xlu1 %880 }
 0x800   :  { %3549 = vpow2.f32 %v818_v63  ;;  %v886_v35 = vsel %vm394_vm4, %v881_v0, 0 }
 0x801   :  { %3244 = vmatpush3.bf16.msra.mxu1 %v886_v35 }
 0x802   :  { %3255 = vmatprep.subr.bf16.mxu1 %v3636_v33 }
 0x803   :  { %v931_v8 = vpop.permute.xlu1 %930 }
 0x804   :  { %v936_v11 = vsel %vm268_vm3, %v931_v8, 0  ;;  %v1183_v8 = vld [vmem:[%s4791_s6 + $0x18] sm:$0xff] }
 0x806   :  { %v3548_v46 = vpop.eup %3547 }
 0x807   :  { %v820_v1 = vsel %vm364_vm6, %v3548_v46, 0.0  ;;  %v929_v15 = vpop.permute.xlu1 %928 }
 0x808   :  { %821 = vadd.xlane.f32.xlu0 %v820_v1 }
 0x80a   :  { %v3550_v2 = vpop.eup %3549 }
 0x80b   :  { %v823_v3 = vsel %vm364_vm6, %v3550_v2, 0.0 }
 0x80c   :  { %824 = vadd.xlane.f32.xlu0 %v823_v3 }
 0x822   :  { %980 = vrot.lane.b32.xlu0 %v3930_v39, %s3644_s2 }
 0x826   :  { %978 = vrot.lane.b32.xlu0 %v3950_v50, %s4807_s23 }
 0x895   :  { %v822_v4 = vpop.xlane.xlu0 %821 }
 0x896   :  { %3551 = vrcp.f32 %v822_v4  ;;  %v1180_v4 = vld [vmem:[%s4791_s6] sm:$0xff] }
 0x899   :  { %v825_v5 = vpop.xlane.xlu0 %824 }
 0x89a   :  { %3553 = vrcp.f32 %v825_v5  ;;  %v1181_v5 = vld [vmem:[%s4791_s6 + $0x8] sm:$0xff] }
 0x89d   :  { %v981_v13 = vpop.permute.xlu0 %980 }
 0x89e   :  { %v986_v50 = vsel %vm268_vm3, %v981_v13, 0  ;;  %v1186_v13 = vld [vmem:[%s4791_s6 + $0x30] sm:$0xff] }
 0x8a0   :  { %v3552_v6 = vpop.eup %3551 }
 0x8a1   :  { %v827_v7 = vmul.f32 %v3552_v6, %v3548_v46  ;;  %v979_v16 = vpop.permute.xlu0 %978  ;;  %v1182_v6 = vld [vmem:[%s4791_s6 + $0x10] sm:$0xff] }
 0x8a3   :  { %v830_v9 = vpack.c.bf16 %v827_v7, %v827_v7  ;;  %v1189_v7 = vpack.c.bf16 %v1181_v5, %v1180_v4  ;;  %v1354_v4 = vld [vmem:[%s4796_s11] sm:$0xff]  ;;  %v1355_v5 = vld [vmem:[%s4796_s11 + $0x8] sm:$0xff] }
 0x8a4   :  { %v3554_v10 = vpop.eup %3553 }
 0x8a5   :  { %v829_v12 = vmul.f32 %v3554_v10, %v3550_v2  ;;  %3240 = vmatmul.mubr.msk.bf16.vlgmr.msra.gmra.mrb[24].mxu0 %vm364_vm6, %v830_v9  ;;  %v1190_v9 = vpack.c.bf16 %v1183_v8, %v1182_v6  ;;  %v1184_v10 = vld [vmem:[%s4791_s6 + $0x20] sm:$0xff]  ;;  %v1356_v6 = vld [vmem:[%s4796_s11 + $0x10] sm:$0xff]  ;;  %v1357_v8 = vld [vmem:[%s4796_s11 + $0x18] sm:$0xff] }
 0x8a6   :  { %3250 = vmatpush3.bf16.xpose.msra.mxu0 %v936_v11  ;;  %3251 = vmatprep.mubr.msk.bf16.mxu0 %vm3637_vm2, %v3636_v33  ;;  %v1185_v11 = vld [vmem:[%s4791_s6 + $0x28] sm:$0xff] }
 0x8a7   :  { %v831_v39 = vpack.c.bf16 %v829_v12, %v829_v12  ;;  %3261 = vmatprep.subr.bf16.mxu0 %v3636_v33  ;;  %v1191_v12 = vpack.c.bf16 %v1185_v11, %v1184_v10  ;;  %v1358_v10 = vld [vmem:[%s4796_s11 + $0x20] sm:$0xff]  ;;  %v1359_v11 = vld [vmem:[%s4796_s11 + $0x28] sm:$0xff] }
 0x8a9   :  { %3246 = vmatmul.mubr.msk.bf16.vlgmr.msra.gmra.mrb[24].mxu1 %vm364_vm6, %v831_v39  ;;  %v1187_v39 = vld [vmem:[%s4791_s6 + $0x38] sm:$0xff] }
 0x8aa   :  { %3256 = vmatpush3.bf16.xpose.msra.mxu1 %v986_v50  ;;  %3257 = vmatprep.mubr.msk.bf16.mxu1 %vm3637_vm2, %v3636_v33  ;;  %v1192_v50 = vpack.c.bf16 %v1187_v39, %v1186_v13  ;;  %v1360_v13 = vld [vmem:[%s4796_s11 + $0x30] sm:$0xff]  ;;  %v1361_v39 = vld [vmem:[%s4796_s11 + $0x38] sm:$0xff] }
 0x8ab   :  { %3267 = vmatprep.subr.bf16.mxu1 %v3636_v33 }
 0x8ad   :  { %3252 = vmatmul.mubr.msk.bf16.vlgmr.msra.gmra.mrb[28].mxu0 %vm268_vm3, %v929_v15 }
 0x8ae   :  { %3263 = vmatprep.mubr.msk.bf16.mxu0 %vm3637_vm2, %v3636_v33 }
 0x8b1   :  { %3258 = vmatmul.mubr.msk.bf16.vlgmr.msra.gmra.mrb[28].mxu1 %vm268_vm3, %v979_v16 }
 0x8b2   :  { %3269 = vmatprep.mubr.msk.bf16.mxu1 %vm3637_vm2, %v3636_v33 }
 0x978   :  { %v874_v17 = vpop.f32.mrb[24].mxu0 }
 0x979   :  { %v3241_v18 = vpop.f32.mrb[25].mxu0 }
 0x97a   :  { %v877_v19 = vpop.f32.mrb[26].mxu0 }
 0x97b   :  { %v3242_v20 = vpop.f32.mrb[27].mxu0 }
 0x97c   :  { %v922_v21 = vpop.f32.mrb[24].mxu1 }
 0x97d   :  { %v3506_v22 = vpack.i.bf16 %v922_v21, %v874_v17  ;;  %v3247_v24 = vpop.f32.mrb[25].mxu1 }
 0x97e   :  { %v925_v25 = vpop.f32.mrb[26].mxu1 }
 0x97f   :  { %v3248_v26 = vpop.f32.mrb[27].mxu1 }
 0x980   :  { %v972_v32 = vpop.f32.mrb[28].mxu0 }
 0x981   :  { %v973_v34 = vadd.f32 %v972_v32, %v3960_v54  ;;  %v3253_v37 = vpop.f32.mrb[29].mxu0 }
 0x982   :  { %v975_v38 = vpop.f32.mrb[30].mxu0 }
 0x983   :  { %v3254_v40 = vpop.f32.mrb[31].mxu0  ;;  %v1028_v41 = vsel %vm364_vm6, %v973_v34, -inf }
 0x984   :  { %1029 = vmax.xlane.f32.xlu1 %v1028_v41  ;;  %v1022_v42 = vpop.f32.mrb[28].mxu1 }
 0x985   :  { %v1023_v43 = vadd.f32 %v1022_v42, %v3960_v54  ;;  %v3259_v45 = vpop.f32.mrb[29].mxu1 }
 0x986   :  { %v1025_v47 = vpop.f32.mrb[30].mxu1 }
 0x987   :  { %v3260_v49 = vpop.f32.mrb[31].mxu1  ;;  %v1031_v51 = vsel %vm364_vm6, %v1023_v43, -inf }
 0x988   :  { %1032 = vmax.xlane.f32.xlu0 %v1031_v51 }
 0xa11   :  { %v1030_v52 = vpop.xlane.xlu1 %1029 }
 0xa12   :  { %v1034_v53 = vsub.f32 %v973_v34, %v1030_v52 }
 0xa14   :  { %v1036_v55 = vmul.f32 1.442695, %v1034_v53 }
 0xa15   :  { %v1033_v56 = vpop.xlane.xlu0 %1032 }
 0xa16   :  { %3555 = vpow2.f32 %v1036_v55  ;;  %v1035_v57 = vsub.f32 %v1023_v43, %v1033_v56 }
 0xa18   :  { %v1038_v58 = vmul.f32 1.442695, %v1035_v57 }
 0xa1a   :  { %3557 = vpow2.f32 %v1038_v58 }
 0xa20   :  { %v3556_v59 = vpop.eup %3555 }
 0xa21   :  { %v1040_v60 = vsel %vm364_vm6, %v3556_v59, 0.0 }
 0xa22   :  { %1041 = vadd.xlane.f32.xlu0 %v1040_v60 }
 0xa24   :  { %v3558_v61 = vpop.eup %3557 }
 0xa25   :  { %v1043_v62 = vsel %vm364_vm6, %v3558_v61, 0.0 }
 0xa26   :  { %1044 = vadd.xlane.f32.xlu1 %v1043_v62 }
 0xa37   :  { %1100 = vrot.lane.b32.xlu1 %v3942_v48, %s4807_s23 }
 0xa38   :  { %1052 = vrot.lane.b32.xlu0 %v3936_v44, %s4807_s23 }
 0xa3b   :  { %3502 = vrot.lane.b32.xlu1 %v3501_v29, %s3644_s2 }
 0xa3c   :  { %3507 = vrot.lane.b32.xlu0 %v3506_v22, %s3642_s1 }
 0xaaf   :  { %v1042_v63 = vpop.xlane.xlu0 %1041 }
 0xab0   :  { %3559 = vrcp.f32 %v1042_v63  ;;  %v1288_v63 = vld [vmem:[%s4794_s9] sm:$0xff] }
 0xab3   :  { %v1045_v0 = vpop.xlane.xlu1 %1044  ;;  %v1053_v35 = vpop.permute.xlu0 %1052 }
 0xab4   :  { %3561 = vrcp.f32 %v1045_v0  ;;  %v1058_v46 = vsel %vm394_vm4, %v1053_v35, 0  ;;  %v1289_v0 = vld [vmem:[%s4794_s9 + $0x8] sm:$0xff] }
 0xab5   :  { %3262 = vmatpush3.bf16.msra.mxu0 %v1058_v46  ;;  %v1297_v35 = vpack.c.bf16 %v1289_v0, %v1288_v63  ;;  %v1290_v46 = vld [vmem:[%s4794_s9 + $0x10] sm:$0xff]  ;;  %v2952_v0 = vld [vmem:[%s4795_s10] ss:$0 sm:$0xff] }
 0xab6   :  { %3273 = vmatprep.subr.bf16.mxu0 %v3636_v33 }
 0xab7   :  { %v1101_v48 = vpop.permute.xlu1 %1100  ;;  %v3508_v34 = vpop.permute.xlu0 %3507 }
 0xab8   :  { %v1106_v44 = vsel %vm394_vm4, %v1101_v48, 0  ;;  %v3510_v40 = vunpack.i.h.bf16 %v3508_v34  ;;  %v3509_v41 = vunpack.i.l.bf16 %v3508_v34  ;;  %v1291_v48 = vld [vmem:[%s4794_s9 + $0x18] sm:$0xff] }
 0xab9   :  { %3268 = vmatpush3.bf16.msra.mxu1 %v1106_v44  ;;  %v1298_v44 = vpack.c.bf16 %v1291_v48, %v1290_v46 }
 0xaba   :  { %v3560_v1 = vpop.eup %3559  ;;  %3285 = vmatprep.subr.bf16.mxu1 %v3636_v33 }
 0xabb   :  { %v1047_v23 = vmul.f32 %v3560_v1, %v3556_v59  ;;  %v3503_v25 = vpop.permute.xlu1 %3502  ;;  %v1292_v1 = vld [vmem:[%s4794_s9 + $0x20] sm:$0xff] }
 0xabc   :  { %v3505_v26 = vunpack.i.h.bf16 %v3503_v25  ;;  %v3504_v32 = vunpack.i.l.bf16 %v3503_v25 }
 0xabd   :  { %v1050_v27 = vpack.c.bf16 %v1047_v23, %v1047_v23  ;;  %v1293_v23 = vld [vmem:[%s4794_s9 + $0x28] sm:$0xff] }
 0xabe   :  { %v3562_v29 = vpop.eup %3561  ;;  %v1173_v37 = vsel %vm268_vm3, %v3994_v36, %v3505_v26  ;;  %v1172_v38 = vsel %vm268_vm3, %v3992_v28, %v3504_v32 }
 0xabf   :  { %v1049_v2 = vmul.f32 %v3562_v29, %v3558_v61  ;;  %3264 = vmatmul.mubr.msk.bf16.vlgmr.msra.gmra.mrb[32].mxu0 %vm364_vm6, %v1050_v27  ;;  %v1175_v47 = vsel %vm1174_vm7, %v1172_v38, %v3509_v41  ;;  %v1176_v49 = vsel %vm1174_vm7, %v1173_v37, %v3510_v40  ;;  %v1299_v27 = vpack.c.bf16 %v1293_v23, %v1292_v1  ;;  %v1294_v29 = vld [vmem:[%s4794_s9 + $0x30] sm:$0xff] }
 0xac0   :  { %3281 = vmatprep.mubr.msk.bf16.mxu0 %vm3637_vm2, %v3636_v33  ;;  %3274 = vmatpush3.bf16.msra.mxu0 %v1189_v7  ;;  %v1371_v7 = vpack.c.bf16 %v1355_v5, %v1354_v4 }
 0xac1   :  { %v1051_v3 = vpack.c.bf16 %v1049_v2, %v1049_v2  ;;  %3275 = vmatprep.subr.bf16.mxu0 %v3636_v33  ;;  %v1295_v2 = vld [vmem:[%s4794_s9 + $0x38] sm:$0xff] }
 0xac3   :  { %3270 = vmatmul.mubr.msk.bf16.vlgmr.msra.gmra.mrb[32].mxu1 %vm364_vm6, %v1051_v3  ;;  %v1300_v3 = vpack.c.bf16 %v1295_v2, %v1294_v29 }
 0xac4   :  { %3293 = vmatprep.mubr.msk.bf16.mxu1 %vm3637_vm2, %v3636_v33  ;;  %3276 = vmatpush3.bf16.msra.mxu0 %v1190_v9  ;;  %v1372_v9 = vpack.c.bf16 %v1357_v8, %v1356_v6 }
 0xac5   :  { %3277 = vmatprep.subr.bf16.mxu0 %v3636_v33  ;;  %3286 = vmatpush3.bf16.msra.mxu1 %v1297_v35 }
 0xac6   :  { %3287 = vmatprep.subr.bf16.mxu1 %v3636_v33 }
 0xac8   :  { %3278 = vmatpush3.bf16.msra.mxu0 %v1191_v12  ;;  %v1373_v12 = vpack.c.bf16 %v1359_v11, %v1358_v10 }
 0xac9   :  { %3279 = vmatprep.subr.bf16.mxu0 %v3636_v33  ;;  %3288 = vmatpush3.bf16.msra.mxu1 %v1298_v44 }
 0xaca   :  { %3289 = vmatprep.subr.bf16.mxu1 %v3636_v33 }
 0xacc   :  { %3280 = vmatpush3.bf16.msra.mxu0 %v1192_v50  ;;  %v1374_v50 = vpack.c.bf16 %v1361_v39, %v1360_v13 }
 0xacd   :  { %3297 = vmatprep.subr.bf16.mxu0 %v3636_v33  ;;  %3290 = vmatpush3.bf16.msra.mxu1 %v1299_v27 }
 0xace   :  { %3291 = vmatprep.subr.bf16.mxu1 %v3636_v33 }
 0xad1   :  { %3292 = vmatpush3.bf16.msra.mxu1 %v1300_v3  ;;  %v2954_v3 = vld [vmem:[%s4797_s12] ss:$0 sm:$0xff] }
 0xb92   :  { %v1094_v15 = vpop.f32.mrb[32].mxu0 }
 0xb93   :  { %v3265_v16 = vpop.f32.mrb[33].mxu0 }
 0xb94   :  { %v1097_v17 = vpop.f32.mrb[34].mxu0  ;;  %v1363_v16 = vld [vmem:[%s4796_s11 + $0x48] sm:$0xff] }
 0xb95   :  { %v3266_v18 = vpop.f32.mrb[35].mxu0 }
 0xb96   :  { %v1142_v19 = vpop.f32.mrb[32].mxu1  ;;  %v1364_v18 = vld [vmem:[%s4796_s11 + $0x50] sm:$0xff] }
 0xb97   :  { %v3511_v20 = vpack.i.bf16 %v1142_v19, %v1094_v15  ;;  %v3271_v21 = vpop.f32.mrb[33].mxu1  ;;  %v1362_v15 = vld [vmem:[%s4796_s11 + $0x40] sm:$0xff]  ;;  %v1365_v19 = vld [vmem:[%s4796_s11 + $0x58] sm:$0xff] }
 0xb98   :  { %v1145_v22 = vpop.f32.mrb[34].mxu1  ;;  %v1375_v17 = vpack.c.bf16 %v1363_v16, %v1362_v15 }
 0xb99   :  { %3512 = vrot.lane.b32.xlu1 %v3511_v20, %s3640_s21  ;;  %v3272_v24 = vpop.f32.mrb[35].mxu1  ;;  %v1376_v20 = vpack.c.bf16 %v1365_v19, %v1364_v18  ;;  %v2960_v18 = vld [vmem:[%s4790_s5 + $0x98] sm:$0xff] }
 0xc0b   :  { %v3513_v42 = vpop.permute.xlu1 %3512 }
 0xc0c   :  { %v3515_v43 = vunpack.i.h.bf16 %v3513_v42  ;;  %v3514_v45 = vunpack.i.l.bf16 %v3513_v42 }
 0xc0e   :  { %v1179_v51 = vsel %vm1177_vm8, %v1176_v49, %v3515_v43  ;;  %v1178_v52 = vsel %vm1177_vm8, %v1175_v47, %v3514_v45 }
 0xc0f   :  { %v1188_v53 = vpack.c.bf16 %v1179_v51, %v1178_v52  ;;  %v2950_v52 = vld [vmem:[%s4792_s7] ss:$0 sm:$0xff] }
 0xc11   :  { %3282 = vmatmul.mubr.msk.bf16.vlgmr.msra.gmra.mrb[36].mxu0 %vm212_vm1, %v1188_v53 }
 0xc12   :  { %3313 = vmatprep.mubr.msk.bf16.mxu0 %vm3637_vm2, %v3636_v33  ;;  %3298 = vmatpush3.bf16.msra.mxu0 %v1371_v7 }
 0xc13   :  { %3299 = vmatprep.subr.bf16.mxu0 %v3636_v33 }
 0xc16   :  { %3300 = vmatpush3.bf16.msra.mxu0 %v1372_v9 }
 0xc17   :  { %3301 = vmatprep.subr.bf16.mxu0 %v3636_v33 }
 0xc1a   :  { %3302 = vmatpush3.bf16.msra.mxu0 %v1373_v12 }
 0xc1b   :  { %3303 = vmatprep.subr.bf16.mxu0 %v3636_v33 }
 0xc1e   :  { %3304 = vmatpush3.bf16.msra.mxu0 %v1374_v50 }
 0xc1f   :  { %3305 = vmatprep.subr.bf16.mxu0 %v3636_v33 }
 0xc22   :  { %3306 = vmatpush3.bf16.msra.mxu0 %v1375_v17  ;;  %v2958_v17 = vld [vmem:[%s4790_s5 + $0x88] sm:$0xff] }
 0xc23   :  { %3307 = vmatprep.subr.bf16.mxu0 %v3636_v33  ;;  %v1496_v19 = vpack.c.bf16 %v2960_v18, %v2958_v17 }
 0xc25   :  { %1506 = vmatprep.subr.bf16.mxu1 %v1496_v19 }
 0xc26   :  { %3308 = vmatpush3.bf16.msra.mxu0 %v1376_v20  ;;  %v2957_v20 = vld [vmem:[%s4790_s5 + $0x80] sm:$0xff] }
 0xc27   :  { %3309 = vmatprep.subr.bf16.mxu0 %v3636_v33 }
 0xce4   :  { %v1230_v28 = vpop.f32.mrb[36].mxu0 }
 0xce5   :  { %v4144_v36 = vadd.f32 %v1230_v28, %v3913_v30  ;;  %v3283_v55 = vpop.f32.mrb[37].mxu0 }
 0xce6   :  { %v1233_v56 = vpop.f32.mrb[38].mxu0 }
 0xce7   :  { %v4147_v57 = vadd.f32 %v1233_v56, %v3915_v31  ;;  %v3284_v58 = vpop.f32.mrb[39].mxu0  ;;  %v1241_v59 = vsel %vm212_vm1, %v4144_v36, 0.0  ;;  %v1250_v60 = vmul.f32 %v4144_v36, %v4144_v36 }
 0xce8   :  { %1242 = vadd.xlane.f32.xlu0 %v1241_v59  ;;  %v2951_v58 = vld [vmem:[%s4793_s8] ss:$0 sm:$0xff] }
 0xce9   :  { %v1244_v61 = vsel %vm212_vm1, %v4147_v57, 0.0  ;;  %v1252_v30 = vsel %vm212_vm1, %v1250_v60, 0.0  ;;  %v1251_v62 = vmul.f32 %v4147_v57, %v4147_v57 }
 0xcea   :  { %1245 = vadd.xlane.f32.xlu1 %v1244_v61 }
 0xceb   :  { %v1255_v31 = vsel %vm212_vm1, %v1251_v62, 0.0 }
 0xcec   :  { %1253 = vadd.xlane.f32.xlu0 %v1252_v30 }
 0xcf0   :  { %1256 = vadd.xlane.f32.xlu0 %v1255_v31  ;;  %v1368_v31 = vld [vmem:[%s4796_s11 + $0x70] sm:$0xff] }
 0xd75   :  { %v1243_v21 = vpop.xlane.xlu0 %1242 }
 0xd76   :  { %v1248_v22 = vmul.f32 0.015625, %v1243_v21  ;;  %v2959_v21 = vld [vmem:[%s4790_s5 + $0x90] sm:$0xff] }
 0xd77   :  { %v1246_v24 = vpop.xlane.xlu1 %1245 }
 0xd78   :  { %v1260_v26 = vmul.f32 %v1248_v22, %v1248_v22  ;;  %v1249_v32 = vmul.f32 0.015625, %v1246_v24  ;;  %v1264_v47 = vsub.f32 %v4144_v36, %v1248_v22  ;;  %v1366_v36 = vld [vmem:[%s4796_s11 + $0x60] sm:$0xff]  ;;  %v1495_v22 = vpack.c.bf16 %v2959_v21, %v2957_v20  ;;  %v2962_v24 = vld [vmem:[%s4790_s5 + $0xa8] sm:$0xff] }
 0xd79   :  { %v1254_v25 = vpop.xlane.xlu0 %1253 }
 0xd7a   :  { %v1258_v34 = vmul.f32 0.015625, %v1254_v25  ;;  %v1261_v40 = vmul.f32 %v1249_v32, %v1249_v32  ;;  %v1265_v53 = vsub.f32 %v4147_v57, %v1249_v32  ;;  %v1367_v57 = vld [vmem:[%s4796_s11 + $0x68] sm:$0xff]  ;;  %v2964_v25 = vld [vmem:[%s4790_s5 + $0xb8] sm:$0xff]  ;;  %v2961_v32 = vld [vmem:[%s4790_s5 + $0xa0] sm:$0xff] }
 0xd7b   :  { %v1377_v62 = vpack.c.bf16 %v1367_v57, %v1366_v36 }
 0xd7c   :  { %v1262_v37 = vsub.f32 %v1258_v34, %v1260_v26  ;;  %v1498_v26 = vpack.c.bf16 %v2964_v25, %v2962_v24  ;;  %v2963_v34 = vld [vmem:[%s4790_s5 + $0xb0] sm:$0xff] }
 0xd7d   :  { %v1257_v38 = vpop.xlane.xlu0 %1256  ;;  %3310 = vmatpush3.bf16.msra.mxu0 %v1377_v62 }
 0xd7e   :  { %v1266_v41 = vadd.f32 1e-05, %v1262_v37  ;;  %v1259_v42 = vmul.f32 0.015625, %v1257_v38  ;;  %3311 = vmatprep.subr.bf16.mxu0 %v3636_v33  ;;  %v1497_v37 = vpack.c.bf16 %v2963_v34, %v2961_v32  ;;  %v2966_v38 = vld [vmem:[%s4790_s5 + $0xc8] sm:$0xff] }
 0xd80   :  { %3563 = vrsqrt.f32 %v1266_v41  ;;  %v1263_v43 = vsub.f32 %v1259_v42, %v1261_v40  ;;  %v2968_v40 = vld [vmem:[%s4790_s5 + $0xd8] sm:$0xff]  ;;  %v2965_v42 = vld [vmem:[%s4790_s5 + $0xc0] sm:$0xff] }
 0xd81   :  { %v1500_v41 = vpack.c.bf16 %v2968_v40, %v2966_v38 }
 0xd82   :  { %v1267_v45 = vadd.f32 1e-05, %v1263_v43  ;;  %v2967_v43 = vld [vmem:[%s4790_s5 + $0xd0] sm:$0xff] }
 0xd84   :  { %3565 = vrsqrt.f32 %v1267_v45  ;;  %v1499_v45 = vpack.c.bf16 %v2967_v43, %v2965_v42 }
 0xd8a   :  { %v3564_v49 = vpop.eup %3563 }
 0xd8b   :  { %v1270_v51 = vmul.f32 %v3564_v49, %v1264_v47  ;;  %v2970_v47 = vld [vmem:[%s4790_s5 + $0xe8] sm:$0xff]  ;;  %v2972_v49 = vld [vmem:[%s4790_s5 + $0xf8] sm:$0xff] }
 0xd8d   :  { %v1278_v56 = vmul.f32 %v2950_v52, %v1270_v51  ;;  %v2969_v51 = vld [vmem:[%s4790_s5 + $0xe0] sm:$0xff] }
 0xd8e   :  { %v3566_v28 = vpop.eup %3565 }
 0xd8f   :  { %v1271_v55 = vmul.f32 %v3566_v28, %v1265_v53  ;;  %v1286_v60 = vadd.f32 %v2951_v58, %v1278_v56  ;;  %v2971_v53 = vld [vmem:[%s4790_s5 + $0xf0] sm:$0xff] }
 0xd90   :  { %v1501_v28 = vpack.c.bf16 %v2971_v53, %v2969_v51 }
 0xd91   :  { %v1279_v59 = vmul.f32 %v2950_v52, %v1271_v55  ;;  %v1502_v52 = vpack.c.bf16 %v2972_v49, %v2970_v47 }
 0xd93   :  { %v1287_v61 = vadd.f32 %v2951_v58, %v1279_v59 }
 0xd95   :  { %v1296_v30 = vpack.c.bf16 %v1287_v61, %v1286_v60 }
 0xd97   :  { %3294 = vmatmul.mubr.msk.bf16.vlgmr.msra.gmra.mrb[36].mxu1 %vm212_vm1, %v1296_v30 }
 0xd98   :  { %1538 = vmatprep.mubr.bf16.mxu1 %v3635_v14  ;;  %v1369_v14 = vld [vmem:[%s4796_s11 + $0x78] sm:$0xff]  ;;  %1507 = vmatpush1.bf16.msra.mxu1 %v1495_v22 }
 0xd99   :  { %v1378_v63 = vpack.c.bf16 %v1369_v14, %v1368_v31  ;;  %1508 = vmatprep.subr.bf16.mxu1 %v1498_v26 }
 0xd9b   :  { %3312 = vmatpush3.bf16.msra.mxu0 %v1378_v63 }
 0xd9c   :  { %3329 = vmatprep.subr.bf16.mxu0 %v3636_v33  ;;  %1509 = vmatpush1.bf16.msra.mxu1 %v1497_v37 }
 0xd9d   :  { %1510 = vmatprep.subr.bf16.mxu1 %v1500_v41 }
 0xda0   :  { %1511 = vmatpush1.bf16.msra.mxu1 %v1499_v45 }
 0xda1   :  { %1512 = vmatprep.subr.bf16.mxu1 %v1502_v52 }
 0xda4   :  { %1513 = vmatpush1.bf16.msra.mxu1 %v1501_v28 }
 0xda5   :  { %3317 = vmatprep.subr.bf16.mxu1 %v3636_v33 }
 0xe6a   :  { %v1345_v35 = vpop.f32.mrb[36].mxu1 }
 0xe6b   :  { %v1346_v46 = vadd.f32 %v2952_v0, %v1345_v35  ;;  %v3295_v48 = vpop.f32.mrb[37].mxu1 }
 0xe6c   :  { %v1348_v44 = vpop.f32.mrb[38].mxu1  ;;  %v2955_v48 = vld [vmem:[%s4798_s13] ss:$0 sm:$0xff] }
 0xe6d   :  { %v1349_v1 = vadd.f32 %v2952_v0, %v1348_v44  ;;  %v3296_v23 = vpop.f32.mrb[39].mxu1  ;;  %v1352_v27 = vmax.f32 %v1346_v46, 0.0 }
 0xe6f   :  { %v1353_v29 = vmax.f32 %v1349_v1, 0.0 }
 0xe71   :  { %v1370_v2 = vpack.c.bf16 %v1353_v29, %v1352_v27 }
 0xe73   :  { %3314 = vmatmul.mubr.bf16.vlgmr.msra.gmra.mrb[40].mxu0 %v1370_v2  ;;  %v2956_v2 = vld [vmem:[%s4799_s14] ss:$0 sm:$0xff] }
 0xe74   :  { %3331 = vmatprep.mubr.msk.bf16.mxu0 %vm3637_vm2, %v3636_v33 }
 0xf46   :  { %v1420_v4 = vpop.f32.mrb[40].mxu0 }
 0xf47   :  { %v1421_v5 = vadd.f32 %v2954_v3, %v1420_v4  ;;  %v3315_v6 = vpop.f32.mrb[41].mxu0 }
 0xf48   :  { %v1423_v7 = vpop.f32.mrb[42].mxu0 }
 0xf49   :  { %v4260_v8 = vadd.f32 %v1421_v5, %v1286_v60  ;;  %v1424_v9 = vadd.f32 %v2954_v3, %v1423_v7  ;;  %v3316_v10 = vpop.f32.mrb[43].mxu0 }
 0xf4b   :  { %v4262_v11 = vadd.f32 %v1424_v9, %v1287_v61  ;;  %v1431_v12 = vsel %vm212_vm1, %v4260_v8, 0.0  ;;  %v1439_v13 = vmul.f32 %v4260_v8, %v4260_v8 }
 0xf4c   :  { %1432 = vadd.xlane.f32.xlu1 %v1431_v12 }
 0xf4d   :  { %v1434_v39 = vsel %vm212_vm1, %v4262_v11, 0.0  ;;  %v1440_v50 = vmul.f32 %v4262_v11, %v4262_v11  ;;  %v1441_v15 = vsel %vm212_vm1, %v1439_v13, 0.0 }
 0xf4e   :  { %1435 = vadd.xlane.f32.xlu0 %v1434_v39 }
 0xf4f   :  { %v1444_v16 = vsel %vm212_vm1, %v1440_v50, 0.0 }
 0xf50   :  { %1442 = vadd.xlane.f32.xlu1 %v1441_v15 }
 0xf52   :  { %1445 = vadd.xlane.f32.xlu0 %v1444_v16 }
 0xfd9   :  { %v1433_v55 = vpop.xlane.xlu1 %1432 }
 0xfda   :  { %v1437_v56 = vmul.f32 0.015625, %v1433_v55 }
 0xfdb   :  { %v1436_v58 = vpop.xlane.xlu0 %1435 }
 0xfdc   :  { %v1438_v59 = vmul.f32 0.015625, %v1436_v58  ;;  %v1449_v61 = vmul.f32 %v1437_v56, %v1437_v56  ;;  %v1453_v35 = vsub.f32 %v4260_v8, %v1437_v56 }
 0xfdd   :  { %v1443_v60 = vpop.xlane.xlu1 %1442 }
 0xfde   :  { %v1447_v30 = vmul.f32 0.015625, %v1443_v60  ;;  %v1450_v57 = vmul.f32 %v1438_v59, %v1438_v59  ;;  %v1454_v44 = vsub.f32 %v4262_v11, %v1438_v59 }
 0xfdf   :  { %v1446_v36 = vpop.xlane.xlu0 %1445 }
 0xfe0   :  { %v1451_v62 = vsub.f32 %v1447_v30, %v1449_v61  ;;  %v1448_v31 = vmul.f32 0.015625, %v1446_v36 }
 0xfe2   :  { %v1455_v14 = vadd.f32 1e-05, %v1451_v62  ;;  %v1452_v63 = vsub.f32 %v1448_v31, %v1450_v57 }
 0xfe4   :  { %3567 = vrsqrt.f32 %v1455_v14  ;;  %v1456_v0 = vadd.f32 1e-05, %v1452_v63 }
 0xfe6   :  { %3569 = vrsqrt.f32 %v1456_v0 }
 0xfee   :  { %v3568_v46 = vpop.eup %3567 }
 0xfef   :  { %v1459_v1 = vmul.f32 %v3568_v46, %v1453_v35 }
 0xff0   :  { %v3570_v23 = vpop.eup %3569 }
 0xff1   :  { %v1460_v27 = vmul.f32 %v3570_v23, %v1454_v44  ;;  %v1467_v29 = vmul.f32 %v2955_v48, %v1459_v1 }
 0xff3   :  { %v1468_v3 = vmul.f32 %v2955_v48, %v1460_v27  ;;  %v4331_v4 = vadd.f32 %v2956_v2, %v1467_v29 }
 0xff5   :  { %v4333_v5 = vadd.f32 %v2956_v2, %v1468_v3 }
 0xff7   :  { %v1494_v6 = vpack.c.bf16 %v4333_v5, %v4331_v4 }
 0xff9   :  { %2973 = vmatmul.mubr.msk.bf16.vlgmr.msra.gmra.mrb[40].mxu1 %vm212_vm1, %v1494_v6 }
 0xffa   :  { %3319 = vmatprep.mubr.msk.bf16.mxu1 %vm3637_vm2, %v3636_v33 }
0x10cc   :  { %v1540_v7 = vpop.f32.mrb[40].mxu1 }
0x10cd   :  { %v4340_v8 = vpack.c.bf16 %v1540_v7, %v1540_v7  ;;  %v1542_v9 = vpop.f32.mrb[41].mxu1  ;;  %v1549_v16 = vmul.f32 0.25, %v1540_v7 }
0x10ce   :  { %v4342_v10 = vpack.c.bf16 %v1542_v9, %v1542_v9  ;;  %v1544_v11 = vpop.f32.mrb[42].mxu1 }
0x10cf   :  { %v4344_v12 = vpack.c.bf16 %v1544_v11, %v1544_v11  ;;  %1556 = vrot.lane.b32.xlu1 %v4340_v8, %s3638_s4  ;;  %v1546_v13 = vpop.f32.mrb[43].mxu1  ;;  %v4355_v18 = vpack.c.bf16 %v1549_v16, %v1549_v16  ;;  %v1550_v20 = vmul.f32 0.25, %v1544_v11 }
0x10d0   :  { %v1683_v39 = vsel %vm394_vm4, %v4342_v10, 0  ;;  %v4363_v21 = vpack.c.bf16 %v1546_v13, %v1546_v13 }
0x10d1   :  { %3330 = vmatpush3.bf16.msra.mxu0 %v1683_v39  ;;  %1605 = vrot.lane.b32.xlu0 %v4344_v12, %s3638_s4  ;;  %v4365_v22 = vpack.c.bf16 %v1550_v20, %v1550_v20  ;;  %s4817_s4 = smov 80  }
0x10d2   :  { %3341 = vmatprep.subr.bf16.mxu0 %v3636_v33  ;;  %v1729_v24 = vsel %vm394_vm4, %v4363_v21, 0 }
0x1141   :  { %v1557_v50 = vpop.permute.xlu1 %1556 }
0x1142   :  { %v1562_v15 = vsel %vm268_vm3, %v1557_v50, 0 }
0x1143   :  { %3318 = vmatpush3.bf16.xpose.msra.mxu1 %v1562_v15  ;;  %v1606_v17 = vpop.permute.xlu0 %1605 }
0x1144   :  { %3323 = vmatprep.subr.bf16.mxu1 %v3636_v33  ;;  %v1611_v19 = vsel %vm268_vm3, %v1606_v17, 0 }
0x114a   :  { %3320 = vmatmul.mubr.msk.bf16.vlgmr.msra.gmra.mrb[44].mxu1 %vm268_vm3, %v4355_v18 }
0x114b   :  { %3324 = vmatpush3.bf16.xpose.msra.mxu1 %v1611_v19  ;;  %3325 = vmatprep.mubr.msk.bf16.mxu1 %vm3637_vm2, %v3636_v33 }
0x114c   :  { %3335 = vmatprep.subr.bf16.mxu1 %v3636_v33 }
0x1152   :  { %3326 = vmatmul.mubr.msk.bf16.vlgmr.msra.gmra.mrb[48].mxu1 %vm268_vm3, %v4365_v22 }
0x1153   :  { %3336 = vmatpush3.bf16.msra.mxu1 %v1729_v24  ;;  %3337 = vmatprep.mubr.msk.bf16.mxu1 %vm3637_vm2, %v3636_v33 }
0x1154   :  { %3347 = vmatprep.subr.bf16.mxu1 %v3636_v33 }
0x121d   :  { %v1598_v25 = vpop.f32.mrb[44].mxu1 }
0x121e   :  { %v1599_v26 = vadd.f32 %v1598_v25, %v3960_v54  ;;  %v3321_v32 = vpop.f32.mrb[45].mxu1 }
0x121f   :  { %v1601_v34 = vpop.f32.mrb[46].mxu1 }
0x1220   :  { %v3322_v37 = vpop.f32.mrb[47].mxu1  ;;  %v1653_v38 = vsel %vm364_vm6, %v1599_v26, -inf }
0x1221   :  { %1654 = vmax.xlane.f32.xlu1 %v1653_v38 }
0x1225   :  { %v1647_v40 = vpop.f32.mrb[48].mxu1 }
0x1226   :  { %v1648_v41 = vadd.f32 %v1647_v40, %v3960_v54  ;;  %v3327_v42 = vpop.f32.mrb[49].mxu1 }
0x1227   :  { %v1650_v43 = vpop.f32.mrb[50].mxu1 }
0x1228   :  { %v3328_v45 = vpop.f32.mrb[51].mxu1  ;;  %v1656_v47 = vsel %vm364_vm6, %v1648_v41, -inf }
0x1229   :  { %1657 = vmax.xlane.f32.xlu0 %v1656_v47 }
0x1232   :  { %1774 = vrot.lane.b32.xlu1 %v4340_v8, %s3640_s21 }
0x12ae   :  { %v1655_v49 = vpop.xlane.xlu1 %1654 }
0x12af   :  { %v1659_v51 = vsub.f32 %v1599_v26, %v1655_v49 }
0x12b1   :  { %v1661_v52 = vmul.f32 1.442695, %v1659_v51 }
0x12b2   :  { %v1775_v61 = vpop.permute.xlu1 %1774 }
0x12b3   :  { %3571 = vpow2.f32 %v1661_v52  ;;  %v1780_v14 = vsel %vm268_vm3, %v1775_v61, 0 }
0x12b6   :  { %v1658_v53 = vpop.xlane.xlu0 %1657 }
0x12b7   :  { %v1660_v28 = vsub.f32 %v1648_v41, %v1658_v53 }
0x12b9   :  { %v1663_v55 = vmul.f32 1.442695, %v1660_v28 }
0x12bb   :  { %3573 = vpow2.f32 %v1663_v55 }
0x12bd   :  { %v3572_v56 = vpop.eup %3571 }
0x12be   :  { %v1665_v58 = vsel %vm364_vm6, %v3572_v56, 0.0 }
0x12bf   :  { %1666 = vadd.xlane.f32.xlu1 %v1665_v58 }
0x12c5   :  { %v3574_v59 = vpop.eup %3573 }
0x12c6   :  { %v1668_v60 = vsel %vm364_vm6, %v3574_v59, 0.0 }
0x12c7   :  { %1669 = vadd.xlane.f32.xlu0 %v1668_v60 }
0x12d0   :  { %1772 = vrot.lane.b32.xlu1 %v4355_v18, %s3641_s20 }
0x12d4   :  { %1823 = vrot.lane.b32.xlu1 %v4365_v22, %s3641_s20 }
0x12dd   :  { %1825 = vrot.lane.b32.xlu0 %v4344_v12, %s3640_s21 }
0x134c   :  { %v1667_v30 = vpop.xlane.xlu1 %1666 }
0x134d   :  { %3575 = vrcp.f32 %v1667_v30 }
0x1350   :  { %v1773_v48 = vpop.permute.xlu1 %1772 }
0x1354   :  { %v1670_v36 = vpop.xlane.xlu0 %1669  ;;  %v1824_v1 = vpop.permute.xlu1 %1823 }
0x1355   :  { %3577 = vrcp.f32 %v1670_v36 }
0x1357   :  { %v3576_v57 = vpop.eup %3575 }
0x1358   :  { %v1672_v62 = vmul.f32 %v3576_v57, %v3572_v56  ;;  %v1826_v35 = vpop.permute.xlu0 %1825 }
0x1359   :  { %v1831_v44 = vsel %vm268_vm3, %v1826_v35, 0 }
0x135a   :  { %v1675_v31 = vpack.c.bf16 %v1672_v62, %v1672_v62 }
0x135c   :  { %3332 = vmatmul.mubr.msk.bf16.vlgmr.msra.gmra.mrb[44].mxu0 %vm364_vm6, %v1675_v31 }
0x135d   :  { %3342 = vmatpush3.bf16.xpose.msra.mxu0 %v1780_v14  ;;  %3343 = vmatprep.mubr.msk.bf16.mxu0 %vm3637_vm2, %v3636_v33 }
0x135e   :  { %3353 = vmatprep.subr.bf16.mxu0 %v3636_v33 }
0x135f   :  { %v3578_v63 = vpop.eup %3577 }
0x1360   :  { %v1674_v0 = vmul.f32 %v3578_v63, %v3574_v59 }
0x1362   :  { %v1676_v46 = vpack.c.bf16 %v1674_v0, %v1674_v0 }
0x1364   :  { %3338 = vmatmul.mubr.msk.bf16.vlgmr.msra.gmra.mrb[52].mxu1 %vm364_vm6, %v1676_v46  ;;  %3344 = vmatmul.mubr.msk.bf16.vlgmr.msra.gmra.mrb[48].mxu0 %vm268_vm3, %v1773_v48 }
0x1365   :  { %3348 = vmatpush3.bf16.xpose.msra.mxu1 %v1831_v44  ;;  %3349 = vmatprep.mubr.msk.bf16.mxu1 %vm3637_vm2, %v3636_v33 }
0x1366   :  { %3359 = vmatprep.subr.bf16.mxu1 %v3636_v33  ;;  %3355 = vmatprep.mubr.msk.bf16.mxu0 %vm3637_vm2, %v3636_v33 }
0x136c   :  { %3350 = vmatmul.mubr.msk.bf16.vlgmr.msra.gmra.mrb[56].mxu1 %vm268_vm3, %v1824_v1 }
0x136d   :  { %3361 = vmatprep.mubr.msk.bf16.mxu1 %vm3637_vm2, %v3636_v33 }
0x142f   :  { %v4404_v23 = vpop.f32.mrb[44].mxu0 }
0x1430   :  { %v3333_v27 = vpop.f32.mrb[45].mxu0 }
0x1431   :  { %v1722_v29 = vpop.f32.mrb[46].mxu0 }
0x1432   :  { %v3334_v2 = vpop.f32.mrb[47].mxu0 }
0x1437   :  { %v4406_v3 = vpop.f32.mrb[52].mxu1  ;;  %v1816_v6 = vpop.f32.mrb[48].mxu0 }
0x1438   :  { %v1817_v7 = vadd.f32 %v1816_v6, %v3960_v54  ;;  %v3339_v9 = vpop.f32.mrb[53].mxu1  ;;  %v3345_v11 = vpop.f32.mrb[49].mxu0 }
0x1439   :  { %v1768_v13 = vpop.f32.mrb[54].mxu1  ;;  %v1819_v39 = vpop.f32.mrb[50].mxu0 }
0x143a   :  { %v3340_v50 = vpop.f32.mrb[55].mxu1  ;;  %v3346_v15 = vpop.f32.mrb[51].mxu0  ;;  %v1873_v16 = vsel %vm364_vm6, %v1817_v7, -inf }
0x143b   :  { %1874 = vmax.xlane.f32.xlu0 %v1873_v16 }
0x143f   :  { %v1867_v17 = vpop.f32.mrb[56].mxu1 }
0x1440   :  { %v1868_v19 = vadd.f32 %v1867_v17, %v3960_v54  ;;  %v3351_v20 = vpop.f32.mrb[57].mxu1 }
0x1441   :  { %v1870_v24 = vpop.f32.mrb[58].mxu1 }
0x1442   :  { %v3352_v25 = vpop.f32.mrb[59].mxu1  ;;  %v1876_v26 = vsel %vm364_vm6, %v1868_v19, -inf }
0x1443   :  { %1877 = vmax.xlane.f32.xlu1 %v1876_v26 }
0x1454   :  { %1898 = vrot.lane.b32.xlu1 %v4342_v10, %s3641_s20 }
0x1458   :  { %1997 = vrot.lane.b32.xlu1 %v4340_v8, %s3642_s1 }
0x145c   :  { %2047 = vrot.lane.b32.xlu1 %v4344_v12, %s3642_s1 }
0x1460   :  { %2045 = vrot.lane.b32.xlu1 %v4365_v22, %s3643_s22 }
0x14c8   :  { %v1875_v32 = vpop.xlane.xlu0 %1874 }
0x14c9   :  { %v1879_v34 = vsub.f32 %v1817_v7, %v1875_v32 }
0x14cb   :  { %v1881_v37 = vmul.f32 1.442695, %v1879_v34 }
0x14cd   :  { %3579 = vpow2.f32 %v1881_v37 }
0x14d0   :  { %v1878_v38 = vpop.xlane.xlu1 %1877 }
0x14d1   :  { %v1880_v40 = vsub.f32 %v1868_v19, %v1878_v38 }
0x14d3   :  { %v1883_v41 = vmul.f32 1.442695, %v1880_v40 }
0x14d4   :  { %v1899_v42 = vpop.permute.xlu1 %1898 }
0x14d5   :  { %3581 = vpow2.f32 %v1883_v41  ;;  %v1904_v43 = vsel %vm394_vm4, %v1899_v42, 0 }
0x14d6   :  { %3354 = vmatpush3.bf16.msra.mxu0 %v1904_v43 }
0x14d7   :  { %v3580_v45 = vpop.eup %3579  ;;  %3365 = vmatprep.subr.bf16.mxu0 %v3636_v33 }
0x14d8   :  { %v1885_v47 = vsel %vm364_vm6, %v3580_v45, 0.0  ;;  %v1998_v58 = vpop.permute.xlu1 %1997 }
0x14d9   :  { %1886 = vadd.xlane.f32.xlu0 %v1885_v47  ;;  %v2003_v61 = vsel %vm268_vm3, %v1998_v58, 0 }
0x14dc   :  { %v2048_v57 = vpop.permute.xlu1 %2047 }
0x14dd   :  { %v2053_v14 = vsel %vm268_vm3, %v2048_v57, 0 }
0x14df   :  { %v3582_v49 = vpop.eup %3581 }
0x14e0   :  { %v1888_v51 = vsel %vm364_vm6, %v3582_v49, 0.0  ;;  %v2046_v63 = vpop.permute.xlu1 %2045 }
0x14e1   :  { %1889 = vadd.xlane.f32.xlu0 %v1888_v51 }
0x14f7   :  { %1947 = vrot.lane.b32.xlu0 %v4363_v21, %s3641_s20 }
0x14fb   :  { %1995 = vrot.lane.b32.xlu0 %v4355_v18, %s3643_s22 }
0x1566   :  { %v1887_v52 = vpop.xlane.xlu0 %1886 }
0x1567   :  { %3583 = vrcp.f32 %v1887_v52 }
0x156e   :  { %v1890_v53 = vpop.xlane.xlu0 %1889 }
0x156f   :  { %3585 = vrcp.f32 %v1890_v53 }
0x1571   :  { %v3584_v28 = vpop.eup %3583 }
0x1572   :  { %v1892_v55 = vmul.f32 %v3584_v28, %v3580_v45  ;;  %v1948_v56 = vpop.permute.xlu0 %1947 }
0x1573   :  { %v1953_v59 = vsel %vm394_vm4, %v1948_v56, 0 }
0x1574   :  { %3360 = vmatpush3.bf16.msra.mxu1 %v1953_v59  ;;  %v1895_v60 = vpack.c.bf16 %v1892_v55, %v1892_v55 }
0x1575   :  { %3371 = vmatprep.subr.bf16.mxu1 %v3636_v33 }
0x1576   :  { %3356 = vmatmul.mubr.msk.bf16.vlgmr.msra.gmra.mrb[52].mxu0 %vm364_vm6, %v1895_v60  ;;  %v1996_v31 = vpop.permute.xlu0 %1995 }
0x1577   :  { %3366 = vmatpush3.bf16.xpose.msra.mxu0 %v2003_v61  ;;  %3367 = vmatprep.mubr.msk.bf16.mxu0 %vm3637_vm2, %v3636_v33 }
0x1578   :  { %3377 = vmatprep.subr.bf16.mxu0 %v3636_v33 }
0x1579   :  { %v3586_v30 = vpop.eup %3585 }
0x157a   :  { %v1894_v36 = vmul.f32 %v3586_v30, %v3582_v49 }
0x157c   :  { %v1896_v62 = vpack.c.bf16 %v1894_v36, %v1894_v36 }
0x157e   :  { %3362 = vmatmul.mubr.msk.bf16.vlgmr.msra.gmra.mrb[60].mxu1 %vm364_vm6, %v1896_v62  ;;  %3368 = vmatmul.mubr.msk.bf16.vlgmr.msra.gmra.mrb[56].mxu0 %vm268_vm3, %v1996_v31 }
0x157f   :  { %3372 = vmatpush3.bf16.xpose.msra.mxu1 %v2053_v14  ;;  %3373 = vmatprep.mubr.msk.bf16.mxu1 %vm3637_vm2, %v3636_v33 }
0x1580   :  { %3383 = vmatprep.subr.bf16.mxu1 %v3636_v33  ;;  %3379 = vmatprep.mubr.msk.bf16.mxu0 %vm3637_vm2, %v3636_v33 }
0x1586   :  { %3374 = vmatmul.mubr.msk.bf16.vlgmr.msra.gmra.mrb[64].mxu1 %vm268_vm3, %v2046_v63 }
0x1587   :  { %3385 = vmatprep.mubr.msk.bf16.mxu1 %vm3637_vm2, %v3636_v33 }
0x1649   :  { %v4446_v0 = vpop.f32.mrb[52].mxu0 }
0x164a   :  { %v3357_v35 = vpop.f32.mrb[53].mxu0 }
0x164b   :  { %v1943_v46 = vpop.f32.mrb[54].mxu0 }
0x164c   :  { %v3358_v48 = vpop.f32.mrb[55].mxu0 }
0x1651   :  { %v4448_v44 = vpop.f32.mrb[60].mxu1  ;;  %v2039_v1 = vpop.f32.mrb[56].mxu0 }
0x1652   :  { %v3516_v27 = vpack.i.bf16 %v4448_v44, %v4446_v0  ;;  %v2040_v29 = vadd.f32 %v2039_v1, %v3960_v54  ;;  %v3363_v2 = vpop.f32.mrb[61].mxu1  ;;  %v3369_v6 = vpop.f32.mrb[57].mxu0 }
0x1653   :  { %v1992_v7 = vpop.f32.mrb[62].mxu1  ;;  %v2042_v9 = vpop.f32.mrb[58].mxu0 }
0x1654   :  { %v3364_v11 = vpop.f32.mrb[63].mxu1  ;;  %v3370_v13 = vpop.f32.mrb[59].mxu0  ;;  %v2095_v39 = vsel %vm364_vm6, %v2040_v29, -inf }
0x1655   :  { %2096 = vmax.xlane.f32.xlu0 %v2095_v39 }
0x1659   :  { %v2089_v50 = vpop.f32.mrb[64].mxu1 }
0x165a   :  { %v2090_v15 = vadd.f32 %v2089_v50, %v3960_v54  ;;  %v3375_v16 = vpop.f32.mrb[65].mxu1 }
0x165b   :  { %v2092_v17 = vpop.f32.mrb[66].mxu1 }
0x165c   :  { %v3376_v19 = vpop.f32.mrb[67].mxu1  ;;  %v2098_v20 = vsel %vm364_vm6, %v2090_v15, -inf }
0x165d   :  { %2099 = vmax.xlane.f32.xlu1 %v2098_v20 }
0x166e   :  { %2119 = vrot.lane.b32.xlu1 %v4342_v10, %s3643_s22 }
0x1672   :  { %2217 = vrot.lane.b32.xlu1 %v4340_v8, %s3644_s2 }
0x1676   :  { %2267 = vrot.lane.b32.xlu1 %v4344_v12, %s3644_s2 }
0x167a   :  { %2265 = vrot.lane.b32.xlu1 %v4365_v22, %s4817_s4 }
0x16e2   :  { %v2097_v24 = vpop.xlane.xlu0 %2096 }
0x16e3   :  { %v2101_v25 = vsub.f32 %v2040_v29, %v2097_v24 }
0x16e5   :  { %v2103_v26 = vmul.f32 1.442695, %v2101_v25 }
0x16e7   :  { %3587 = vpow2.f32 %v2103_v26 }
0x16ea   :  { %v2100_v32 = vpop.xlane.xlu1 %2099 }
0x16eb   :  { %v2102_v34 = vsub.f32 %v2090_v15, %v2100_v32 }
0x16ed   :  { %v2105_v37 = vmul.f32 1.442695, %v2102_v34 }
0x16ee   :  { %v2120_v38 = vpop.permute.xlu1 %2119 }
0x16ef   :  { %3589 = vpow2.f32 %v2105_v37  ;;  %v2125_v40 = vsel %vm394_vm4, %v2120_v38, 0 }
0x16f0   :  { %3378 = vmatpush3.bf16.msra.mxu0 %v2125_v40 }
0x16f1   :  { %v3588_v41 = vpop.eup %3587  ;;  %3389 = vmatprep.subr.bf16.mxu0 %v3636_v33 }
0x16f2   :  { %v2107_v8 = vsel %vm364_vm6, %v3588_v41, 0.0  ;;  %v2218_v51 = vpop.permute.xlu1 %2217 }
0x16f3   :  { %2108 = vadd.xlane.f32.xlu0 %v2107_v8  ;;  %v2223_v28 = vsel %vm268_vm3, %v2218_v51, 0 }
0x16f6   :  { %v2268_v56 = vpop.permute.xlu1 %2267 }
0x16f7   :  { %v2273_v60 = vsel %vm268_vm3, %v2268_v56, 0 }
0x16f9   :  { %v3590_v12 = vpop.eup %3589 }
0x16fa   :  { %v2110_v22 = vsel %vm364_vm6, %v3590_v12, 0.0  ;;  %v2266_v61 = vpop.permute.xlu1 %2265 }
0x16fb   :  { %2111 = vadd.xlane.f32.xlu0 %v2110_v22 }
0x1711   :  { %2167 = vrot.lane.b32.xlu0 %v4363_v21, %s3643_s22 }
0x1715   :  { %2215 = vrot.lane.b32.xlu0 %v4355_v18, %s4817_s4 }
0x1780   :  { %v2109_v42 = vpop.xlane.xlu0 %2108 }
0x1781   :  { %3591 = vrcp.f32 %v2109_v42  ;;  %v2990_v42 = vld [vmem:[%s4791_s6 + $0x40] sm:$0xff] }
0x1788   :  { %v2112_v43 = vpop.xlane.xlu0 %2111 }
0x1789   :  { %3593 = vrcp.f32 %v2112_v43  ;;  %v2991_v43 = vld [vmem:[%s4791_s6 + $0x48] sm:$0xff] }
0x178b   :  { %v3592_v45 = vpop.eup %3591 }
0x178c   :  { %v2114_v47 = vmul.f32 %v3592_v45, %v3588_v41  ;;  %v2168_v49 = vpop.permute.xlu0 %2167  ;;  %v2992_v45 = vld [vmem:[%s4791_s6 + $0x50] sm:$0xff] }
0x178d   :  { %v2173_v52 = vsel %vm394_vm4, %v2168_v49, 0  ;;  %v2993_v49 = vld [vmem:[%s4791_s6 + $0x58] sm:$0xff] }
0x178e   :  { %3384 = vmatpush3.bf16.msra.mxu1 %v2173_v52  ;;  %v2117_v53 = vpack.c.bf16 %v2114_v47, %v2114_v47  ;;  %v2475_v47 = vpack.c.bf16 %v2991_v43, %v2990_v42  ;;  %v2476_v51 = vpack.c.bf16 %v2993_v49, %v2992_v45  ;;  %v2994_v52 = vld [vmem:[%s4791_s6 + $0x60] sm:$0xff]  ;;  %v3016_v42 = vld [vmem:[%s4796_s11 + $0x90] sm:$0xff]  ;;  %v3017_v45 = vld [vmem:[%s4796_s11 + $0x98] sm:$0xff] }
0x178f   :  { %3395 = vmatprep.subr.bf16.mxu1 %v3636_v33  ;;  %v3018_v49 = vld [vmem:[%s4796_s11 + $0xa0] sm:$0xff] }
0x1790   :  { %3380 = vmatmul.mubr.msk.bf16.vlgmr.msra.gmra.mrb[60].mxu0 %vm364_vm6, %v2117_v53  ;;  %v2216_v59 = vpop.permute.xlu0 %2215  ;;  %v2995_v53 = vld [vmem:[%s4791_s6 + $0x68] sm:$0xff] }
0x1791   :  { %3390 = vmatpush3.bf16.xpose.msra.mxu0 %v2223_v28  ;;  %3391 = vmatprep.mubr.msk.bf16.mxu0 %vm3637_vm2, %v3636_v33  ;;  %v2477_v28 = vpack.c.bf16 %v2995_v53, %v2994_v52  ;;  %v3020_v53 = vld [vmem:[%s4796_s11 + $0xb0] sm:$0xff] }
0x1792   :  { %3401 = vmatprep.subr.bf16.mxu0 %v3636_v33 }
0x1793   :  { %v3594_v18 = vpop.eup %3593 }
0x1794   :  { %v2116_v55 = vmul.f32 %v3594_v18, %v3590_v12  ;;  %v2996_v18 = vld [vmem:[%s4791_s6 + $0x70] sm:$0xff] }
0x1796   :  { %v2118_v58 = vpack.c.bf16 %v2116_v55, %v2116_v55  ;;  %v2997_v55 = vld [vmem:[%s4791_s6 + $0x78] sm:$0xff] }
0x1797   :  { %v2478_v56 = vpack.c.bf16 %v2997_v55, %v2996_v18  ;;  %v3022_v55 = vld [vmem:[%s4796_s11 + $0xc0] sm:$0xff] }
0x1798   :  { %3386 = vmatmul.mubr.msk.bf16.vlgmr.msra.gmra.mrb[68].mxu1 %vm364_vm6, %v2118_v58  ;;  %3392 = vmatmul.mubr.msk.bf16.vlgmr.msra.gmra.mrb[64].mxu0 %vm268_vm3, %v2216_v59 }
0x1799   :  { %3396 = vmatpush3.bf16.xpose.msra.mxu1 %v2273_v60  ;;  %3397 = vmatprep.mubr.msk.bf16.mxu1 %vm3637_vm2, %v3636_v33 }
0x179a   :  { %3407 = vmatprep.subr.bf16.mxu1 %v3636_v33  ;;  %3403 = vmatprep.mubr.msk.bf16.mxu0 %vm3637_vm2, %v3636_v33 }
0x17a0   :  { %3398 = vmatmul.mubr.msk.bf16.vlgmr.msra.gmra.mrb[72].mxu1 %vm268_vm3, %v2266_v61 }
0x17a1   :  { %3409 = vmatprep.mubr.msk.bf16.mxu1 %vm3637_vm2, %v3636_v33 }
0x1863   :  { %v2161_v30 = vpop.f32.mrb[60].mxu0 }
0x1864   :  { %v3381_v36 = vpop.f32.mrb[61].mxu0 }
0x1865   :  { %v2164_v57 = vpop.f32.mrb[62].mxu0 }
0x1866   :  { %v3382_v62 = vpop.f32.mrb[63].mxu0 }
0x186b   :  { %v2209_v31 = vpop.f32.mrb[68].mxu1  ;;  %v2259_v14 = vpop.f32.mrb[64].mxu0 }
0x186c   :  { %v3521_v63 = vpack.i.bf16 %v2209_v31, %v2161_v30  ;;  %v2260_v35 = vadd.f32 %v2259_v14, %v3960_v54  ;;  %v3387_v46 = vpop.f32.mrb[69].mxu1  ;;  %v3393_v48 = vpop.f32.mrb[65].mxu0 }
0x186d   :  { %v2212_v1 = vpop.f32.mrb[70].mxu1  ;;  %v2262_v29 = vpop.f32.mrb[66].mxu0 }
0x186e   :  { %v3388_v2 = vpop.f32.mrb[71].mxu1  ;;  %v3394_v6 = vpop.f32.mrb[67].mxu0  ;;  %v2315_v7 = vsel %vm364_vm6, %v2260_v35, -inf }
0x186f   :  { %2316 = vmax.xlane.f32.xlu0 %v2315_v7 }
0x1873   :  { %v2309_v9 = vpop.f32.mrb[72].mxu1 }
0x1874   :  { %v2310_v11 = vadd.f32 %v2309_v9, %v3960_v54  ;;  %v3399_v13 = vpop.f32.mrb[73].mxu1 }
0x1875   :  { %v2312_v39 = vpop.f32.mrb[74].mxu1 }
0x1876   :  { %v3400_v50 = vpop.f32.mrb[75].mxu1  ;;  %v2318_v15 = vsel %vm364_vm6, %v2310_v11, -inf }
0x1877   :  { %2319 = vmax.xlane.f32.xlu1 %v2318_v15 }
0x1888   :  { %2339 = vrot.lane.b32.xlu1 %v4342_v10, %s4817_s4 }
0x188c   :  { %3517 = vrot.lane.b32.xlu1 %v3516_v27, %s3644_s2 }
0x1890   :  { %3522 = vrot.lane.b32.xlu1 %v3521_v63, %s3642_s1 }
0x18fc   :  { %v2317_v16 = vpop.xlane.xlu0 %2316 }
0x18fd   :  { %v2321_v17 = vsub.f32 %v2260_v35, %v2317_v16 }
0x18ff   :  { %v2323_v19 = vmul.f32 1.442695, %v2321_v17 }
0x1901   :  { %3595 = vpow2.f32 %v2323_v19 }
0x1904   :  { %v2320_v54 = vpop.xlane.xlu1 %2319 }
0x1905   :  { %v2322_v20 = vsub.f32 %v2310_v11, %v2320_v54 }
0x1907   :  { %v2325_v24 = vmul.f32 1.442695, %v2322_v20 }
0x1908   :  { %v2340_v25 = vpop.permute.xlu1 %2339 }
0x1909   :  { %3597 = vpow2.f32 %v2325_v24  ;;  %v2345_v26 = vsel %vm394_vm4, %v2340_v25, 0 }
0x190a   :  { %3402 = vmatpush3.bf16.msra.mxu0 %v2345_v26 }
0x190b   :  { %v3596_v10 = vpop.eup %3595  ;;  %3413 = vmatprep.subr.bf16.mxu0 %v3636_v33 }
0x190c   :  { %v2327_v0 = vsel %vm364_vm6, %v3596_v10, 0.0  ;;  %v3518_v14 = vpop.permute.xlu1 %3517 }
0x190d   :  { %2328 = vadd.xlane.f32.xlu0 %v2327_v0  ;;  %v3520_v35 = vunpack.i.h.bf16 %v3518_v14  ;;  %v3519_v46 = vunpack.i.l.bf16 %v3518_v14  ;;  %v3004_v0 = vld [vmem:[%s4794_s9 + $0x48] sm:$0xff] }
0x190f   :  { %v2460_v2 = vsel %vm268_vm3, %v4406_v3, %v3520_v35  ;;  %v2459_v6 = vsel %vm268_vm3, %v4404_v23, %v3519_v46 }
0x1910   :  { %v3523_v63 = vpop.permute.xlu1 %3522 }
0x1911   :  { %v3525_v48 = vunpack.i.h.bf16 %v3523_v63  ;;  %v3524_v1 = vunpack.i.l.bf16 %v3523_v63 }
0x1913   :  { %v3598_v44 = vpop.eup %3597  ;;  %v2461_v11 = vsel %vm1174_vm7, %v2459_v6, %v3524_v1  ;;  %v2462_v13 = vsel %vm1174_vm7, %v2460_v2, %v3525_v48 }
0x1914   :  { %v2330_v27 = vsel %vm364_vm6, %v3598_v44, 0.0 }
0x1915   :  { %2331 = vadd.xlane.f32.xlu0 %v2330_v27  ;;  %v3005_v27 = vld [vmem:[%s4794_s9 + $0x50] sm:$0xff] }
0x192b   :  { %2387 = vrot.lane.b32.xlu0 %v4363_v21, %s4817_s4 }
0x199a   :  { %v2329_v32 = vpop.xlane.xlu0 %2328 }
0x199b   :  { %3599 = vrcp.f32 %v2329_v32  ;;  %v3006_v32 = vld [vmem:[%s4794_s9 + $0x58] sm:$0xff] }
0x19a2   :  { %v2332_v34 = vpop.xlane.xlu0 %2331 }
0x19a3   :  { %3601 = vrcp.f32 %v2332_v34  ;;  %v2586_v34 = vpack.c.bf16 %v3006_v32, %v3005_v27 }
0x19a5   :  { %v3600_v37 = vpop.eup %3599 }
0x19a6   :  { %v2334_v38 = vmul.f32 %v3600_v37, %v3596_v10  ;;  %v2388_v40 = vpop.permute.xlu0 %2387  ;;  %v3003_v10 = vld [vmem:[%s4794_s9 + $0x40] sm:$0xff] }
0x19a7   :  { %v2393_v41 = vsel %vm394_vm4, %v2388_v40, 0  ;;  %v3007_v37 = vld [vmem:[%s4794_s9 + $0x60] sm:$0xff] }
0x19a8   :  { %3408 = vmatpush3.bf16.msra.mxu1 %v2393_v41  ;;  %v2337_v8 = vpack.c.bf16 %v2334_v38, %v2334_v38  ;;  %v3008_v38 = vld [vmem:[%s4794_s9 + $0x68] sm:$0xff]  ;;  %v3009_v41 = vld [vmem:[%s4794_s9 + $0x70] sm:$0xff] }
0x19a9   :  { %3425 = vmatprep.subr.bf16.mxu1 %v3636_v33  ;;  %v2587_v40 = vpack.c.bf16 %v3008_v38, %v3007_v37 }
0x19aa   :  { %3404 = vmatmul.mubr.msk.bf16.vlgmr.msra.gmra.mrb[68].mxu0 %vm364_vm6, %v2337_v8  ;;  %v3010_v8 = vld [vmem:[%s4794_s9 + $0x78] sm:$0xff] }
0x19ab   :  { %3421 = vmatprep.mubr.msk.bf16.mxu0 %vm3637_vm2, %v3636_v33  ;;  %3414 = vmatpush3.bf16.msra.mxu0 %v2475_v47  ;;  %v2662_v47 = vpack.c.bf16 %v3017_v45, %v3016_v42 }
0x19ac   :  { %3415 = vmatprep.subr.bf16.mxu0 %v3636_v33 }
0x19ad   :  { %v3602_v12 = vpop.eup %3601 }
0x19ae   :  { %v2336_v21 = vmul.f32 %v3602_v12, %v3598_v44  ;;  %v2585_v44 = vpack.c.bf16 %v3004_v0, %v3003_v10  ;;  %v2588_v12 = vpack.c.bf16 %v3010_v8, %v3009_v41  ;;  %v3012_v10 = vld [vmem:[%s4795_s10 + $0x1] ss:$0 sm:$0xff] }
0x19af   :  { %3416 = vmatpush3.bf16.msra.mxu0 %v2476_v51  ;;  %v3019_v51 = vld [vmem:[%s4796_s11 + $0xa8] sm:$0xff]  ;;  %v3031_v8 = vld [vmem:[%s4797_s12 + $0x1] ss:$0 sm:$0xff]  ;;  %s3646_s12 = smov [#allocation2]  }
0x19b0   :  { %v2338_v22 = vpack.c.bf16 %v2336_v21, %v2336_v21  ;;  %3417 = vmatprep.subr.bf16.mxu0 %v3636_v33  ;;  %v3014_v21 = vld [vmem:[%s4796_s11 + $0x80] sm:$0xff]  ;;  %v2663_v52 = vpack.c.bf16 %v3019_v51, %v3018_v49 }
0x19b2   :  { %3410 = vmatmul.mubr.msk.bf16.vlgmr.msra.gmra.mrb[76].mxu1 %vm364_vm6, %v2338_v22  ;;  %v3015_v22 = vld [vmem:[%s4796_s11 + $0x88] sm:$0xff] }
0x19b3   :  { %3433 = vmatprep.mubr.msk.bf16.mxu1 %vm3637_vm2, %v3636_v33  ;;  %3418 = vmatpush3.bf16.msra.mxu0 %v2477_v28  ;;  %v2661_v43 = vpack.c.bf16 %v3015_v22, %v3014_v21  ;;  %v3021_v28 = vld [vmem:[%s4796_s11 + $0xb8] sm:$0xff] }
0x19b4   :  { %3419 = vmatprep.subr.bf16.mxu0 %v3636_v33  ;;  %3426 = vmatpush3.bf16.msra.mxu1 %v2585_v44  ;;  %v2664_v18 = vpack.c.bf16 %v3021_v28, %v3020_v53 }
0x19b5   :  { %3427 = vmatprep.subr.bf16.mxu1 %v3636_v33 }
0x19b7   :  { %3420 = vmatpush3.bf16.msra.mxu0 %v2478_v56  ;;  %v3023_v56 = vld [vmem:[%s4796_s11 + $0xc8] sm:$0xff] }
0x19b8   :  { %3437 = vmatprep.subr.bf16.mxu0 %v3636_v33  ;;  %3428 = vmatpush3.bf16.msra.mxu1 %v2586_v34 }
0x19b9   :  { %3429 = vmatprep.subr.bf16.mxu1 %v3636_v33 }
0x19bc   :  { %3430 = vmatpush3.bf16.msra.mxu1 %v2587_v40 }
0x19bd   :  { %3431 = vmatprep.subr.bf16.mxu1 %v3636_v33 }
0x19c0   :  { %3432 = vmatpush3.bf16.msra.mxu1 %v2588_v12 }
0x19c1   :  { %3457 = vmatprep.subr.bf16.mxu1 %v3636_v33 }
0x1a7d   :  { %v2381_v58 = vpop.f32.mrb[68].mxu0 }
0x1a7e   :  { %v3405_v59 = vpop.f32.mrb[69].mxu0 }
0x1a7f   :  { %v2384_v60 = vpop.f32.mrb[70].mxu0  ;;  %v3024_v59 = vld [vmem:[%s4796_s11 + $0xd0] sm:$0xff] }
0x1a80   :  { %v3406_v61 = vpop.f32.mrb[71].mxu0  ;;  %v3025_v60 = vld [vmem:[%s4796_s11 + $0xd8] sm:$0xff] }
0x1a81   :  { %v2666_v61 = vpack.c.bf16 %v3025_v60, %v3024_v59  ;;  %v2772_v60 = vld [vmem:[%s4800_s15 + $0x10] sm:$0xff] }
0x1a85   :  { %v2429_v30 = vpop.f32.mrb[76].mxu1 }
0x1a86   :  { %v3526_v36 = vpack.i.bf16 %v2429_v30, %v2381_v58  ;;  %v3411_v57 = vpop.f32.mrb[77].mxu1  ;;  %v2665_v58 = vpack.c.bf16 %v3023_v56, %v3022_v55  ;;  %v2770_v56 = vld [vmem:[%s4800_s15] sm:$0xff] }
0x1a87   :  { %v2432_v62 = vpop.f32.mrb[78].mxu1 }
0x1a88   :  { %3527 = vrot.lane.b32.xlu0 %v3526_v36, %s3640_s21  ;;  %v3412_v31 = vpop.f32.mrb[79].mxu1 }
0x1afa   :  { %v3528_v29 = vpop.permute.xlu0 %3527 }
0x1afb   :  { %v3530_v7 = vunpack.i.h.bf16 %v3528_v29  ;;  %v3529_v9 = vunpack.i.l.bf16 %v3528_v29 }
0x1afd   :  { %v2464_v39 = vsel %vm1177_vm8, %v2462_v13, %v3530_v7  ;;  %v2463_v50 = vsel %vm1177_vm8, %v2461_v11, %v3529_v9  ;;  %v3001_v11 = vld [vmem:[%s4792_s7 + $0x1] ss:$0 sm:$0xff] }
0x1afe   :  { %v2474_v15 = vpack.c.bf16 %v2464_v39, %v2463_v50 }
0x1b00   :  { %3422 = vmatmul.mubr.msk.bf16.vlgmr.msra.gmra.mrb[72].mxu0 %vm212_vm1, %v2474_v15 }
0x1b01   :  { %3453 = vmatprep.mubr.msk.bf16.mxu0 %vm3637_vm2, %v3636_v33  ;;  %3438 = vmatpush3.bf16.msra.mxu0 %v2661_v43 }
0x1b02   :  { %3439 = vmatprep.subr.bf16.mxu0 %v3636_v33 }
0x1b05   :  { %3440 = vmatpush3.bf16.msra.mxu0 %v2662_v47 }
0x1b06   :  { %3441 = vmatprep.subr.bf16.mxu0 %v3636_v33 }
0x1b09   :  { %3442 = vmatpush3.bf16.msra.mxu0 %v2663_v52 }
0x1b0a   :  { %3443 = vmatprep.subr.bf16.mxu0 %v3636_v33 }
0x1b0d   :  { %3444 = vmatpush3.bf16.msra.mxu0 %v2664_v18 }
0x1b0e   :  { %3445 = vmatprep.subr.bf16.mxu0 %v3636_v33 }
0x1b11   :  { %3446 = vmatpush3.bf16.msra.mxu0 %v2665_v58  ;;  %v2771_v58 = vld [vmem:[%s4800_s15 + $0x8] sm:$0xff] }
0x1b12   :  { %3447 = vmatprep.subr.bf16.mxu0 %v3636_v33  ;;  %v2780_v59 = vpack.c.bf16 %v2771_v58, %v2770_v56  ;;  %v2855_v56 = vld [vmem:[%s4802_s17 + $0x60] sm:$0xff]  ;;  %v2856_v58 = vld [vmem:[%s4802_s17 + $0x68] sm:$0xff] }
0x1b15   :  { %3448 = vmatpush3.bf16.msra.mxu0 %v2666_v61  ;;  %v2773_v61 = vld [vmem:[%s4800_s15 + $0x18] sm:$0xff] }
0x1b16   :  { %3449 = vmatprep.subr.bf16.mxu0 %v3636_v33 }
0x1bd3   :  { %v2516_v3 = vpop.f32.mrb[72].mxu0 }
0x1bd4   :  { %v4556_v16 = vadd.f32 %v2516_v3, %v4331_v4  ;;  %v3423_v23 = vpop.f32.mrb[73].mxu0 }
0x1bd5   :  { %v2519_v17 = vpop.f32.mrb[74].mxu0  ;;  %v3002_v23 = vld [vmem:[%s4793_s8 + $0x1] ss:$0 sm:$0xff] }
0x1bd6   :  { %v4559_v19 = vadd.f32 %v2519_v17, %v4333_v5  ;;  %v3424_v54 = vpop.f32.mrb[75].mxu0  ;;  %v2529_v20 = vsel %vm212_vm1, %v4556_v16, 0.0  ;;  %v2537_v4 = vmul.f32 %v4556_v16, %v4556_v16 }
0x1bd7   :  { %2530 = vadd.xlane.f32.xlu1 %v2529_v20 }
0x1bd8   :  { %v2532_v24 = vsel %vm212_vm1, %v4559_v19, 0.0  ;;  %v2538_v25 = vmul.f32 %v4559_v19, %v4559_v19  ;;  %v2539_v5 = vsel %vm212_vm1, %v2537_v4, 0.0  ;;  %v3028_v4 = vld [vmem:[%s4796_s11 + $0xf0] sm:$0xff] }
0x1bd9   :  { %2533 = vadd.xlane.f32.xlu0 %v2532_v24 }
0x1bda   :  { %v2542_v26 = vsel %vm212_vm1, %v2538_v25, 0.0 }
0x1bdb   :  { %2543 = vadd.xlane.f32.xlu1 %v2542_v26  ;;  %v3029_v26 = vld [vmem:[%s4796_s11 + $0xf8] sm:$0xff] }
0x1bdd   :  { %2540 = vadd.xlane.f32.xlu0 %v2539_v5  ;;  %v2668_v5 = vpack.c.bf16 %v3029_v26, %v3028_v4 }
0x1c64   :  { %v2531_v30 = vpop.xlane.xlu1 %2530 }
0x1c65   :  { %v2535_v57 = vmul.f32 0.015625, %v2531_v30  ;;  %v2781_v30 = vpack.c.bf16 %v2773_v61, %v2772_v60  ;;  %v2857_v60 = vld [vmem:[%s4802_s17 + $0x70] sm:$0xff]  ;;  %v2858_v61 = vld [vmem:[%s4802_s17 + $0x78] sm:$0xff] }
0x1c66   :  { %v2534_v36 = vpop.xlane.xlu0 %2533 }
0x1c67   :  { %v2536_v62 = vmul.f32 0.015625, %v2534_v36  ;;  %v2547_v46 = vmul.f32 %v2535_v57, %v2535_v57  ;;  %v2551_v13 = vsub.f32 %v4556_v16, %v2535_v57  ;;  %v3026_v16 = vld [vmem:[%s4796_s11 + $0xe0] sm:$0xff]  ;;  %v2775_v57 = vld [vmem:[%s4800_s15 + $0x28] sm:$0xff] }
0x1c68   :  { %v2544_v31 = vpop.xlane.xlu1 %2543  ;;  %v2774_v36 = vld [vmem:[%s4800_s15 + $0x20] sm:$0xff] }
0x1c69   :  { %v2548_v14 = vmul.f32 %v2536_v62, %v2536_v62  ;;  %v2546_v63 = vmul.f32 0.015625, %v2544_v31  ;;  %v2552_v7 = vsub.f32 %v4559_v19, %v2536_v62  ;;  %v3027_v19 = vld [vmem:[%s4796_s11 + $0xe8] sm:$0xff]  ;;  %v2782_v62 = vpack.c.bf16 %v2775_v57, %v2774_v36  ;;  %v2776_v31 = vld [vmem:[%s4800_s15 + $0x30] sm:$0xff]  ;;  %v3036_v36 = vld [vmem:[%s4801_s16] ss:$0 sm:$0xff] }
0x1c6a   :  { %v2541_v35 = vpop.xlane.xlu0 %2540  ;;  %v2667_v25 = vpack.c.bf16 %v3027_v19, %v3026_v16  ;;  %v3035_v16 = vld [vmem:[%s4799_s14 + $0x1] ss:$0 sm:$0xff] }
0x1c6b   :  { %v2550_v48 = vsub.f32 %v2546_v63, %v2548_v14  ;;  %v2545_v1 = vmul.f32 0.015625, %v2541_v35  ;;  %v2777_v14 = vld [vmem:[%s4800_s15 + $0x38] sm:$0xff] }
0x1c6c   :  { %3450 = vmatpush3.bf16.msra.mxu0 %v2667_v25  ;;  %v2783_v63 = vpack.c.bf16 %v2777_v14, %v2776_v31 }
0x1c6d   :  { %v2554_v29 = vadd.f32 1e-05, %v2550_v48  ;;  %v2549_v2 = vsub.f32 %v2545_v1, %v2547_v46  ;;  %3451 = vmatprep.subr.bf16.mxu0 %v3636_v33 }
0x1c6f   :  { %3603 = vrsqrt.f32 %v2554_v29  ;;  %v2553_v6 = vadd.f32 1e-05, %v2549_v2 }
0x1c70   :  { %3452 = vmatpush3.bf16.msra.mxu0 %v2668_v5 }
0x1c71   :  { %3605 = vrsqrt.f32 %v2553_v6 }
0x1c79   :  { %v3604_v9 = vpop.eup %3603 }
0x1c7a   :  { %v2558_v39 = vmul.f32 %v3604_v9, %v2552_v7 }
0x1c7b   :  { %v3606_v50 = vpop.eup %3605 }
0x1c7c   :  { %v2557_v15 = vmul.f32 %v3606_v50, %v2551_v13  ;;  %v2566_v3 = vmul.f32 %v3001_v11, %v2558_v39 }
0x1c7e   :  { %v2565_v17 = vmul.f32 %v3001_v11, %v2557_v15  ;;  %v2574_v20 = vadd.f32 %v3002_v23, %v2566_v3 }
0x1c80   :  { %v2573_v54 = vadd.f32 %v3002_v23, %v2565_v17  ;;  %v3034_v17 = vld [vmem:[%s4798_s13 + $0x1] ss:$0 sm:$0xff] }
0x1c82   :  { %v2584_v24 = vpack.c.bf16 %v2574_v20, %v2573_v54 }
0x1c84   :  { %3434 = vmatmul.mubr.msk.bf16.vlgmr.msra.gmra.mrb[80].mxu1 %vm212_vm1, %v2584_v24 }
0x1c85   :  { %3465 = vmatprep.mubr.msk.bf16.mxu1 %vm3637_vm2, %v3636_v33  ;;  %3458 = vmatpush3.bf16.msra.mxu1 %v2780_v59  ;;  %v2866_v59 = vpack.c.bf16 %v2856_v58, %v2855_v56 }
0x1c86   :  { %3459 = vmatprep.subr.bf16.mxu1 %v3636_v33 }
0x1c89   :  { %3460 = vmatpush3.bf16.msra.mxu1 %v2781_v30  ;;  %v2867_v30 = vpack.c.bf16 %v2858_v61, %v2857_v60 }
0x1c8a   :  { %3461 = vmatprep.subr.bf16.mxu1 %v3636_v33 }
0x1c8d   :  { %3462 = vmatpush3.bf16.msra.mxu1 %v2782_v62 }
0x1c8e   :  { %3463 = vmatprep.subr.bf16.mxu1 %v3636_v33 }
0x1c91   :  { %3464 = vmatpush3.bf16.msra.mxu1 %v2783_v63 }
0x1c92   :  { %3469 = vmatprep.subr.bf16.mxu1 %v3636_v33 }
0x1d57   :  { %v2634_v0 = vpop.f32.mrb[80].mxu1 }
0x1d58   :  { %v2635_v44 = vadd.f32 %v3012_v10, %v2634_v0  ;;  %v3435_v27 = vpop.f32.mrb[81].mxu1 }
0x1d59   :  { %v2637_v32 = vpop.f32.mrb[82].mxu1  ;;  %v2843_v27 = vld [vmem:[%s4802_s17] sm:$0xff] }
0x1d5a   :  { %v2638_v34 = vadd.f32 %v3012_v10, %v2637_v32  ;;  %v3436_v37 = vpop.f32.mrb[83].mxu1  ;;  %v2641_v38 = vmax.f32 %v2635_v44, 0.0  ;;  %v2844_v32 = vld [vmem:[%s4802_s17 + $0x8] sm:$0xff] }
0x1d5c   :  { %v2642_v40 = vmax.f32 %v2638_v34, 0.0 }
0x1d5e   :  { %v2660_v41 = vpack.c.bf16 %v2642_v40, %v2641_v38  ;;  %v2860_v40 = vpack.c.bf16 %v2844_v32, %v2843_v27 }
0x1d60   :  { %3454 = vmatmul.mubr.bf16.vlgmr.msra.gmra.mrb[76].mxu0 %v2660_v41 }
0x1e33   :  { %v2711_v12 = vpop.f32.mrb[76].mxu0 }
0x1e34   :  { %v2712_v21 = vadd.f32 %v3031_v8, %v2711_v12  ;;  %v3455_v22 = vpop.f32.mrb[77].mxu0  ;;  %v2846_v12 = vld [vmem:[%s4802_s17 + $0x18] sm:$0xff] }
0x1e35   :  { %v2714_v42 = vpop.f32.mrb[78].mxu0  ;;  %v2847_v22 = vld [vmem:[%s4802_s17 + $0x20] sm:$0xff] }
0x1e36   :  { %v2718_v43 = vadd.f32 %v2712_v21, %v2573_v54  ;;  %v2715_v45 = vadd.f32 %v3031_v8, %v2714_v42  ;;  %v3456_v47 = vpop.f32.mrb[79].mxu0  ;;  %v2845_v8 = vld [vmem:[%s4802_s17 + $0x10] sm:$0xff]  ;;  %v2848_v42 = vld [vmem:[%s4802_s17 + $0x28] sm:$0xff] }
0x1e37   :  { %v2861_v21 = vpack.c.bf16 %v2846_v12, %v2845_v8  ;;  %v2850_v47 = vld [vmem:[%s4802_s17 + $0x38] sm:$0xff] }
0x1e38   :  { %v2719_v49 = vadd.f32 %v2715_v45, %v2574_v20  ;;  %v2724_v51 = vsel %vm212_vm1, %v2718_v43, 0.0  ;;  %v2732_v52 = vmul.f32 %v2718_v43, %v2718_v43  ;;  %v2849_v45 = vld [vmem:[%s4802_s17 + $0x30] sm:$0xff] }
0x1e39   :  { %2725 = vadd.xlane.f32.xlu1 %v2724_v51  ;;  %v2851_v51 = vld [vmem:[%s4802_s17 + $0x40] sm:$0xff] }
0x1e3a   :  { %v2727_v53 = vsel %vm212_vm1, %v2719_v49, 0.0  ;;  %v2733_v28 = vmul.f32 %v2719_v49, %v2719_v49  ;;  %v2734_v18 = vsel %vm212_vm1, %v2732_v52, 0.0  ;;  %v2852_v52 = vld [vmem:[%s4802_s17 + $0x48] sm:$0xff] }
0x1e3b   :  { %2728 = vadd.xlane.f32.xlu0 %v2727_v53  ;;  %v2864_v53 = vpack.c.bf16 %v2852_v52, %v2851_v51 }
0x1e3c   :  { %v2737_v55 = vsel %vm212_vm1, %v2733_v28, 0.0  ;;  %v2853_v28 = vld [vmem:[%s4802_s17 + $0x50] sm:$0xff] }
0x1e3d   :  { %2735 = vadd.xlane.f32.xlu1 %v2734_v18  ;;  %v2854_v18 = vld [vmem:[%s4802_s17 + $0x58] sm:$0xff]  ;;  %s2922_s17 = sshll.u32 %s3646_s12, 4  ;;  %s2923_s17 = int_to_ptr.vmem [resolvable:$true] %s2922_s17 }
0x1e3e   :  { %s3611_s16 = scalar_lea.vmem %s2923_s17, 32  ;;  %p3616_p1 = scmp.lt.s32.totalorder %s2923_s17, %s2923_s17 }
0x1e3f   :  { %2738 = vadd.xlane.f32.xlu0 %v2737_v55  ;;  %v2865_v55 = vpack.c.bf16 %v2854_v18, %v2853_v28  ;;  %p3612_p0 = scmp.ne.s32.totalorder %s2923_s17, %s3611_s16  ;;  %p3617_p2 = scmp.lt.s32.totalorder %s3611_s16, %s3611_s16 }
0x1e41   :  { %p3618_p3 = por %p3617_p2, %p3616_p1 }
0x1e43   :  { %p3619_p4 = pnand %p3618_p3, %p3612_p0 }
0x1ec6   :  { %v2726_v35 = vpop.xlane.xlu1 %2725 }
0x1ec7   :  { %v2730_v46 = vmul.f32 0.015625, %v2726_v35 }
0x1ec8   :  { %v2729_v48 = vpop.xlane.xlu0 %2728 }
0x1ec9   :  { %v2731_v1 = vmul.f32 0.015625, %v2729_v48  ;;  %v2742_v2 = vmul.f32 %v2730_v46, %v2730_v46  ;;  %v2746_v3 = vsub.f32 %v2718_v43, %v2730_v46  ;;  %v2862_v43 = vpack.c.bf16 %v2848_v42, %v2847_v22  ;;  %v3038_v46 = vld [vmem:[%s4803_s18] ss:$0 sm:$0xff] }
0x1eca   :  { %v2736_v29 = vpop.xlane.xlu1 %2735 }
0x1ecb   :  { %v2740_v6 = vmul.f32 0.015625, %v2736_v29  ;;  %v2743_v9 = vmul.f32 %v2731_v1, %v2731_v1  ;;  %v2747_v54 = vsub.f32 %v2719_v49, %v2731_v1  ;;  %v2863_v49 = vpack.c.bf16 %v2850_v47, %v2849_v45 }
0x1ecc   :  { %v2739_v7 = vpop.xlane.xlu0 %2738 }
0x1ecd   :  { %v2744_v11 = vsub.f32 %v2740_v6, %v2742_v2  ;;  %v2741_v13 = vmul.f32 0.015625, %v2739_v7 }
0x1ecf   :  { %v2748_v39 = vadd.f32 1e-05, %v2744_v11  ;;  %v2745_v50 = vsub.f32 %v2741_v13, %v2743_v9 }
0x1ed1   :  { %3607 = vrsqrt.f32 %v2748_v39  ;;  %v2749_v15 = vadd.f32 1e-05, %v2745_v50 }
0x1ed3   :  { %3609 = vrsqrt.f32 %v2749_v15 }
0x1edb   :  { %v3608_v23 = vpop.eup %3607 }
0x1edc   :  { %v2752_v20 = vmul.f32 %v3608_v23, %v2746_v3 }
0x1edd   :  { %v3610_v24 = vpop.eup %3609 }
0x1ede   :  { %v2760_v19 = vmul.f32 %v3034_v17, %v2752_v20  ;;  %v2753_v25 = vmul.f32 %v3610_v24, %v2747_v54 }
0x1ee0   :  { %v2761_v4 = vmul.f32 %v3034_v17, %v2753_v25  ;;  %v2768_v26 = vadd.f32 %v3035_v16, %v2760_v19 }
0x1ee2   :  { %v2769_v5 = vadd.f32 %v3035_v16, %v2761_v4  ;;  %v2778_v10 = vpack.c.bf16 %v2768_v26, %v2768_v26 }
0x1ee4   :  { %v2779_v0 = vpack.c.bf16 %v2769_v5, %v2769_v5  ;;  %v2793_v34 = vunpack.c.l.b16 %v2778_v10 }
0x1ee6   :  { %v2794_v44 = vunpack.c.l.b16 %v2779_v0 }
0x1ee8   :  { %v2795_v37 = vrot.slane %v2794_v44, 7 }
0x1eea   :  { %v2797_v38 = vsel %vm2796_vm9, %v2795_v37, %v2793_v34 }
0x1eeb   :  { %v2798_v41 = vpack.c.b16 %v2797_v38, %v2797_v38 }
0x1eed   :  { %3466 = vmatmul.mubr.msk.bf16.vlgmr.msra.gmra.mrb[84].mxu1 %vm212_vm1, %v2798_v41 }
0x1eee   :  { %3470 = vmatpush3.bf16.msra.mxu1 %v2860_v40  ;;  %3485 = vmatprep.mubr.msk.bf16.mxu1 %vm3637_vm2, %v3636_v33 }
0x1eef   :  { %3471 = vmatprep.subr.bf16.mxu1 %v3636_v33 }
0x1ef2   :  { %3472 = vmatpush3.bf16.msra.mxu1 %v2861_v21 }
0x1ef3   :  { %3473 = vmatprep.subr.bf16.mxu1 %v3636_v33 }
0x1ef6   :  { %3474 = vmatpush3.bf16.msra.mxu1 %v2862_v43 }
0x1ef7   :  { %3475 = vmatprep.subr.bf16.mxu1 %v3636_v33 }
0x1efa   :  { %3476 = vmatpush3.bf16.msra.mxu1 %v2863_v49 }
0x1efb   :  { %3477 = vmatprep.subr.bf16.mxu1 %v3636_v33 }
0x1efe   :  { %3478 = vmatpush3.bf16.msra.mxu1 %v2864_v53 }
0x1eff   :  { %3479 = vmatprep.subr.bf16.mxu1 %v3636_v33 }
0x1f02   :  { %3480 = vmatpush3.bf16.msra.mxu1 %v2865_v55 }
0x1f03   :  { %3481 = vmatprep.subr.bf16.mxu1 %v3636_v33 }
0x1f06   :  { %3482 = vmatpush3.bf16.msra.mxu1 %v2866_v59 }
0x1f07   :  { %3483 = vmatprep.subr.bf16.mxu1 %v3636_v33 }
0x1f0a   :  { %3484 = vmatpush3.bf16.msra.mxu1 %v2867_v30 }
0x1fc0   :  { %v2836_v57 = vpop.f32.mrb[84].mxu1 }
0x1fc1   :  { %v2837_v62 = vadd.f32 %v3036_v36, %v2836_v57  ;;  %v3467_v31 = vpop.f32.mrb[85].mxu1 }
0x1fc2   :  { %v2839_v14 = vpop.f32.mrb[86].mxu1 }
0x1fc3   :  { %v2842_v63 = vmax.f32 %v2837_v62, 0.0  ;;  %v3468_v33 = vpop.f32.mrb[87].mxu1 }
0x1fc5   :  { %v2859_v35 = vpack.c.bf16 %v2842_v63, %v2842_v63 }
0x1fc7   :  { %3486 = vmatmul.mubr.bf16.vlgmr.msra.gmra.mrb[88].mxu1 %v2859_v35 }
0x209a   :  { %v2909_v48 = vpop.f32.mrb[88].mxu1 }
0x209b   :  { %v2910_v1 = vadd.f32 %v3038_v46, %v2909_v48  ;;  %v3487_v29 = vpop.f32.mrb[89].mxu1 }
0x209c   :  { %v2912_v2 = vpop.f32.mrb[90].mxu1 }
0x209d   :  { %2915 = vst [vmem:[#allocation2] sm:$0x3] %v2910_v1  ;;  %v3488_v6 = vpop.f32.mrb[91].mxu1 }
0x209e   :  { %3622 = shalt.err (!%p3619_p4)
}
0x209f   :  { %s3623_s18 = scalar_lea.hbm %s4804_s19, 32 }
0x20a0   :  { %p3624_p5 = scmp.ne.s32.totalorder %s4804_s19, %s3623_s18  ;;  %p3627_p6 = scmp.lt.u32.totalorder %s3623_s18, %s4804_s19 }
0x20a2   :  { %p3629_p7 = pnand %p3627_p6, %p3624_p5 }
0x20a4   :  { %3632 = shalt.err (!%p3629_p7)
}
0x20a5   :  { %2925 = dma.vmem_to_hbm [thread:$0]  %s2923_s17, 32, %s4804_s19, [#allocation3]  }
0x20a6   :  { %3633 = dma.done.wait [#allocation3], 32  }
0x20a7   :  { %3634 = vsyncadd [#allocation3], 4294967264 }
0x20a8   :  { %2929 = vsyncpa [#allocation3], 1 }

</bundles_post_ra>
